<compile_context>
chip_gen: v7x
topology: tpu7x:2x2x1
jax: 0.10.0
libtpu: 0.0.40
codegen_flags: <defaults>
</compile_context>

<pallas_src>
import math

import jax
import jax.numpy as jnp
from jax.experimental import pallas as pl

# Config mirroring CnnEncoder.__init__ constraints:
#   num_filters * len(n_gram) must equal 900 (hard-coded nn.Linear(900, 600))
#   filter_height == ninp so the conv output height is 1 (squeeze(2) works)
NTOKEN = 50
NTOK_PAD = 64                   # embedding table padded to 64 rows (zeros)
NINP = 32                       # embedding dim == conv filter height
NUM_FILTERS = 300
N_GRAM = (3, 4, 5)              # 300 * 3 = 900
BOTTLE_IN = NUM_FILTERS * len(N_GRAM)   # 900
BOTTLE_OUT = 600
BOTTLE_PAD = 640                # lane-dense (5*128) padded output width
SEQ = 8
BATCH = 2


def _cnn_encoder_kernel(tok_ref, emb_ref, w_ref, wb_ref, bias_ref, out_ref):
    """Fused encoder: embed+pad (one-hot matmul) -> convs -> max-pool -> bottleneck -> tanh."""
    m_rows = out_ref.shape[0]                      # 2 * batch (both inputs batched)
    s_pad = tok_ref.shape[0] // m_rows             # seq + 2
    d = emb_ref.shape[1]                           # ninp
    nf = w_ref.shape[1]                            # num_filters
    n_tok_pad = emb_ref.shape[0]

    # --- fused embedding lookup + zero padding ------------------------------
    # one-hot (M, 64) @ (64, 32); pad positions carry sentinel id -1 so their
    # one-hot row is all zeros -> exact literal-zero padding.
    ids = tok_ref[...]                                                   # (M, 1) int32
    iota = jax.lax.broadcasted_iota(jnp.int32, (m_rows * s_pad, n_tok_pad), 1)
    onehot = (iota == ids).astype(jnp.bfloat16)                          # (M, 64)
    x = jnp.dot(onehot, emb_ref[...], preferred_element_type=jnp.float32)
    x_bf = x.astype(jnp.bfloat16).reshape(m_rows, s_pad, d)              # (2B, S+2, D)

    # --- per-n-gram conv (im2col matmul) + max-pool + bias + bottleneck -----
    r = None
    row = 0
    for g, k in enumerate(N_GRAM):
        kd = k * d
        t_out = s_pad - k + 1
        # im2col: one (2B*T, k*D) @ (k*D, NF) matmul per n-gram (feature order
        # w-major, d-minor — matches the packed weight layout).
        cols = jnp.concatenate(
            [x_bf[:, w:w + t_out, :] for w in range(k)], axis=-1)        # (2B, T, k*D)
        conv = jnp.dot(cols.reshape(m_rows * t_out, kd),
                       w_ref[row:row + kd, :],
                       preferred_element_type=jnp.float32)               # (2B*T, NF)
        conv = conv.reshape(m_rows, t_out, nf)
        # max-pool over seq, then bias (max(x + b) == max(x) + b).
        pooled = jnp.max(conv, axis=1) + bias_ref[g:g + 1, :NUM_FILTERS]  # (2B, NF) f32
        # Bottleneck split per n-gram: avoids the non-128-aligned 900-wide concat.
        contrib = jnp.dot(pooled.astype(jnp.bfloat16), wb_ref[g],
                          preferred_element_type=jnp.float32)             # (2B, 640) f32
        r = contrib if r is None else r + contrib
        row += kd

    # Row 3 of the bias pack is the bottleneck bias (zero in the padded lanes).
    out_ref[...] = jnp.tanh(r + bias_ref[len(N_GRAM):len(N_GRAM) + 1, :]).astype(out_ref.dtype)


def cnn_encoder_forward(input1, input2, params):
    """Equivalent of CnnEncoder.forward (dropout in eval mode = identity)."""
    s, b = input1.shape
    s_pad = s + 2
    m_rows = 2 * b

    # Pack both token sequences into one (2*B*(S+2), 1) int32 block, row order
    # (input, batch, seq), with -1 sentinels at the zero-pad positions.
    tok = jnp.stack([input1, input2], axis=0).transpose(0, 2, 1)   # (2, B, S)
    pad = jnp.full((2, b, 1), -1, jnp.int32)
    tok = jnp.concatenate([pad, tok, pad], axis=2)                 # (2, B, S+2)
    tok = tok.reshape(m_rows * s_pad, 1)

    out = pl.pallas_call(
        _cnn_encoder_kernel,
        out_shape=jax.ShapeDtypeStruct((m_rows, BOTTLE_PAD), jnp.float32),
        grid=(1,),
        in_specs=[
            pl.BlockSpec(tok.shape, lambda i: (0, 0)),               # token ids
            pl.BlockSpec(params['emb'].shape, lambda i: (0, 0)),     # bf16 emb table
            pl.BlockSpec(params['w_conv'].shape, lambda i: (0, 0)),  # packed conv weights
            pl.BlockSpec(params['wb'].shape, lambda i: (0, 0, 0)),   # per-n-gram bottleneck
            pl.BlockSpec(params['bias'].shape, lambda i: (0, 0)),    # packed biases
        ],
        out_specs=pl.BlockSpec((m_rows, BOTTLE_PAD), lambda i: (0, 0)),
    )(tok, params['emb'], params['w_conv'], params['wb'], params['bias'])

    r = out[:, :BOTTLE_OUT]                     # drop the 600..640 lane padding
    return r[:b], r[b:], None, None


def init_params(key):
    """Deterministic parameter init (shapes follow the module's __init__)."""
    ks = jax.random.split(key, 9)
    emb = jax.random.normal(ks[0], (NTOKEN, NINP), jnp.float32) * 0.1
    emb = emb.at[0].set(0.0)          # <pad> row zeroed, as in Embed.__init__
    emb_pad = jnp.zeros((NTOK_PAD, NINP), jnp.float32).at[:NTOKEN].set(emb)
    params = {'emb': emb_pad.astype(jnp.bfloat16)}

    w_blocks, bias_rows = [], []
    for i, k in enumerate(N_GRAM):
        fan_in = 1 * NINP * k         # Conv2d(1, NF, (ninp, k)) fan-in
        bound = 1.0 / math.sqrt(fan_in)
        # PyTorch conv weight (NF, 1, ninp, k) -> permute to (k, ninp, NF) ->
        # reshape (k*ninp, NF): row = w*ninp + d, matching the kernel's im2col
        # feature order.  All three n-grams packed into one bf16 slab.
        w = jax.random.uniform(ks[1 + i], (k * NINP, NUM_FILTERS), jnp.float32,
                               -bound, bound)
        w_blocks.append(w)
        bconv = jax.random.uniform(ks[4 + i], (NUM_FILTERS,), jnp.float32,
                                   -bound, bound)
        bias_rows.append(jnp.zeros((BOTTLE_PAD,), jnp.float32).at[:NUM_FILTERS].set(bconv))
    params['w_conv'] = jnp.concatenate(w_blocks, axis=0).astype(jnp.bfloat16)  # (384, 300)

    lb = 1.0 / math.sqrt(BOTTLE_IN)
    # nn.Linear(900, 600): weight (600, 900) -> transpose (900, 600) -> pad cols
    # to 640 -> split per n-gram into (3, NF, 640); rows [g*NF:(g+1)*NF]
    # multiply pooled n-gram g.
    wb = jax.random.uniform(ks[7], (BOTTLE_IN, BOTTLE_OUT), jnp.float32, -lb, lb)
    wb_pad = jnp.zeros((BOTTLE_IN, BOTTLE_PAD), jnp.float32).at[:, :BOTTLE_OUT].set(wb)
    params['wb'] = wb_pad.reshape(len(N_GRAM), NUM_FILTERS, BOTTLE_PAD).astype(jnp.bfloat16)

    bb = jax.random.uniform(ks[8], (BOTTLE_OUT,), jnp.float32, -lb, lb)
    bias_rows.append(jnp.zeros((BOTTLE_PAD,), jnp.float32).at[:BOTTLE_OUT].set(bb))
    params['bias'] = jnp.stack(bias_rows, axis=0)     # (4, 640) f32: 3 conv biases + bottleneck bias
    return params


if __name__ == "__main__":
    key = jax.random.PRNGKey(0)
    pkey, k1, k2 = jax.random.split(key, 3)
    params = init_params(pkey)

    # Token-id inputs, shape (seq, batch), ids > 0 (0 is <pad>).
    input1 = jax.random.randint(k1, (SEQ, BATCH), 1, NTOKEN, dtype=jnp.int32)
    input2 = jax.random.randint(k2, (SEQ, BATCH), 1, NTOKEN, dtype=jnp.int32)

    r1, r2, attention, adist = cnn_encoder_forward(input1, input2, params)
    jax.block_until_ready((r1, r2))

    assert r1.shape == (BATCH, BOTTLE_OUT), r1.shape
    assert r2.shape == (BATCH, BOTTLE_OUT), r2.shape
    assert attention is None and adist is None
    assert bool(jnp.all(jnp.isfinite(r1))) and bool(jnp.all(jnp.isfinite(r2)))
    print("KERNEL_OK")
</pallas_src>

<mosaic_0001>
module attributes {stable_mosaic.version = 11 : i64} {
  func.func @_cnn_encoder_kernel(%arg0: i32, %arg1: memref<40x1xi32, #tpu.memory_space<vmem>>, %arg2: memref<64x32xbf16, #tpu.memory_space<vmem>>, %arg3: memref<384x300xbf16, #tpu.memory_space<vmem>>, %arg4: memref<3x300x640xbf16, #tpu.memory_space<vmem>>, %arg5: memref<4x640xf32, #tpu.memory_space<vmem>>, %arg6: memref<4x640xf32, #tpu.memory_space<vmem>>) attributes {dimension_semantics = [#tpu.dimension_semantics<arbitrary>], iteration_bounds = array<i64: 1>, scalar_prefetch = 0 : i64, scratch_operands = 0 : i64, tpu.core_type = #tpu.core_type<tc>, window_params = [{pipeline_mode = #tpu.pipeline_mode<synchronous>, transform_indices = @transform_0, window_bounds = array<i64: 40, 1>}, {pipeline_mode = #tpu.pipeline_mode<synchronous>, transform_indices = @transform_1, window_bounds = array<i64: 64, 32>}, {pipeline_mode = #tpu.pipeline_mode<synchronous>, transform_indices = @transform_2, window_bounds = array<i64: 384, 300>}, {pipeline_mode = #tpu.pipeline_mode<synchronous>, transform_indices = @transform_3, window_bounds = array<i64: 3, 300, 640>}, {pipeline_mode = #tpu.pipeline_mode<synchronous>, transform_indices = @transform_4, window_bounds = array<i64: 4, 640>}, {pipeline_mode = #tpu.pipeline_mode<synchronous>, transform_indices = @transform_5, window_bounds = array<i64: 4, 640>}]} {
    %c0 = arith.constant 0 : index
    %c0_0 = arith.constant 0 : index
    %0 = vector.load %arg1[%c0, %c0_0] : memref<40x1xi32, #tpu.memory_space<vmem>>, vector<40x1xi32>
    %1 = tpu.iota {dimensions = array<i32: 1>} : vector<40x64xi32>
    %2 = vector.broadcast %0 : vector<40x1xi32> to vector<40x64xi32>
    %3 = arith.cmpi eq, %1, %2 : vector<40x64xi32>
    %4 = arith.extui %3 : vector<40x64xi1> to vector<40x64xi32>
    %5 = arith.sitofp %4 : vector<40x64xi32> to vector<40x64xf32>
    %6 = arith.truncf %5 : vector<40x64xf32> to vector<40x64xbf16>
    %c0_1 = arith.constant 0 : index
    %c0_2 = arith.constant 0 : index
    %7 = vector.load %arg2[%c0_1, %c0_2] : memref<64x32xbf16, #tpu.memory_space<vmem>>, vector<64x32xbf16>
    %cst = arith.constant dense<0.000000e+00> : vector<40x32xf32>
    %8 = tpu.matmul %6, %7, %cst {dimension_numbers = #tpu.dot_dimension_numbers<[1], [0], [0], [1], [0, 0, 1, 1], [], []>} : vector<40x64xbf16>, vector<64x32xbf16>, vector<40x32xf32> -> vector<40x32xf32>
    %9 = arith.truncf %8 : vector<40x32xf32> to vector<40x32xbf16>
    %10 = vector.shape_cast %9 : vector<40x32xbf16> to vector<4x10x32xbf16>
    %11 = vector.extract_strided_slice %10 {offsets = [0, 0, 0], sizes = [4, 8, 32], strides = [1, 1, 1]} : vector<4x10x32xbf16> to vector<4x8x32xbf16>
    %12 = vector.extract_strided_slice %10 {offsets = [0, 1, 0], sizes = [4, 8, 32], strides = [1, 1, 1]} : vector<4x10x32xbf16> to vector<4x8x32xbf16>
    %13 = vector.extract_strided_slice %10 {offsets = [0, 2, 0], sizes = [4, 8, 32], strides = [1, 1, 1]} : vector<4x10x32xbf16> to vector<4x8x32xbf16>
    %14 = tpu.concatenate %11, %12, %13 in 2 : vector<4x8x32xbf16>, vector<4x8x32xbf16>, vector<4x8x32xbf16> -> vector<4x8x96xbf16>
    %15 = vector.shape_cast %14 : vector<4x8x96xbf16> to vector<32x96xbf16>
    %c0_3 = arith.constant 0 : index
    %c0_4 = arith.constant 0 : index
    %16 = vector.load %arg3[%c0_3, %c0_4] : memref<384x300xbf16, #tpu.memory_space<vmem>>, vector<96x300xbf16>
    %cst_5 = arith.constant dense<0.000000e+00> : vector<32x300xf32>
    %17 = tpu.matmul %15, %16, %cst_5 {dimension_numbers = #tpu.dot_dimension_numbers<[1], [0], [0], [1], [0, 0, 1, 1], [], []>} : vector<32x96xbf16>, vector<96x300xbf16>, vector<32x300xf32> -> vector<32x300xf32>
    %18 = vector.shape_cast %17 : vector<32x300xf32> to vector<4x8x300xf32>
    %cst_6 = arith.constant dense<0xFF800000> : vector<4x300xf32>
    %19 = vector.multi_reduction <maximumf>, %18, %cst_6 [1] : vector<4x8x300xf32> to vector<4x300xf32>
    %c0_7 = arith.constant 0 : index
    %c0_8 = arith.constant 0 : index
    %20 = vector.load %arg5[%c0_7, %c0_8] : memref<4x640xf32, #tpu.memory_space<vmem>>, vector<1x300xf32>
    %21 = vector.broadcast %20 : vector<1x300xf32> to vector<4x300xf32>
    %22 = arith.addf %19, %21 : vector<4x300xf32>
    %23 = arith.truncf %22 : vector<4x300xf32> to vector<4x300xbf16>
    %c0_9 = arith.constant 0 : index
    %c0_10 = arith.constant 0 : index
    %c0_11 = arith.constant 0 : index
    %24 = vector.load %arg4[%c0_9, %c0_10, %c0_11] : memref<3x300x640xbf16, #tpu.memory_space<vmem>>, vector<1x300x640xbf16>
    %25 = vector.shape_cast %24 : vector<1x300x640xbf16> to vector<300x640xbf16>
    %cst_12 = arith.constant dense<0.000000e+00> : vector<4x640xf32>
    %26 = tpu.matmul %23, %25, %cst_12 {dimension_numbers = #tpu.dot_dimension_numbers<[1], [0], [0], [1], [0, 0, 1, 1], [], []>} : vector<4x300xbf16>, vector<300x640xbf16>, vector<4x640xf32> -> vector<4x640xf32>
    %27 = vector.extract_strided_slice %10 {offsets = [0, 0, 0], sizes = [4, 7, 32], strides = [1, 1, 1]} : vector<4x10x32xbf16> to vector<4x7x32xbf16>
    %28 = vector.extract_strided_slice %10 {offsets = [0, 1, 0], sizes = [4, 7, 32], strides = [1, 1, 1]} : vector<4x10x32xbf16> to vector<4x7x32xbf16>
    %29 = vector.extract_strided_slice %10 {offsets = [0, 2, 0], sizes = [4, 7, 32], strides = [1, 1, 1]} : vector<4x10x32xbf16> to vector<4x7x32xbf16>
    %30 = vector.extract_strided_slice %10 {offsets = [0, 3, 0], sizes = [4, 7, 32], strides = [1, 1, 1]} : vector<4x10x32xbf16> to vector<4x7x32xbf16>
    %31 = tpu.concatenate %27, %28, %29, %30 in 2 : vector<4x7x32xbf16>, vector<4x7x32xbf16>, vector<4x7x32xbf16>, vector<4x7x32xbf16> -> vector<4x7x128xbf16>
    %32 = vector.shape_cast %31 : vector<4x7x128xbf16> to vector<28x128xbf16>
    %c96 = arith.constant 96 : index
    %c0_13 = arith.constant 0 : index
    %33 = vector.load %arg3[%c96, %c0_13] : memref<384x300xbf16, #tpu.memory_space<vmem>>, vector<128x300xbf16>
    %cst_14 = arith.constant dense<0.000000e+00> : vector<28x300xf32>
    %34 = tpu.matmul %32, %33, %cst_14 {dimension_numbers = #tpu.dot_dimension_numbers<[1], [0], [0], [1], [0, 0, 1, 1], [], []>} : vector<28x128xbf16>, vector<128x300xbf16>, vector<28x300xf32> -> vector<28x300xf32>
    %35 = vector.shape_cast %34 : vector<28x300xf32> to vector<4x7x300xf32>
    %cst_15 = arith.constant dense<0xFF800000> : vector<4x300xf32>
    %36 = vector.multi_reduction <maximumf>, %35, %cst_15 [1] : vector<4x7x300xf32> to vector<4x300xf32>
    %c1 = arith.constant 1 : index
    %c0_16 = arith.constant 0 : index
    %37 = vector.load %arg5[%c1, %c0_16] : memref<4x640xf32, #tpu.memory_space<vmem>>, vector<1x300xf32>
    %38 = vector.broadcast %37 : vector<1x300xf32> to vector<4x300xf32>
    %39 = arith.addf %36, %38 : vector<4x300xf32>
    %40 = arith.truncf %39 : vector<4x300xf32> to vector<4x300xbf16>
    %c1_17 = arith.constant 1 : index
    %c0_18 = arith.constant 0 : index
    %c0_19 = arith.constant 0 : index
    %41 = vector.load %arg4[%c1_17, %c0_18, %c0_19] : memref<3x300x640xbf16, #tpu.memory_space<vmem>>, vector<1x300x640xbf16>
    %42 = vector.shape_cast %41 : vector<1x300x640xbf16> to vector<300x640xbf16>
    %cst_20 = arith.constant dense<0.000000e+00> : vector<4x640xf32>
    %43 = tpu.matmul %40, %42, %cst_20 {dimension_numbers = #tpu.dot_dimension_numbers<[1], [0], [0], [1], [0, 0, 1, 1], [], []>} : vector<4x300xbf16>, vector<300x640xbf16>, vector<4x640xf32> -> vector<4x640xf32>
    %44 = arith.addf %26, %43 : vector<4x640xf32>
    %45 = vector.extract_strided_slice %10 {offsets = [0, 0, 0], sizes = [4, 6, 32], strides = [1, 1, 1]} : vector<4x10x32xbf16> to vector<4x6x32xbf16>
    %46 = vector.extract_strided_slice %10 {offsets = [0, 1, 0], sizes = [4, 6, 32], strides = [1, 1, 1]} : vector<4x10x32xbf16> to vector<4x6x32xbf16>
    %47 = vector.extract_strided_slice %10 {offsets = [0, 2, 0], sizes = [4, 6, 32], strides = [1, 1, 1]} : vector<4x10x32xbf16> to vector<4x6x32xbf16>
    %48 = vector.extract_strided_slice %10 {offsets = [0, 3, 0], sizes = [4, 6, 32], strides = [1, 1, 1]} : vector<4x10x32xbf16> to vector<4x6x32xbf16>
    %49 = vector.extract_strided_slice %10 {offsets = [0, 4, 0], sizes = [4, 6, 32], strides = [1, 1, 1]} : vector<4x10x32xbf16> to vector<4x6x32xbf16>
    %50 = tpu.concatenate %45, %46, %47, %48, %49 in 2 : vector<4x6x32xbf16>, vector<4x6x32xbf16>, vector<4x6x32xbf16>, vector<4x6x32xbf16>, vector<4x6x32xbf16> -> vector<4x6x160xbf16>
    %51 = vector.shape_cast %50 : vector<4x6x160xbf16> to vector<24x160xbf16>
    %c224 = arith.constant 224 : index
    %c0_21 = arith.constant 0 : index
    %52 = vector.load %arg3[%c224, %c0_21] : memref<384x300xbf16, #tpu.memory_space<vmem>>, vector<160x300xbf16>
    %cst_22 = arith.constant dense<0.000000e+00> : vector<24x300xf32>
    %53 = tpu.matmul %51, %52, %cst_22 {dimension_numbers = #tpu.dot_dimension_numbers<[1], [0], [0], [1], [0, 0, 1, 1], [], []>} : vector<24x160xbf16>, vector<160x300xbf16>, vector<24x300xf32> -> vector<24x300xf32>
    %54 = vector.shape_cast %53 : vector<24x300xf32> to vector<4x6x300xf32>
    %cst_23 = arith.constant dense<0xFF800000> : vector<4x300xf32>
    %55 = vector.multi_reduction <maximumf>, %54, %cst_23 [1] : vector<4x6x300xf32> to vector<4x300xf32>
    %c2 = arith.constant 2 : index
    %c0_24 = arith.constant 0 : index
    %56 = vector.load %arg5[%c2, %c0_24] : memref<4x640xf32, #tpu.memory_space<vmem>>, vector<1x300xf32>
    %57 = vector.broadcast %56 : vector<1x300xf32> to vector<4x300xf32>
    %58 = arith.addf %55, %57 : vector<4x300xf32>
    %59 = arith.truncf %58 : vector<4x300xf32> to vector<4x300xbf16>
    %c2_25 = arith.constant 2 : index
    %c0_26 = arith.constant 0 : index
    %c0_27 = arith.constant 0 : index
    %60 = vector.load %arg4[%c2_25, %c0_26, %c0_27] : memref<3x300x640xbf16, #tpu.memory_space<vmem>>, vector<1x300x640xbf16>
    %61 = vector.shape_cast %60 : vector<1x300x640xbf16> to vector<300x640xbf16>
    %cst_28 = arith.constant dense<0.000000e+00> : vector<4x640xf32>
    %62 = tpu.matmul %59, %61, %cst_28 {dimension_numbers = #tpu.dot_dimension_numbers<[1], [0], [0], [1], [0, 0, 1, 1], [], []>} : vector<4x300xbf16>, vector<300x640xbf16>, vector<4x640xf32> -> vector<4x640xf32>
    %63 = arith.addf %44, %62 : vector<4x640xf32>
    %c3 = arith.constant 3 : index
    %c0_29 = arith.constant 0 : index
    %64 = vector.load %arg5[%c3, %c0_29] : memref<4x640xf32, #tpu.memory_space<vmem>>, vector<1x640xf32>
    %65 = vector.broadcast %64 : vector<1x640xf32> to vector<4x640xf32>
    %66 = arith.addf %63, %65 : vector<4x640xf32>
    %67 = math.tanh %66 : vector<4x640xf32>
    %c0_30 = arith.constant 0 : index
    %c0_31 = arith.constant 0 : index
    %68 = vector.load %arg6[%c0_30, %c0_31] : memref<4x640xf32, #tpu.memory_space<vmem>>, vector<4x640xf32>
    tpu.vector_store %arg6[%c0_30, %c0_31], %67 {strides = array<i32>} : memref<4x640xf32, #tpu.memory_space<vmem>>, vector<4x640xf32>,
    return
  }
  func.func @transform_0(%arg0: i32) -> (i32, i32) {
    %c0_i32 = arith.constant 0 : i32
    %c0_i32_0 = arith.constant 0 : i32
    %c0_i32_1 = arith.constant 0 : i32
    return %c0_i32, %c0_i32_0 : i32, i32
  }
  func.func @transform_1(%arg0: i32) -> (i32, i32) {
    %c0_i32 = arith.constant 0 : i32
    %c0_i32_0 = arith.constant 0 : i32
    %c0_i32_1 = arith.constant 0 : i32
    return %c0_i32, %c0_i32_0 : i32, i32
  }
  func.func @transform_2(%arg0: i32) -> (i32, i32) {
    %c0_i32 = arith.constant 0 : i32
    %c0_i32_0 = arith.constant 0 : i32
    %c0_i32_1 = arith.constant 0 : i32
    return %c0_i32, %c0_i32_0 : i32, i32
  }
  func.func @transform_3(%arg0: i32) -> (i32, i32, i32) {
    %c0_i32 = arith.constant 0 : i32
    %c0_i32_0 = arith.constant 0 : i32
    %c0_i32_1 = arith.constant 0 : i32
    %c0_i32_2 = arith.constant 0 : i32
    return %c0_i32, %c0_i32_0, %c0_i32_1 : i32, i32, i32
  }
  func.func @transform_4(%arg0: i32) -> (i32, i32) {
    %c0_i32 = arith.constant 0 : i32
    %c0_i32_0 = arith.constant 0 : i32
    %c0_i32_1 = arith.constant 0 : i32
    return %c0_i32, %c0_i32_0 : i32, i32
  }
  func.func @transform_5(%arg0: i32) -> (i32, i32) {
    %c0_i32 = arith.constant 0 : i32
    %c0_i32_0 = arith.constant 0 : i32
    %c0_i32_1 = arith.constant 0 : i32
    return %c0_i32, %c0_i32_0 : i32, i32
  }
}

</mosaic_0001>

<bundles_post_ra>
// kernel: tpu_custom_call.1
= control target key start
LH: loop header
LB: loop body
LE: loop exit
PB: predicated region body
PF: predicated region fallthrough
CT: control target
= control target key end

     0   :  { %10 = vsyncpa [#allocation3], 0  ;;  %s8550_s0 = inlined_call_operand.vmem [shape: s32[40,1], index: 0, kind: input, shape index: {}]   ;;  %s8551_s1 = inlined_call_operand.vmem [shape: bf16[64,32], index: 1, kind: input, shape index: {}]   ;;  %s8552_s2 = inlined_call_operand.vmem [shape: bf16[384,300], index: 2, kind: input, shape index: {}]   ;;  %s8553_s3 = inlined_call_operand.hbm [shape: bf16[3,300,640], index: 3, kind: input, shape index: {}]   ;;  %s8554_s4 = inlined_call_operand.hbm [shape: f32[4,640], index: 4, kind: input, shape index: {}]   ;;  %s8555_s5 = inlined_call_operand.hbm [shape: f32[4,640], index: 5, kind: output, shape index: {}]  }
   0x1   :  { %11 = vsyncpa [#allocation6], 0 }
   0x2   :  { %12 = vsyncpa [#allocation4], 0  ;;  %s7311_s18 = smov [#allocation2]   ;;  %s7239_s22 = scalar_lea.hbm %s8553_s3, 36480 }
   0x3   :  { %s24_s19 = sshll.u32 %s7311_s18, 4  ;;  %p7240_p0 = scmp.ne.s32.totalorder %s8553_s3, %s7239_s22  ;;  %s25_s19 = int_to_ptr.vmem [resolvable:$true] %s24_s19 }
   0x4   :  { %p7243_p1 = scmp.lt.u32.totalorder %s7239_s22, %s8553_s3 }
   0x6   :  { %p7245_p2 = pnand %p7243_p1, %p7240_p0 }
   0x8   :  { %7248 = shalt.err (!%p7245_p2)
}
   0x9   :  { %s7249_s27 = scalar_lea.vmem %s25_s19, 36480  ;;  %p7254_p4 = scmp.lt.s32.totalorder %s25_s19, %s25_s19 }
   0xa   :  { %p7250_p3 = scmp.ne.s32.totalorder %s25_s19, %s7249_s27  ;;  %p7255_p5 = scmp.lt.s32.totalorder %s7249_s27, %s7249_s27 }
   0xc   :  { %p7256_p6 = por %p7255_p5, %p7254_p4 }
   0xe   :  { %p7257_p7 = pnand %p7256_p6, %p7250_p3 }
  0x10   :  { %7260 = shalt.err (!%p7257_p7)
}
  0x11   :  { %s7312_s28 = smov 320   ;;  %s7313_s29 = smov 20  }
  0x12   :  { %30 = dma.hbm_to_vmem [thread:$0]  %s8553_s3, 36480, %s25_s19, [#allocation3], %s7312_s28, %s7312_s28, %s7313_s29  }
  0x13   :  { %s7314_s7 = smov [#allocation5]   ;;  %s7261_s11 = scalar_lea.hbm %s8554_s4, 320 }
  0x14   :  { %s37_s8 = sshll.u32 %s7314_s7, 4  ;;  %p7262_p8 = scmp.ne.s32.totalorder %s8554_s4, %s7261_s11  ;;  %s38_s8 = int_to_ptr.vmem [resolvable:$true] %s37_s8 }
  0x15   :  { %p7265_p9 = scmp.lt.u32.totalorder %s7261_s11, %s8554_s4 }
  0x17   :  { %p7267_p10 = pnand %p7265_p9, %p7262_p8 }
  0x19   :  { %7270 = shalt.err (!%p7267_p10)
}
  0x1a   :  { %s7271_s16 = scalar_lea.vmem %s38_s8, 320  ;;  %p7276_p12 = scmp.lt.s32.totalorder %s38_s8, %s38_s8 }
  0x1b   :  { %p7272_p11 = scmp.ne.s32.totalorder %s38_s8, %s7271_s16  ;;  %p7277_p13 = scmp.lt.s32.totalorder %s7271_s16, %s7271_s16 }
  0x1d   :  { %p7278_p0 = por %p7277_p13, %p7276_p12 }
  0x1f   :  { %p7279_p1 = pnand %p7278_p0, %p7272_p11 }
  0x21   :  { %7282 = shalt.err (!%p7279_p1)
}
  0x22   :  { %40 = dma.hbm_to_vmem [thread:$0]  %s8554_s4, 320, %s38_s8, [#allocation6]  }
  0x23   :  { %7305 = dma.done.wait [#allocation3], 36480  }
  0x24   :  { %7306 = vsyncadd [#allocation3], 4294930816 }
  0x25   :  { %7307 = dma.done.wait [#allocation6], 320  }
  0x26   :  { %7308 = vsyncadd [#allocation6], 4294966976  ;;  %v7315_v0 = vmov 0   ;;  %v7316_v1 = vmov 0.0   ;;  %v48_v2 = vld [vmem:[%s8550_s0] sm:$0xff]  ;;  %v50_v3 = vld [vmem:[%s8550_s0 + $0x10] sm:$0xff]  ;;  %v53_v11 = vlaneseq }
  0x27   :  { %6728 = vset.pattern.permute.xlu0 %v7315_v0  ;;  %6729 = vset.pattern.permute.xlu1 %v7315_v0  ;;  %v49_v4 = vld [vmem:[%s8550_s0 + $0x8] sm:$0xff]  ;;  %v51_v5 = vld [vmem:[%s8550_s0 + $0x18] sm:$0xff]  ;;  %v6730_v6 = vld [vmem:[%s8551_s1] sm:$0xff]   ;;  %vm7317_vm0 = vmmov 0   ;;  %vm120_vm3 = vcmask 523264   ;;  %s7319_s9 = smov 64  }
  0x28   :  { %6629 = vmatprep.subr.bf16.mxu0 %v7316_v1  ;;  %800 = vmatprep.mubr.bf16.mxu1 %v7315_v0  ;;  %v6731_v7 = vld [vmem:[%s8551_s1 + $0x8] sm:$0xff]   ;;  %v52_v8 = vld [vmem:[%s8550_s0 + $0x20] sm:$0xff]  ;;  %v6732_v9 = vld [vmem:[%s8551_s1 + $0x10] sm:$0xff]   ;;  %v54_v12 = vand.u32 127, %v53_v11  ;;  %v7318_v31 = vmov 1966171168  }
  0x29   :  { %56 = vperm.xlu0 %6728, %v48_v2   ;;  %62 = vperm.xlu1 %6729, %v50_v3   ;;  %v6733_v10 = vld [vmem:[%s8551_s1 + $0x18] sm:$0xff]   ;;  %v6734_v26 = vld [vmem:[%s8552_s2 + $0x4] ss:$12 sps:$4 sm:$0xff]   ;;  %v6736_v27 = vld [vmem:[%s8552_s2] ss:$12 sps:$4 sm:$0xff]   ;;  %v194_v32 = vunpack.c.l.s4 %v7318_v31  ;;  %v7441_v34 = vshrl.u32 %v53_v11, 7 }
  0x2a   :  { %6630 = vmatpush3.bf16.msra.mxu0 %v6730_v6  ;;  %6637 = vmatprep.mubr.msk.bf16.mxu0 %vm7317_vm0, %v7316_v1  ;;  %v6737_v28 = vld [vmem:[%s8552_s2 + $0x1c] ss:$12 sps:$4 sm:$0xff]   ;;  %v6739_v30 = vld [vmem:[%s8552_s2 + $0x18] ss:$12 sps:$4 sm:$0xff]   ;;  %v6741_v54 = vld [vmem:[%s8552_s2 + $0x34] ss:$12 sps:$4 sm:$0xff]  }
  0x2b   :  { %6631 = vmatprep.subr.bf16.mxu0 %v7316_v1  ;;  %v6740_v29 = vld [vmem:[%s8552_s2 + $0x8] ss:$12 sps:$4 sm:$0xff]   ;;  %768 = vmatprep.subr.bf16.mxu1 %v6734_v26  ;;  %v195_v33 = vunpack.c.0.s8 %v194_v32  ;;  %v6743_v55 = vld [vmem:[%s8552_s2 + $0x30] ss:$12 sps:$4 sm:$0xff]   ;;  %v6744_v57 = vld [vmem:[%s8552_s2 + $0x20] ss:$12 sps:$4 sm:$0xff]  }
  0x2c   :  { %769 = vmatpush1.bf16.msra.mxu1 %v6736_v27  ;;  %v6745_v58 = vld [vmem:[%s8552_s2 + $0x4c] ss:$12 sps:$4 sm:$0xff]   ;;  %v6747_v6 = vld [vmem:[%s8552_s2 + $0x48] ss:$12 sps:$4 sm:$0xff]   ;;  %s7320_s14 = smov 32   ;;  %s7321_s20 = smov 96  }
  0x2d   :  { %59 = vperm.xlu0 %6728, %v49_v4   ;;  %65 = vperm.xlu1 %6729, %v51_v5   ;;  %v7444_v36 = vsub.s32 %v195_v33, %v7441_v34  ;;  %vm610_vm7 = vcmask 261120   ;;  %vm761_vm8 = vcmask 785408   ;;  %vm2992_vm9 = vcmask 1045504  }
  0x2e   :  { %6632 = vmatpush3.bf16.msra.mxu0 %v6731_v7  ;;  %770 = vmatprep.subr.bf16.mxu1 %v6737_v28  ;;  %v6748_v28 = vld [vmem:[%s8552_s2 + $0x38] ss:$12 sps:$4 sm:$0xff]   ;;  %vm882_vm10 = vcmask 359424   ;;  %vm2475_vm11 = vcmask 1041409   ;;  %vm2478_vm12 = vcmask 1042434   ;;  %vm2481_vm13 = vcmask 1043459  }
  0x2f   :  { %6633 = vmatprep.subr.bf16.mxu0 %v7316_v1  ;;  %vm2207_vm14 = vcmask 1046528   ;;  %vm2222_vm15 = vcmask 358400  }
  0x30   :  { %771 = vmatpush1.bf16.msra.mxu1 %v6739_v30 }
  0x31   :  { %68 = vperm.xlu0 %6728, %v52_v8   ;;  %772 = vmatprep.subr.bf16.mxu1 %v6741_v54 }
  0x32   :  { %6634 = vmatpush3.bf16.msra.mxu0 %v6732_v9 }
  0x33   :  { %6635 = vmatprep.subr.bf16.mxu0 %v7316_v1 }
  0x34   :  { %773 = vmatpush1.bf16.msra.mxu1 %v6743_v55 }
  0x35   :  { %774 = vmatprep.subr.bf16.mxu1 %v6745_v58 }
  0x36   :  { %6636 = vmatpush3.bf16.msra.mxu0 %v6733_v10 }
  0x37   :  { %6649 = vmatprep.subr.bf16.mxu0 %v6740_v29 }
  0x38   :  { %775 = vmatpush1.bf16.msra.mxu1 %v6747_v6 }
  0xa8   :  { %v57_v13 = vpop.permute.xlu0 %56  ;;  %v63_v14 = vpop.permute.xlu1 %62 }
  0xa9   :  { %vm70_vm1 = vcmp.eq.s32.totalorder %v54_v12, %v57_v13  ;;  %vm72_vm4 = vcmp.eq.s32.totalorder %v54_v12, %v63_v14 }
  0xaa   :  { %v6107_v17 = vsel %vm70_vm1, 1.0, %v7316_v1  ;;  %v6109_v20 = vsel %vm72_vm4, 1.0, %v7316_v1  ;;  %vm5011_vm1 = vcmask 357376  }
  0xac   :  { %v60_v15 = vpop.permute.xlu0 %59  ;;  %v66_v16 = vpop.permute.xlu1 %65 }
  0xad   :  { %vm71_vm2 = vcmp.eq.s32.totalorder %v54_v12, %v60_v15  ;;  %vm73_vm5 = vcmp.eq.s32.totalorder %v54_v12, %v66_v16 }
  0xae   :  { %v6108_v18 = vsel %vm71_vm2, 1.0, %v7316_v1  ;;  %v6110_v21 = vsel %vm73_vm5, 1.0, %v7316_v1 }
  0xaf   :  { %v85_v19 = vpack.c.bf16 %v6108_v18, %v6107_v17  ;;  %v86_v23 = vpack.c.bf16 %v6110_v21, %v6109_v20 }
  0xb0   :  { %v69_v22 = vpop.permute.xlu0 %68 }
  0xb1   :  { %6638 = vmatmul.mubr.msk.bf16.vlgmr.msra.gmra.mrb[0].mxu0 %vm120_vm3, %v85_v19  ;;  %vm74_vm6 = vcmp.eq.s32.totalorder %v54_v12, %v69_v22 }
  0xb2   :  { %6641 = vmatprep.mubr.msk.bf16.mxu0 %vm7317_vm0, %v7316_v1  ;;  %v6111_v24 = vsel %vm74_vm6, 1.0, %v7316_v1  ;;  %6650 = vmatpush3.bf16.msra.mxu0 %v6740_v29  ;;  %v6749_v29 = vld [vmem:[%s8552_s2 + $0x64] ss:$12 sps:$4 sm:$0xff]  }
  0xb3   :  { %v87_v25 = vpack.c.bf16 %v6111_v24, %v6111_v24  ;;  %6651 = vmatprep.subr.bf16.mxu0 %v6744_v57  ;;  %776 = vmatprep.subr.bf16.mxu1 %v6749_v29 }
  0xb6   :  { %6652 = vmatpush3.bf16.msra.mxu0 %v6744_v57 }
  0xb7   :  { %6653 = vmatprep.subr.bf16.mxu0 %v6748_v28 }
  0xb9   :  { %6642 = vmatmul.mubr.msk.bf16.gmra.mrb[4].mxu0 %vm120_vm3, %v86_v23 }
  0xba   :  { %6645 = vmatprep.mubr.msk.bf16.mxu0 %vm7317_vm0, %v7316_v1  ;;  %6654 = vmatpush3.bf16.msra.mxu0 %v6748_v28 }
  0xc1   :  { %6646 = vmatmul.mubr.msk.bf16.gmra.mrb[8].mxu0 %vm120_vm3, %v87_v25 }
 0x184   :  { %v164_v35 = vpop.f32.mrb[0].mxu0 }
 0x185   :  { %v6639_v37 = vpop.f32.mrb[1].mxu0 }
 0x186   :  { %v167_v38 = vpop.f32.mrb[2].mxu0  ;;  %v6751_v37 = vld [vmem:[%s8552_s2 + $0x60] ss:$12 sps:$4 sm:$0xff]  }
 0x187   :  { %v186_v39 = vpack.c.bf16 %v167_v38, %v164_v35  ;;  %v6119_v40 = vpack.c.bf16 %v167_v38, %v167_v38  ;;  %v6640_v41 = vpop.f32.mrb[3].mxu0  ;;  %777 = vmatpush1.bf16.msra.mxu1 %v6751_v37 }
 0x189   :  { %v199_v42 = vrot.slane %v186_v39, %v7444_v36  ;;  %v206_v43 = vrot.slane %v6119_v40, %v7444_v36 }
 0x18b   :  { %v207_v44 = vcombine.high %v199_v42, %v199_v42  ;;  %v208_v45 = vcombine.high %v206_v43, %v206_v43  ;;  %v215_v46 = vrot.slane %v199_v42, %v7444_v36  ;;  %v222_v47 = vrot.slane %v206_v43, %v7444_v36 }
 0x18c   :  { %v172_v48 = vpop.f32.mrb[4].mxu0 }
 0x18d   :  { %v229_v49 = vrot.slane %v207_v44, %v7444_v36  ;;  %v236_v50 = vrot.slane %v208_v45, %v7444_v36  ;;  %v7452_v51 = vcombine.high %v215_v46, %v215_v46  ;;  %v238_v52 = vcombine.high %v222_v47, %v222_v47  ;;  %v6643_v53 = vpop.f32.mrb[5].mxu0 }
 0x18e   :  { %v175_v56 = vpop.f32.mrb[6].mxu0  ;;  %v7467_v63 = vrot.slane %v222_v47, %v7444_v36 }
 0x18f   :  { %v314_v59 = vcombine.low %v215_v46, %v229_v49  ;;  %v6121_v60 = vcombine.high %v215_v46, %v229_v49  ;;  %v338_v61 = vcombine.low %v236_v50, %v238_v52  ;;  %v6644_v62 = vpop.f32.mrb[7].mxu0  ;;  %v187_v2 = vpack.c.bf16 %v175_v56, %v172_v48  ;;  %v6752_v46 = vld [vmem:[%s8552_s2 + $0x50] ss:$12 sps:$4 sm:$0xff]  }
 0x190   :  { %v6120_v3 = vpack.c.bf16 %v175_v56, %v175_v56  ;;  %v7469_v4 = vcombine.high %v229_v49, %v229_v49  ;;  %v506_v5 = vcombine.low %v229_v49, %v7452_v51  ;;  %v7475_v7 = vcombine.high %v236_v50, %v236_v50  ;;  %6655 = vmatprep.subr.bf16.mxu0 %v6752_v46 }
 0x191   :  { %v7478_v8 = vrot.slane %v314_v59, %v7444_v36  ;;  %v7481_v9 = vrot.slane %v6121_v60, %v7444_v36  ;;  %v7484_v10 = vrot.slane %v338_v61, %v7444_v36  ;;  %v248_v11 = vrot.slane %v187_v2, %v7444_v36  ;;  %6656 = vmatpush3.bf16.msra.mxu0 %v6752_v46 }
 0x192   :  { %v255_v12 = vrot.slane %v6120_v3, %v7444_v36  ;;  %v507_v13 = vcombine.low %v7469_v4, %v222_v47  ;;  %v7492_v15 = vrot.slane %v506_v5, %v7444_v36  ;;  %v423_v16 = vrot.slane %v7467_v63, %v7444_v36 }
 0x193   :  { %v330_v14 = vcombine.low %v7478_v8, %v7481_v9  ;;  %v6123_v17 = vcombine.high %v222_v47, %v236_v50  ;;  %v256_v18 = vcombine.high %v248_v11, %v248_v11  ;;  %v7497_v20 = vrot.slane %v248_v11, %v7444_v36 }
 0x194   :  { %v257_v19 = vcombine.high %v255_v12, %v255_v12  ;;  %v7500_v21 = vrot.slane %v255_v12, %v7444_v36  ;;  %v180_v22 = vpop.f32.mrb[8].mxu0  ;;  %v521_v26 = vrot.slane %v507_v13, %v7444_v36 }
 0x195   :  { %v7503_v23 = vrot.slane %v330_v14, %v7444_v36  ;;  %v188_v24 = vpack.c.bf16 %v180_v22, %v180_v22  ;;  %v6647_v25 = vpop.f32.mrb[9].mxu0  ;;  %v7507_v27 = vrot.slane %v6123_v17, %v7444_v36  ;;  %v278_v30 = vrot.slane %v256_v18, %v7444_v36 }
 0x196   :  { %v7517_v31 = vrot.slane %v257_v19, %v7444_v36  ;;  %v339_v32 = vcombine.low %v7475_v7, %v7497_v20  ;;  %v183_v33 = vpop.f32.mrb[10].mxu0  ;;  %v287_v35 = vcombine.high %v7500_v21, %v7500_v21  ;;  %v522_v40 = vcombine.low %v7492_v15, %v521_v26  ;;  %v6755_v25 = vld [vmem:[%s8552_s2 + $0x78] ss:$12 sps:$4 sm:$0xff]   ;;  %v6756_v26 = vld [vmem:[%s8552_s2 + $0x68] ss:$12 sps:$4 sm:$0xff]  }
 0x197   :  { %v296_v38 = vrot.slane %v188_v24, %v7444_v36  ;;  %v6648_v39 = vpop.f32.mrb[11].mxu0  ;;  %v424_v41 = vcombine.low %v7503_v23, %v423_v16  ;;  %v6122_v43 = vcombine.high %v7497_v20, %v278_v30  ;;  %v531_v59 = vcombine.low %v7497_v20, %v278_v30  ;;  %v6753_v24 = vld [vmem:[%s8552_s2 + $0x7c] ss:$12 sps:$4 sm:$0xff]   ;;  %6657 = vmatprep.subr.bf16.mxu0 %v6756_v26 }
 0x198   :  { %v7530_v42 = vrot.slane %v339_v32, %v7444_v36  ;;  %v363_v44 = vcombine.low %v7500_v21, %v7517_v31  ;;  %v289_v45 = vcombine.high %v7517_v31, %v7517_v31  ;;  %v7542_v49 = vrot.slane %v522_v40, %v7444_v36  ;;  %778 = vmatprep.subr.bf16.mxu1 %v6753_v24 }
 0x199   :  { %v297_v47 = vcombine.high %v296_v38, %v296_v38  ;;  %v304_v48 = vrot.slane %v296_v38, %v7444_v36  ;;  %v471_v50 = vshrl.u32 %v424_v41, 16  ;;  %v7547_v53 = vrot.slane %v6122_v43, %v7444_v36  ;;  %v6759_v38 = vld [vmem:[%s8552_s2 + $0x94] ss:$12 sps:$4 sm:$0xff]   ;;  %779 = vmatpush1.bf16.msra.mxu1 %v6755_v25  ;;  %6658 = vmatpush3.bf16.msra.mxu0 %v6756_v26 }
 0x19a   :  { %v354_v52 = vcombine.low %v7484_v10, %v7530_v42  ;;  %v7550_v54 = vrot.slane %v363_v44, %v7444_v36  ;;  %v473_v55 = vshll.u32 %v424_v41, 16  ;;  %602 = vrot.lane.b32.xlu1 %v7542_v49, %s7319_s9  ;;  %v288_v2 = vcombine.high %v278_v30, %v278_v30  ;;  %v6760_v41 = vld [vmem:[%s8552_s2 + $0x80] ss:$12 sps:$4 sm:$0xff]   ;;  %1583 = vmatprep.subr.bf16.mxu1 %v6759_v38 }
 0x19b   :  { %v7553_v56 = vrot.slane %v297_v47, %v7444_v36  ;;  %v7555_v57 = vcombine.high %v304_v48, %v304_v48  ;;  %v386_v58 = vcombine.low %v289_v45, %v304_v48  ;;  %v545_v6 = vrot.slane %v531_v59, %v7444_v36  ;;  %6659 = vmatprep.subr.bf16.mxu0 %v6760_v41 }
 0x19c   :  { %v7561_v60 = vrot.slane %v354_v52, %v7444_v36  ;;  %v378_v61 = vcombine.low %v7547_v53, %v7550_v54  ;;  %v475_v62 = vrot.slane %v473_v55, 1  ;;  %v555_v11 = vcombine.low %v7517_v31, %v287_v35 }
 0x19d   :  { %v387_v3 = vcombine.low %v7553_v56, %v7555_v57  ;;  %v7568_v5 = vrot.slane %v386_v58, %v7444_v36  ;;  %v554_v14 = vcombine.low %v288_v2, %v7500_v21  ;;  %v7577_v16 = vrot.slane %v278_v30, %v7444_v36  ;;  %6660 = vmatpush3.bf16.msra.mxu0 %v6760_v41 }
 0x19e   :  { %v7573_v12 = vrot.slane %v378_v61, %v7444_v36  ;;  %v476_v13 = vor.u32 %v475_v62, %v471_v50  ;;  %v546_v18 = vcombine.low %v7507_v27, %v545_v6  ;;  %v569_v19 = vrot.slane %v555_v11, %v7444_v36 }
 0x19f   :  { %v7580_v17 = vrot.slane %v387_v3, %v7444_v36  ;;  %v7585_v22 = vrot.slane %v287_v35, %v7444_v36  ;;  %v7598_v28 = vrot.slane %v554_v14, %v7444_v36  ;;  %v438_v29 = vrot.slane %v7577_v16, %v7444_v36 }
 0x1a0   :  { %498 = vrot.lane.b32.xlu1 %v476_v13, %s7320_s14  ;;  %v578_v30 = vcombine.low %v304_v48, %v7553_v56  ;;  %v6124_v32 = vcombine.high %v304_v48, %v7553_v56  ;;  %v7607_v35 = vrot.slane %v546_v18, %v7444_v36  ;;  %v313_v44 = vcombine.high %v7553_v56, %v7553_v56 }
 0x1a1   :  { %v402_v33 = vcombine.low %v7568_v5, %v7580_v17  ;;  %v453_v37 = vrot.slane %v7585_v22, %v7444_v36  ;;  %v570_v39 = vcombine.low %v7598_v28, %v569_v19  ;;  %v439_v40 = vcombine.low %v7561_v60, %v438_v29 }
 0x1a2   :  { %604 = vrot.lane.b32.xlu0 %v7607_v35, %s7319_s9  ;;  %v7628_v47 = vrot.slane %v578_v30, %v7444_v36  ;;  %v593_v48 = vrot.slane %v6124_v32, %v7444_v36  ;;  %v1104_v55 = vshll.u32 %v7503_v23, 16  ;;  %v7636_v58 = vrot.slane %v313_v44, %v7444_v36 }
 0x1a3   :  { %v454_v43 = vcombine.low %v7573_v12, %v453_v37  ;;  %v7625_v45 = vrot.slane %v570_v39, %v7444_v36  ;;  %v480_v46 = vshll.u32 %v439_v40, 16  ;;  %v7632_v50 = vrot.slane %v402_v33, %v7444_v36 }
 0x1a4   :  { %v478_v59 = vshrl.u32 %v439_v40, 16  ;;  %v468_v3 = vrot.slane %v7636_v58, %v7444_v36  ;;  %v594_v11 = vcombine.low %v7628_v47, %v593_v48  ;;  %v1137_v13 = vshll.u32 %v7542_v49, 16 }
 0x1a5   :  { %v487_v52 = vshll.u32 %v454_v43, 16  ;;  %606 = vrot.lane.b32.xlu1 %v7625_v45, %s7319_s9  ;;  %v482_v61 = vrot.slane %v480_v46, 1  ;;  %v485_v62 = vshrl.u32 %v454_v43, 16  ;;  %v1106_v18 = vrot.slane %v1104_v55, 1 }
 0x1a6   :  { %v469_v19 = vcombine.low %v7632_v50, %v468_v3  ;;  %v1110_v24 = vshll.u32 %v7561_v60, 16  ;;  %v1102_v25 = vshrl.u32 %v7503_v23, 16  ;;  %v1116_v29 = vshll.u32 %v7573_v12, 16 }
 0x1a7   :  { %v489_v2 = vrot.slane %v487_v52, 1  ;;  %v483_v6 = vor.u32 %v482_v61, %v478_v59  ;;  %v601_v30 = vrot.slane %v594_v11, %v7444_v36  ;;  %v1139_v32 = vrot.slane %v1137_v13, 1 }
 0x1a8   :  { %v494_v26 = vshll.u32 %v469_v19, 16  ;;  %v1107_v33 = vor.u32 %v1106_v18, %v1102_v25  ;;  %v492_v37 = vshrl.u32 %v469_v19, 16  ;;  %v1135_v39 = vshrl.u32 %v7542_v49, 16  ;;  %v7664_v49 = vld [vmem:[%s8552_s2 + $0x98] ss:$12 sps:$4 sm:$0xff]  }
 0x1a9   :  { %v490_v14 = vor.u32 %v489_v2, %v485_v62  ;;  %500 = vrot.lane.b32.xlu0 %v483_v6, %s7320_s14  ;;  %v1112_v40 = vrot.slane %v1110_v24, 1  ;;  %v4146_v41 = vrot.slane %v7517_v31, %v7444_v36  ;;  %v4056_v43 = vrot.slane %v7452_v51, %v7444_v36  ;;  %6665 = vmatprep.subr.bf16.mxu0 %v7664_v49 }
 0x1aa   :  { %v496_v38 = vrot.slane %v494_v26, 1  ;;  %v1118_v46 = vrot.slane %v1116_v29, 1  ;;  %v1144_v48 = vshll.u32 %v7607_v35, 16  ;;  %v4131_v52 = vrot.slane %v7497_v20, %v7444_v36 }
 0x1ab   :  { %502 = vrot.lane.b32.xlu1 %v490_v14, %s7320_s14  ;;  %v1140_v55 = vor.u32 %v1139_v32, %v1135_v39  ;;  %v1108_v31 = vshrl.u32 %v7561_v60, 16  ;;  %v1114_v59 = vshrl.u32 %v7573_v12, 16  ;;  %v4147_v51 = vcombine.low %v7598_v28, %v4146_v41 }
 0x1ac   :  { %v497_v44 = vor.u32 %v496_v38, %v492_v37  ;;  %v1122_v61 = vshll.u32 %v7632_v50, 16  ;;  %v4132_v62 = vcombine.low %v7507_v27, %v4131_v52  ;;  %v7672_v2 = vcombine.low %v7478_v8, %v4056_v43 }
 0x1ad   :  { %608 = vrot.lane.b32.xlu0 %v601_v30, %s7319_s9  ;;  %v4071_v20 = vrot.slane %v7475_v7, %v7444_v36  ;;  %v1113_v3 = vor.u32 %v1112_v40, %v1108_v31  ;;  %v4116_v6 = vrot.slane %v7469_v4, %v7444_v36  ;;  %v4086_v28 = vrot.slane %v7500_v21, %v7444_v36 }
 0x1ae   :  { %v1119_v27 = vor.u32 %v1118_v46, %v1114_v59  ;;  %v1146_v8 = vrot.slane %v1144_v48, 1  ;;  %v4101_v7 = vrot.slane %v7553_v56, %v7444_v36  ;;  %v1151_v13 = vshll.u32 %v7625_v45, 16 }
 0x1af   :  { %1126 = vrot.lane.b32.xlu1 %v1107_v33, %s7320_s14  ;;  %v7684_v11 = vcombine.low %v7484_v10, %v4071_v20  ;;  %v7690_v14 = vcombine.low %v7547_v53, %v4086_v28  ;;  %v4178_v4 = vcombine.low %v7481_v9, %v7467_v63  ;;  %v4194_v21 = vcombine.low %v7550_v54, %v7585_v22  ;;  %v6763_v20 = vld [vmem:[%s8552_s2 + $0xac] ss:$12 sps:$4 sm:$0xff]  }
 0x1b0   :  { %v1124_v18 = vrot.slane %v1122_v61, 1  ;;  %v7697_v19 = vcombine.low %v7568_v5, %v4101_v7  ;;  %v4186_v10 = vcombine.low %v7530_v42, %v7577_v16  ;;  %v4202_v56 = vcombine.low %v7580_v17, %v7636_v58  ;;  %v6757_v61 = vld [vmem:[%s8552_s2 + $0x90] ss:$12 sps:$4 sm:$0xff]   ;;  %v6761_v7 = vld [vmem:[%s8552_s2 + $0xa8] ss:$12 sps:$4 sm:$0xff]  }
 0x1b1   :  { %504 = vrot.lane.b32.xlu0 %v497_v44, %s7320_s14  ;;  %v1142_v53 = vshrl.u32 %v7607_v35, 16  ;;  %v1120_v24 = vshrl.u32 %v7632_v50, 16  ;;  %v1153_v26 = vrot.slane %v1151_v13, 1  ;;  %v1158_v29 = vshll.u32 %v601_v30, 16  ;;  %v6767_v13 = vld [vmem:[%s8552_s2 + $0xc4] ss:$12 sps:$4 sm:$0xff]  }
 0x1b2   :  { %v4117_v5 = vcombine.low %v7492_v15, %v4116_v6  ;;  %v1149_v33 = vshrl.u32 %v7625_v45, 16  ;;  %v1156_v39 = vshrl.u32 %v601_v30, 16  ;;  %v4154_v41 = vrot.slane %v4147_v51, %v7444_v36 }
 0x1b3   :  { %1162 = vrot.lane.b32.xlu1 %v1140_v55, %s7321_s20  ;;  %v1147_v25 = vor.u32 %v1146_v8, %v1142_v53  ;;  %v1125_v32 = vor.u32 %v1124_v18, %v1120_v24  ;;  %v1160_v38 = vrot.slane %v1158_v29, 1  ;;  %v4161_v15 = vrot.slane %v7555_v57, %v7444_v36 }
 0x1b4   :  { %v1154_v37 = vor.u32 %v1153_v26, %v1149_v33  ;;  %v4124_v35 = vrot.slane %v4117_v5, %v7444_v36  ;;  %v4139_v45 = vrot.slane %v4132_v62, %v7444_v36  ;;  %v4064_v6 = vrot.slane %v7672_v2, %v7444_v36 }
 0x1b5   :  { %1128 = vrot.lane.b32.xlu0 %v1113_v3, %s7320_s14  ;;  %v1161_v40 = vor.u32 %v1160_v38, %v1156_v39  ;;  %v4162_v43 = vcombine.low %v7628_v47, %v4161_v15  ;;  %v6771_v38 = vld [vmem:[%s8552_s2 + $0xdc] ss:$12 sps:$4 sm:$0xff]   ;;  %v4094_v39 = vrot.slane %v7690_v14, %v7444_v36  ;;  %v6769_v14 = vld [vmem:[%s8552_s2 + $0xd8] ss:$12 sps:$4 sm:$0xff]   ;;  %v4209_v16 = vrot.slane %v4202_v56, %v7444_v36 }
 0x1b7   :  { %1130 = vrot.lane.b32.xlu1 %v1119_v27, %s7320_s14  ;;  %v4169_v30 = vrot.slane %v4162_v43, %v7444_v36 }
 0x1b9   :  { %1164 = vrot.lane.b32.xlu0 %v1147_v25, %s7321_s20 }
 0x1bb   :  { %1132 = vrot.lane.b32.xlu1 %v1125_v32, %s7320_s14  ;;  %v6765_v32 = vld [vmem:[%s8552_s2 + $0xc0] ss:$12 sps:$4 sm:$0xff]  }
 0x1bd   :  { %1166 = vrot.lane.b32.xlu0 %v1154_v37, %s7321_s20  ;;  %v4079_v37 = vrot.slane %v7684_v11, %v7444_v36 }
 0x1bf   :  { %4170 = vrot.lane.b32.xlu1 %v4124_v35, %s7319_s9 }
 0x1c1   :  { %1168 = vrot.lane.b32.xlu0 %v1161_v40, %s7321_s20  ;;  %v6768_v40 = vld [vmem:[%s8552_s2 + $0xb0] ss:$12 sps:$4 sm:$0xff]  }
 0x1c3   :  { %4174 = vrot.lane.b32.xlu1 %v4154_v41, %s7319_s9 }
 0x1c5   :  { %4172 = vrot.lane.b32.xlu0 %v4139_v45, %s7319_s9 }
 0x1c9   :  { %4176 = vrot.lane.b32.xlu0 %v4169_v30, %s7319_s9 }
 0x20c   :  { %v603_v44 = vpop.permute.xlu1 %602 }
 0x212   :  { %v499_v46 = vpop.permute.xlu1 %498 }
 0x213   :  { %v613_v57 = vsel %vm610_vm7, %v7503_v23, %v499_v46 }
 0x214   :  { %v605_v48 = vpop.permute.xlu0 %604  ;;  %v624_v59 = vsel %vm120_vm3, %v613_v57, %v603_v44  ;;  %v4109_v57 = vrot.slane %v7697_v19, %v7444_v36 }
 0x217   :  { %v7724_v52 = vpop.permute.xlu1 %606 }
 0x21b   :  { %v501_v55 = vpop.permute.xlu0 %500 }
 0x21c   :  { %v616_v31 = vsel %vm610_vm7, %v7561_v60, %v501_v55 }
 0x21d   :  { %v503_v47 = vpop.permute.xlu1 %502  ;;  %v626_v51 = vsel %vm120_vm3, %v616_v31, %v605_v48 }
 0x21e   :  { %v6125_v62 = vcombine.low %v624_v59, %v626_v51  ;;  %v619_v2 = vsel %vm610_vm7, %v7573_v12, %v503_v47  ;;  %v6773_v51 = vld [vmem:[%s8552_s2 + $0xf0] ss:$12 sps:$4 sm:$0xff]  }
 0x21f   :  { %v7738_v3 = vpop.permute.xlu0 %608  ;;  %v628_v25 = vsel %vm120_vm3, %v619_v2, %v7724_v52 }
 0x220   :  { %6145 = vmatmul.mubr.msk.bf16.vlgmr.msra.gmra.mrb[0].mxu1 %vm761_vm8, %v6125_v62  ;;  %6661 = vmatprep.mubr.msk.bf16.mxu0 %vm761_vm8, %v6125_v62 }
 0x221   :  { %v1127_v28 = vpop.permute.xlu1 %1126  ;;  %1584 = vmatpush1.bf16.msra.mxu1 %v6757_v61  ;;  %810 = vmatprep.mubr.bf16.mxu1 %v7315_v0 }
 0x222   :  { %v1171_v27 = vsel %vm610_vm7, %v7503_v23, %v1127_v28  ;;  %v7747_v8 = vsel %vm610_vm7, %v4064_v6, %v1127_v28  ;;  %1585 = vmatprep.subr.bf16.mxu1 %v6763_v20 }
 0x223   :  { %v505_v18 = vpop.permute.xlu0 %504  ;;  %v1178_v53 = vsel %vm120_vm3, %v1171_v27, %v603_v44  ;;  %v6776_v27 = vld [vmem:[%s8552_s2 + $0xe0] ss:$12 sps:$4 sm:$0xff]  }
 0x224   :  { %v622_v23 = vsel %vm610_vm7, %v7632_v50, %v505_v18 }
 0x225   :  { %v7761_v24 = vpop.permute.xlu1 %1162  ;;  %v630_v26 = vsel %vm120_vm3, %v622_v23, %v7738_v3  ;;  %1586 = vmatpush1.bf16.msra.mxu1 %v6761_v7 }
 0x226   :  { %v1183_v29 = vsel %vm761_vm8, %v1178_v53, %v7761_v24  ;;  %v6126_v5 = vcombine.low %v628_v25, %v630_v26  ;;  %1587 = vmatprep.subr.bf16.mxu1 %v6767_v13 }
 0x227   :  { %v1200_v33 = vrot.slane %v1183_v29, %v7444_v36  ;;  %v1129_v35 = vpop.permute.xlu0 %1128  ;;  %v6777_v29 = vld [vmem:[%s8552_s2 + $0x108] ss:$12 sps:$4 sm:$0xff]  }
 0x228   :  { %v1173_v15 = vsel %vm610_vm7, %v7561_v60, %v1129_v35  ;;  %v7786_v45 = vsel %vm610_vm7, %v4079_v37, %v1129_v35  ;;  %6146 = vmatmul.mubr.msk.bf16.gmra.mrb[4].mxu1 %vm761_vm8, %v6126_v5  ;;  %6662 = vmatmul.mubr.msk.bf16.vlgmr.msra.gmra.mrb[12].mxu0 %vm761_vm8, %v6126_v5  ;;  %v6775_v60 = vld [vmem:[%s8552_s2 + $0xf4] ss:$12 sps:$4 sm:$0xff]  }
 0x229   :  { %v1201_v41 = vcombine.high %v1200_v33, %v1200_v33  ;;  %v1131_v11 = vpop.permute.xlu1 %1130  ;;  %1588 = vmatpush1.bf16.msra.mxu1 %v6765_v32  ;;  %6666 = vmatpush3.bf16.msra.mxu0 %v7664_v49  ;;  %v1179_v44 = vsel %vm120_vm3, %v1173_v15, %v605_v48  ;;  %v6772_v49 = vld [vmem:[%s8552_s2 + $0xc8] ss:$12 sps:$4 sm:$0xff]   ;;  %v7813_v55 = vrot.slane %v1200_v33, %v7444_v36  ;;  %v6783_v15 = vld [vmem:[%s8552_s2 + $0x124] ss:$12 sps:$4 sm:$0xff]  }
 0x22a   :  { %v7791_v43 = vsel %vm610_vm7, %v4094_v39, %v1131_v11  ;;  %1589 = vmatprep.subr.bf16.mxu1 %v6771_v38  ;;  %6667 = vmatprep.subr.bf16.mxu0 %v6768_v40  ;;  %v1175_v31 = vsel %vm610_vm7, %v7573_v12, %v1131_v11  ;;  %v6779_v12 = vld [vmem:[%s8552_s2 + $0x10c] ss:$12 sps:$4 sm:$0xff]  }
 0x22b   :  { %v7801_v30 = vrot.slane %v1201_v41, %v7444_v36  ;;  %v7804_v46 = vpop.permute.xlu0 %1164  ;;  %1615 = vmatprep.mubr.bf16.mxu1 %v7315_v0  ;;  %v1180_v6 = vsel %vm120_vm3, %v1175_v31, %v7724_v52  ;;  %v1216_v7 = vcombine.high %v7813_v55, %v7813_v55  ;;  %v4185_v52 = vrot.slane %v4178_v4, %v7444_v36  ;;  %v6780_v38 = vld [vmem:[%s8552_s2 + $0xf8] ss:$12 sps:$4 sm:$0xff]  }
 0x22c   :  { %v1185_v48 = vsel %vm761_vm8, %v1179_v44, %v7804_v46 }
 0x22d   :  { %v1133_v47 = vpop.permute.xlu1 %1132  ;;  %v1224_v59 = vrot.slane %v1185_v48, %v7444_v36  ;;  %1590 = vmatpush1.bf16.msra.mxu1 %v6769_v14  ;;  %6668 = vmatpush3.bf16.msra.mxu0 %v6768_v40  ;;  %v1217_v61 = vcombine.high %v7801_v30, %v7801_v30 }
 0x22e   :  { %v7821_v19 = vsel %vm610_vm7, %v4109_v57, %v1133_v47  ;;  %1591 = vmatprep.subr.bf16.mxu1 %v6775_v60  ;;  %6669 = vmatprep.subr.bf16.mxu0 %v6772_v49  ;;  %v1177_v2 = vsel %vm610_vm7, %v7632_v50, %v1133_v47  ;;  %v1364_v50 = vcombine.low %v7813_v55, %v7801_v30  ;;  %v6781_v30 = vld [vmem:[%s8552_s2 + $0x120] ss:$12 sps:$4 sm:$0xff]  }
 0x22f   :  { %v1225_v62 = vcombine.high %v1224_v59, %v1224_v59  ;;  %v1232_v20 = vrot.slane %v1224_v59, %v7444_v36  ;;  %v7834_v28 = vpop.permute.xlu0 %1166  ;;  %v1181_v33 = vsel %vm120_vm3, %v1177_v2, %v7738_v3 }
 0x230   :  { %v1187_v13 = vsel %vm761_vm8, %v1180_v6, %v7834_v28 }
 0x231   :  { %v4171_v18 = vpop.permute.xlu1 %4170  ;;  %v1239_v23 = vrot.slane %v1225_v62, %v7444_v36  ;;  %v1240_v53 = vcombine.high %v1232_v20, %v1232_v20  ;;  %v1298_v25 = vunpack.i.h.s16 %v1232_v20  ;;  %v6149_v26 = vpack.i.b16 %v1232_v20, %v1217_v61  ;;  %1592 = vmatpush1.bf16.msra.mxu1 %v6773_v51  ;;  %6670 = vmatpush3.bf16.msra.mxu0 %v6772_v49  ;;  %v6784_v51 = vld [vmem:[%s8552_s2 + $0x110] ss:$12 sps:$4 sm:$0xff]  }
 0x232   :  { %v1248_v32 = vrot.slane %v1187_v13, %v7444_v36  ;;  %v4219_v63 = vsel %vm120_vm3, %v7747_v8, %v4171_v18  ;;  %1593 = vmatprep.subr.bf16.mxu1 %v6779_v12  ;;  %6671 = vmatprep.subr.bf16.mxu0 %v6776_v27  ;;  %v4201_v49 = vrot.slane %v4194_v21, %v7444_v36  ;;  %v6787_v12 = vld [vmem:[%s8552_s2 + $0x13c] ss:$12 sps:$4 sm:$0xff]  }
 0x233   :  { %v1300_v9 = vunpack.i.h.s16 %v1239_v23  ;;  %v1365_v4 = vcombine.low %v1216_v7, %v6149_v26  ;;  %v1241_v5 = vcombine.high %v1239_v23, %v1239_v23  ;;  %v7860_v37 = vpop.permute.xlu0 %1168  ;;  %v1302_v35 = vunpack.i.h.s16 %v1240_v53 }
 0x234   :  { %v1249_v39 = vcombine.high %v1248_v32, %v1248_v32  ;;  %v1256_v40 = vrot.slane %v1248_v32, %v7444_v36  ;;  %v4226_v8 = vsel %vm761_vm8, %v4219_v63, %v7761_v24  ;;  %v6150_v11 = vpack.i.b16 %v1239_v23, %v1298_v25 }
 0x235   :  { %v4175_v41 = vpop.permute.xlu1 %4174  ;;  %v6151_v3 = vpack.i.b16 %v1240_v53, %v1300_v9  ;;  %v4234_v14 = vcombine.low %v4226_v8, %v4185_v52  ;;  %v1189_v60 = vsel %vm761_vm8, %v1181_v33, %v7860_v37  ;;  %1594 = vmatpush1.bf16.msra.mxu1 %v6777_v29  ;;  %v6152_v44 = vpack.i.b16 %v1241_v5, %v1302_v35  ;;  %v6788_v53 = vld [vmem:[%s8552_s2 + $0x128] ss:$12 sps:$4 sm:$0xff]  }
 0x236   :  { %v1263_v57 = vrot.slane %v1249_v39, %v7444_v36  ;;  %v1272_v24 = vrot.slane %v1189_v60, %v7444_v36  ;;  %6672 = vmatpush3.bf16.msra.mxu0 %v6776_v27  ;;  %v1381_v31 = vrot.slane %v1365_v4, %v7444_v36  ;;  %v1264_v48 = vcombine.high %v1256_v40, %v1256_v40  ;;  %v6785_v27 = vld [vmem:[%s8552_s2 + $0x138] ss:$12 sps:$4 sm:$0xff]   ;;  %v6789_v39 = vld [vmem:[%s8552_s2 + $0x140] ss:$12 sps:$4 sm:$0xff]  }
 0x237   :  { %v1366_v55 = vcombine.low %v6150_v11, %v6151_v3  ;;  %v4223_v47 = vsel %vm120_vm3, %v7791_v43, %v4175_v41  ;;  %6673 = vmatprep.subr.bf16.mxu0 %v6780_v38  ;;  %v4173_v59 = vpop.permute.xlu0 %4172  ;;  %v1367_v61 = vcombine.low %v6152_v44, %v1256_v40  ;;  %v4241_v54 = vrot.slane %v4234_v14, %v7444_v36 }
 0x238   :  { %v1273_v22 = vcombine.high %v1272_v24, %v1272_v24  ;;  %v4193_v21 = vrot.slane %v4186_v10, %v7444_v36  ;;  %1595 = vmatprep.subr.bf16.mxu1 %v6783_v15  ;;  %v1374_v43 = vrot.slane %v1364_v50, %v7444_v36  ;;  %v1265_v20 = vcombine.high %v1263_v57, %v1263_v57 }
 0x239   :  { %v1388_v62 = vrot.slane %v1366_v55, %v7444_v36  ;;  %v1280_v6 = vrot.slane %v1272_v24, %v7444_v36  ;;  %1596 = vmatpush1.bf16.msra.mxu1 %v6781_v30  ;;  %v1395_v7 = vrot.slane %v1367_v61, %v7444_v36  ;;  %v4228_v42 = vsel %vm761_vm8, %v4223_v47, %v7834_v28 }
 0x23a   :  { %v1287_v2 = vrot.slane %v1273_v22, %v7444_v36  ;;  %6674 = vmatpush3.bf16.msra.mxu0 %v6780_v38  ;;  %v1396_v10 = vcombine.low %v1374_v43, %v1381_v31  ;;  %v1413_v13 = vcombine.low %v1263_v57, %v1264_v48  ;;  %1597 = vmatprep.subr.bf16.mxu1 %v6787_v12 }
 0x23b   :  { %v1288_v52 = vcombine.high %v1280_v6, %v1280_v6  ;;  %v1312_v18 = vunpack.i.h.s16 %v1280_v6  ;;  %6675 = vmatprep.subr.bf16.mxu0 %v6784_v51  ;;  %v4177_v23 = vpop.permute.xlu0 %4176  ;;  %v1397_v25 = vcombine.low %v1388_v62, %v1395_v7  ;;  %v4242_v26 = vcombine.high %v4241_v54, %v4241_v54 }
 0x23c   :  { %v1289_v28 = vcombine.high %v1287_v2, %v1287_v2  ;;  %v1314_v29 = vunpack.i.h.s16 %v1287_v2  ;;  %v6153_v32 = vpack.i.b16 %v1280_v6, %v1265_v20  ;;  %v4282_v17 = vcombine.low %v4228_v42, %v4201_v49 }
 0x23d   :  { %v1316_v50 = vunpack.i.h.s16 %v1288_v52  ;;  %v6154_v63 = vpack.i.b16 %v1287_v2, %v1312_v18  ;;  %1598 = vmatpush1.bf16.msra.mxu1 %v6785_v27  ;;  %v1411_v58 = vrot.slane %v1397_v25, %v7444_v36  ;;  %v4221_v9 = vsel %vm120_vm3, %v7786_v45, %v4173_v59 }
 0x23e   :  { %v6155_v56 = vpack.i.b16 %v1288_v52, %v1314_v29  ;;  %v4225_v4 = vsel %vm120_vm3, %v7821_v19, %v4177_v23  ;;  %6676 = vmatpush3.bf16.msra.mxu0 %v6784_v51  ;;  %v4249_v5 = vrot.slane %v4241_v54, %v7444_v36  ;;  %v4289_v35 = vrot.slane %v4282_v17, %v7444_v36 }
 0x23f   :  { %v6156_v33 = vpack.i.b16 %v1289_v28, %v1316_v50  ;;  %v1414_v38 = vcombine.low %v6153_v32, %v6154_v63  ;;  %6677 = vmatprep.subr.bf16.mxu0 %v6788_v53  ;;  %v1422_v40 = vrot.slane %v1413_v13, %v7444_v36  ;;  %v4227_v45 = vsel %vm761_vm8, %v4221_v9, %v7804_v46 }
 0x240   :  { %v4229_v19 = vsel %vm761_vm8, %v4225_v4, %v7860_v37  ;;  %v1404_v8 = vrot.slane %v1396_v10, %v7444_v36  ;;  %v4256_v41 = vrot.slane %v4242_v26, %v7444_v36  ;;  %v4290_v3 = vcombine.high %v4289_v35, %v4289_v35  ;;  %v6790_v4 = vld [vmem:[#allocation2 + $0x2f8] ss:$20 sps:$4 sm:$0xff]  }
 0x241   :  { %v1415_v15 = vcombine.low %v6155_v56, %v6156_v33  ;;  %v1429_v11 = vrot.slane %v1414_v38, %v7444_v36  ;;  %v4258_v14 = vcombine.low %v4227_v45, %v4193_v21  ;;  %v4306_v60 = vcombine.low %v4229_v19, %v4209_v16  ;;  %v6795_v33 = vld [vmem:[#allocation2 + $0x324] ss:$20 sps:$4 sm:$0xff]   ;;  %v6793_v38 = vld [vmem:[#allocation2 + $0x320] ss:$20 sps:$4 sm:$0xff]   ;;  %v6804_v19 = vld [vmem:[#allocation2 + $0x39c] ss:$20 sps:$4 sm:$0xff]  }
 0x242   :  { %6678 = vmatpush3.bf16.msra.mxu0 %v6788_v53  ;;  %v1412_v30 = vcombine.low %v1404_v8, %v1411_v58  ;;  %v4297_v44 = vrot.slane %v4289_v35, %v7444_v36  ;;  %v4304_v57 = vrot.slane %v4290_v3, %v7444_v36  ;;  %v4257_v55 = vcombine.high %v4249_v5, %v4249_v5  ;;  %v6798_v35 = vld [vmem:[#allocation2 + $0x34c] ss:$20 sps:$4 sm:$0xff]   ;;  %v6799_v45 = vld [vmem:[#allocation2 + $0x370] ss:$20 sps:$4 sm:$0xff]   ;;  %v6808_v3 = vld [vmem:[#allocation2 + $0x3e8] ss:$20 sps:$4 sm:$0xff]  }
 0x243   :  { %6679 = vmatprep.subr.bf16.mxu0 %v6789_v39  ;;  %v1436_v46 = vrot.slane %v1415_v15, %v7444_v36  ;;  %v1437_v37 = vcombine.low %v1422_v40, %v1429_v11  ;;  %v4265_v24 = vrot.slane %v4258_v14, %v7444_v36  ;;  %v4313_v49 = vrot.slane %v4306_v60, %v7444_v36  ;;  %v6801_v40 = vld [vmem:[#allocation2 + $0x374] ss:$20 sps:$4 sm:$0xff]   ;;  %v6802_v8 = vld [vmem:[#allocation2 + $0x398] ss:$20 sps:$4 sm:$0xff]   ;;  %v6811_v60 = vld [vmem:[#allocation2 + $0x410] ss:$20 sps:$4 sm:$0xff]  }
 0x244   :  { %1616 = vmatmul.mubr.bf16.vlgmr.msra.gmra.mrb[8].mxu1 %v1412_v30  ;;  %6681 = vmatprep.mubr.bf16.mxu0 %v1412_v30  ;;  %v4370_v31 = vcombine.low %v4249_v5, %v4256_v41  ;;  %v4305_v54 = vcombine.high %v4297_v44, %v4297_v44  ;;  %v4373_v22 = vcombine.low %v4297_v44, %v4304_v57  ;;  %v6792_v5 = vld [vmem:[#allocation2 + $0x2fc] ss:$20 sps:$4 sm:$0xff]   ;;  %v6807_v41 = vld [vmem:[#allocation2 + $0x3c4] ss:$20 sps:$4 sm:$0xff]   ;;  %v6805_v15 = vld [vmem:[#allocation2 + $0x3c0] ss:$20 sps:$4 sm:$0xff]  }
 0x245   :  { %v1444_v48 = vrot.slane %v1437_v37, %v7444_v36  ;;  %v1451_v47 = vrot.slane %v1436_v46, %v7444_v36  ;;  %1625 = vmatprep.mubr.bf16.mxu1 %v7315_v0  ;;  %v4266_v59 = vcombine.high %v4265_v24, %v4265_v24  ;;  %v4273_v51 = vrot.slane %v4265_v24, %v7444_v36  ;;  %v6810_v11 = vld [vmem:[#allocation2 + $0x3ec] ss:$20 sps:$4 sm:$0xff]   ;;  %v6813_v14 = vld [vmem:[#allocation2 + $0x414] ss:$20 sps:$4 sm:$0xff]   ;;  %v6816_v30 = vld [vmem:[#allocation2 + $0x43c] ss:$20 sps:$4 sm:$0xff]  }
 0x246   :  { %v4314_v12 = vcombine.high %v4313_v49, %v4313_v49  ;;  %v4321_v61 = vrot.slane %v4313_v49, %v7444_v36  ;;  %6680 = vmatpush3.bf16.msra.mxu0 %v6789_v39  ;;  %v4380_v2 = vrot.slane %v4370_v31, %v7444_v36  ;;  %v4401_v13 = vrot.slane %v4373_v22, %v7444_v36  ;;  %v6796_v39 = vld [vmem:[#allocation2 + $0x348] ss:$20 sps:$4 sm:$0xff]   ;;  %v6814_v44 = vld [vmem:[#allocation2 + $0x438] ss:$20 sps:$4 sm:$0xff]   ;;  %v6817_v46 = vld [vmem:[#allocation2 + $0x460] ss:$20 sps:$4 sm:$0xff]  }
 0x247   :  { %v1452_v21 = vcombine.low %v1444_v48, %v1451_v47  ;;  %v4280_v43 = vrot.slane %v4266_v59, %v7444_v36  ;;  %v4281_v62 = vcombine.high %v4273_v51, %v4273_v51  ;;  %v4371_v20 = vcombine.low %v4257_v55, %v4273_v51  ;;  %3008 = vmatprep.subr.bf16.mxu1 %v6792_v5  ;;  %v6819_v57 = vld [vmem:[#allocation2 + $0x464] ss:$20 sps:$4 sm:$0xff]   ;;  %v6822_v37 = vld [vmem:[#allocation2 + $0x48c] ss:$20 sps:$4 sm:$0xff]   ;;  %v6820_v24 = vld [vmem:[#allocation2 + $0x488] ss:$20 sps:$4 sm:$0xff]  }
 0x248   :  { %v4328_v6 = vrot.slane %v4314_v12, %v7444_v36  ;;  %v4329_v27 = vcombine.high %v4321_v61, %v4321_v61  ;;  %v4436_v7 = vcombine.low %v4305_v54, %v4321_v61  ;;  %3009 = vmatpush1.bf16.msra.mxu1 %v6790_v4  ;;  %v6825_v49 = vld [vmem:[#allocation2 + $0x4b4] ss:$20 sps:$4 sm:$0xff]   ;;  %v6823_v55 = vld [vmem:[#allocation2 + $0x4b0] ss:$20 sps:$4 sm:$0xff]   ;;  %v6829_v48 = vld [vmem:[#allocation2 + $0x578] ss:$20 sps:$4 sm:$0xff]  }
 0x249   :  { %6682 = vmatmul.mubr.bf16.vlgmr.msra.gmra.mrb[16].mxu0 %v1452_v21  ;;  %v4372_v42 = vcombine.low %v4280_v43, %v4281_v62  ;;  %v4387_v16 = vrot.slane %v4371_v20, %v7444_v36  ;;  %3010 = vmatprep.subr.bf16.mxu1 %v6795_v33  ;;  %v6828_v31 = vld [vmem:[#allocation2 + $0x4dc] ss:$20 sps:$4 sm:$0xff]   ;;  %v6826_v59 = vld [vmem:[#allocation2 + $0x4d8] ss:$20 sps:$4 sm:$0xff]   ;;  %v6835_v61 = vld [vmem:[#allocation2 + $0x5a0] ss:$20 sps:$4 sm:$0xff]  }
 0x24a   :  { %3081 = vmatprep.mubr.bf16.mxu0 %v7315_v0  ;;  %v4437_v10 = vcombine.low %v4328_v6, %v4329_v27  ;;  %v7949_v53 = vrot.slane %v4436_v7, %v7444_v36  ;;  %v6831_v47 = vld [vmem:[#allocation2 + $0x57c] ss:$20 sps:$4 sm:$0xff]   ;;  %v6837_v51 = vld [vmem:[#allocation2 + $0x5a4] ss:$20 sps:$4 sm:$0xff]   ;;  %v6840_v43 = vld [vmem:[#allocation2 + $0x52c] ss:$20 sps:$4 sm:$0xff]  }
 0x24b   :  { %v4394_v52 = vrot.slane %v4372_v42, %v7444_v36  ;;  %v4403_v18 = vcombine.high %v4380_v2, %v4387_v16  ;;  %v4402_v23 = vcombine.low %v4380_v2, %v4387_v16  ;;  %3049 = vmatprep.subr.bf16.mxu0 %v6831_v47  ;;  %v6834_v12 = vld [vmem:[#allocation2 + $0x504] ss:$20 sps:$4 sm:$0xff]   ;;  %v6841_v54 = vld [vmem:[#allocation2 + $0x5cc] ss:$20 sps:$4 sm:$0x3f]  }
 0x24c   :  { %1626 = vmatmul.mubr.bf16.gmra.mrb[12].mxu1 %v1452_v21  ;;  %v7952_v25 = vrot.slane %v4437_v10, %v7444_v36  ;;  %3050 = vmatpush1.bf16.msra.mxu0 %v6829_v48  ;;  %v6846_v22 = vld [vmem:[#allocation2 + $0x5c8] ss:$20 sps:$4 sm:$0x3f]   ;;  %v6832_v21 = vld [vmem:[#allocation2 + $0x500] ss:$20 sps:$4 sm:$0xff]  }
 0x24d   :  { %v4405_v26 = vcombine.high %v4394_v52, %v4401_v13  ;;  %v4404_v28 = vcombine.low %v4394_v52, %v4401_v13  ;;  %v4419_v32 = vrot.slane %v4403_v18, %v7444_v36  ;;  %v4412_v17 = vrot.slane %v4402_v23, %v7444_v36  ;;  %3011 = vmatpush1.bf16.msra.mxu1 %v6793_v38  ;;  %v6849_v20 = vld [vmem:[#allocation2 + $0x304] ss:$20 sps:$4 sm:$0xff]   ;;  %v6838_v6 = vld [vmem:[#allocation2 + $0x528] ss:$20 sps:$4 sm:$0xff]  }
 0x24e   :  { %v4453_v29 = vcombine.high %v7949_v53, %v7952_v25  ;;  %v4452_v50 = vcombine.low %v7949_v53, %v7952_v25  ;;  %3012 = vmatprep.subr.bf16.mxu1 %v6798_v35  ;;  %3051 = vmatprep.subr.bf16.mxu0 %v6837_v51  ;;  %v2994_v62 = vsel %vm2992_vm9, %v6846_v22, 0  ;;  %v6845_v27 = vld [vmem:[#allocation2 + $0x554] ss:$20 sps:$4 sm:$0xff]   ;;  %v6843_v7 = vld [vmem:[#allocation2 + $0x550] ss:$20 sps:$4 sm:$0xff]  }
 0x24f   :  { %v4433_v63 = vrot.slane %v4405_v26, %v7444_v36  ;;  %v4426_v58 = vrot.slane %v4404_v28, %v7444_v36  ;;  %v6852_v2 = vld [vmem:[#allocation2 + $0x584] ss:$20 sps:$4 sm:$0xff]   ;;  %v7969_v28 = vsub.s32 0, %v7441_v34  ;;  %v947_v4 = vld [vmem:[#allocation5] ss:$4 sm:$0x7] }
 0x250   :  { %3052 = vmatpush1.bf16.msra.mxu0 %v6835_v61  ;;  %v7089_v53 = vld [vmem:[%s8552_s2 + $0x1a0] ss:$12 sps:$4 sm:$0xff]   ;;  %v7090_v25 = vld [vmem:[%s8552_s2 + $0x1b8] ss:$12 sps:$4 sm:$0xff]  }
 0x251   :  { %v7962_v56 = vcombine.low %v4419_v32, %v4433_v63  ;;  %v7964_v9 = vcombine.low %v4412_v17, %v4426_v58  ;;  %3013 = vmatpush1.bf16.msra.mxu1 %v6796_v39  ;;  %6279 = vmatprep.subr.msk.bf16.mxu0 %vm2992_vm9, %v6841_v54  ;;  %v7972_v63 = vsub.s32 1, %v7441_v34 }
 0x252   :  { %3014 = vmatprep.subr.bf16.mxu1 %v6801_v40  ;;  %v7975_v40 = vrot.slane %v947_v4, %v7969_v28 }
 0x254   :  { %3054 = vmatpush1.bf16.msra.mxu0 %v2994_v62 }
 0x255   :  { %3015 = vmatpush1.bf16.msra.mxu1 %v6799_v45  ;;  %3090 = vmatprep.subr.bf16.mxu0 %v6849_v20 }
 0x256   :  { %3016 = vmatprep.subr.bf16.mxu1 %v6804_v19  ;;  %v7978_v19 = vrot.slane %v947_v4, %v7972_v63 }
 0x259   :  { %3017 = vmatpush1.bf16.msra.mxu1 %v6802_v8 }
 0x25a   :  { %3018 = vmatprep.subr.bf16.mxu1 %v6807_v41 }
 0x25d   :  { %3019 = vmatpush1.bf16.msra.mxu1 %v6805_v15 }
 0x25e   :  { %3020 = vmatprep.subr.bf16.mxu1 %v6810_v11 }
 0x261   :  { %3021 = vmatpush1.bf16.msra.mxu1 %v6808_v3 }
 0x262   :  { %3022 = vmatprep.subr.bf16.mxu1 %v6813_v14 }
 0x265   :  { %3023 = vmatpush1.bf16.msra.mxu1 %v6811_v60  ;;  %v7981_v60 = vsub.s32 2, %v7441_v34 }
 0x266   :  { %3024 = vmatprep.subr.bf16.mxu1 %v6816_v30 }
 0x269   :  { %3025 = vmatpush1.bf16.msra.mxu1 %v6814_v44 }
 0x26a   :  { %3026 = vmatprep.subr.bf16.mxu1 %v6819_v57 }
 0x26d   :  { %3027 = vmatpush1.bf16.msra.mxu1 %v6817_v46 }
 0x26e   :  { %3028 = vmatprep.subr.bf16.mxu1 %v6822_v37 }
 0x271   :  { %3029 = vmatpush1.bf16.msra.mxu1 %v6820_v24 }
 0x272   :  { %3030 = vmatprep.subr.bf16.mxu1 %v6825_v49 }
 0x275   :  { %3031 = vmatpush1.bf16.msra.mxu1 %v6823_v55 }
 0x276   :  { %3032 = vmatprep.subr.bf16.mxu1 %v6828_v31 }
 0x279   :  { %3033 = vmatpush1.bf16.msra.mxu1 %v6826_v59 }
 0x27a   :  { %3034 = vmatprep.subr.bf16.mxu1 %v6834_v12 }
 0x27d   :  { %3035 = vmatpush1.bf16.msra.mxu1 %v6832_v21 }
 0x27e   :  { %3036 = vmatprep.subr.bf16.mxu1 %v6840_v43 }
 0x281   :  { %3037 = vmatpush1.bf16.msra.mxu1 %v6838_v6 }
 0x282   :  { %3038 = vmatprep.subr.bf16.mxu1 %v6845_v27 }
 0x285   :  { %3039 = vmatpush1.bf16.msra.mxu1 %v6843_v7 }
 0x286   :  { %3131 = vmatprep.subr.bf16.mxu1 %v6852_v2 }
 0x2f3   :  { %v802_v42 = vpop.f32.mrb[0].mxu1 }
 0x2f4   :  { %v870_v16 = vrot.slane %v802_v42, 4  ;;  %v804_v10 = vpop.f32.mrb[1].mxu1 }
 0x2f5   :  { %v876_v13 = vrot.slane %v804_v10, 4  ;;  %v806_v52 = vpop.f32.mrb[2].mxu1 }
 0x2f6   :  { %v871_v18 = vmax.f32 %v802_v42, %v870_v16  ;;  %v890_v23 = vrot.slane %v806_v52, 4  ;;  %v808_v26 = vpop.f32.mrb[3].mxu1 }
 0x2f7   :  { %v877_v32 = vmax.f32 %v804_v10, %v876_v13  ;;  %v896_v17 = vrot.slane %v808_v26, 4 }
 0x2f8   :  { %v872_v58 = vrot.slane %v871_v18, 2  ;;  %v891_v5 = vmax.f32 %v806_v52, %v890_v23 }
 0x2f9   :  { %v878_v33 = vrot.slane %v877_v32, 2  ;;  %v897_v38 = vmax.f32 %v808_v26, %v896_v17  ;;  %v7990_v17 = vrot.slane %v947_v4, %v7981_v60 }
 0x2fa   :  { %v873_v35 = vmax.f32 %v871_v18, %v872_v58  ;;  %v892_v39 = vrot.slane %v891_v5, 2 }
 0x2fb   :  { %v879_v45 = vmax.f32 %v877_v32, %v878_v33  ;;  %v898_v8 = vrot.slane %v897_v38, 2  ;;  %v812_v41 = vpop.f32.mrb[4].mxu1  ;;  %v6663_v14 = vpop.f32.mrb[12].mxu0 }
 0x2fc   :  { %v874_v15 = vrot.slane %v873_v35, 1  ;;  %v893_v11 = vmax.f32 %v891_v5, %v892_v39  ;;  %v909_v3 = vrot.slane %v812_v41, 4  ;;  %v814_v30 = vpop.f32.mrb[5].mxu1  ;;  %v921_v46 = vsel %vm882_vm10, %v6663_v14, -inf  ;;  %v855_v24 = vpop.f32.mrb[13].mxu0 }
 0x2fd   :  { %v880_v44 = vrot.slane %v879_v45, 1  ;;  %v899_v57 = vmax.f32 %v897_v38, %v898_v8  ;;  %v915_v37 = vrot.slane %v814_v30, 4  ;;  %v816_v49 = vpop.f32.mrb[6].mxu1  ;;  %v922_v47 = vrot.slane %v921_v46, 4  ;;  %v6664_v59 = vpop.f32.mrb[14].mxu0 }
 0x2fe   :  { %v875_v55 = vmax.f32 %v873_v35, %v874_v15  ;;  %v894_v31 = vrot.slane %v893_v11, 1  ;;  %v910_v48 = vmax.f32 %v812_v41, %v909_v3  ;;  %v818_v51 = vpop.f32.mrb[7].mxu1  ;;  %v883_v22 = vsel %vm882_vm10, %v855_v24, -inf  ;;  %v858_v21 = vpop.f32.mrb[15].mxu0 }
 0x2ff   :  { %v881_v12 = vmax.f32 %v879_v45, %v880_v44  ;;  %v900_v61 = vrot.slane %v899_v57, 1  ;;  %v916_v54 = vmax.f32 %v814_v30, %v915_v37  ;;  %v923_v6 = vmax.f32 %v921_v46, %v922_v47 }
 0x300   :  { %v964_v43 = vadd.f32 %v7975_v40, %v875_v55  ;;  %v895_v62 = vmax.f32 %v893_v11, %v894_v31  ;;  %v911_v20 = vrot.slane %v910_v48, 2  ;;  %v884_v2 = vrot.slane %v883_v22, 4 }
 0x301   :  { %v901_v27 = vmax.f32 %v899_v57, %v900_v61  ;;  %v917_v7 = vrot.slane %v916_v54, 2  ;;  %v924_v10 = vrot.slane %v923_v6, 2  ;;  %v965_v13 = vadd.f32 %v7978_v19, %v881_v12 }
 0x302   :  { %v967_v42 = vadd.f32 %v7975_v40, %v895_v62  ;;  %v912_v16 = vmax.f32 %v910_v48, %v911_v20  ;;  %v885_v23 = vmax.f32 %v883_v22, %v884_v2  ;;  %v928_v45 = vrot.slane %v816_v49, 4 }
 0x303   :  { %v968_v52 = vadd.f32 %v7978_v19, %v901_v27  ;;  %v918_v18 = vmax.f32 %v916_v54, %v917_v7  ;;  %v925_v32 = vmax.f32 %v923_v6, %v924_v10  ;;  %v977_v8 = vpack.c.bf16 %v965_v13, %v965_v13 }
 0x304   :  { %v913_v26 = vrot.slane %v912_v16, 1  ;;  %v979_v58 = vpack.c.bf16 %v967_v42, %v967_v42  ;;  %v886_v38 = vrot.slane %v885_v23, 2  ;;  %v940_v11 = vsel %vm882_vm10, %v6664_v59, -inf }
 0x305   :  { %v980_v5 = vpack.c.bf16 %v968_v52, %v968_v52  ;;  %v919_v33 = vrot.slane %v918_v18, 1  ;;  %v926_v39 = vrot.slane %v925_v32, 1  ;;  %v976_v3 = vpack.c.bf16 %v964_v43, %v964_v43 }
 0x306   :  { %v914_v35 = vmax.f32 %v912_v16, %v913_v26  ;;  %v887_v15 = vmax.f32 %v885_v23, %v886_v38  ;;  %v929_v4 = vmax.f32 %v816_v49, %v928_v45  ;;  %v3267_v44 = vunpack.c.l.b16 %v979_v58 }
 0x307   :  { %v920_v41 = vmax.f32 %v918_v18, %v919_v33  ;;  %v3268_v14 = vunpack.c.l.b16 %v980_v5  ;;  %v927_v57 = vmax.f32 %v925_v32, %v926_v39  ;;  %v941_v37 = vrot.slane %v940_v11, 4 }
 0x308   :  { %v970_v30 = vadd.f32 %v7975_v40, %v914_v35  ;;  %v888_v55 = vrot.slane %v887_v15, 1  ;;  %v930_v31 = vrot.slane %v929_v4, 2  ;;  %v934_v48 = vrot.slane %v818_v51, 4 }
 0x309   :  { %v971_v46 = vadd.f32 %v7978_v19, %v920_v41  ;;  %v3265_v47 = vunpack.c.l.b16 %v977_v8  ;;  %v942_v61 = vmax.f32 %v940_v11, %v941_v37  ;;  %v902_v54 = vsel %vm882_vm10, %v858_v21, -inf }
 0x30a   :  { %v982_v24 = vpack.c.bf16 %v970_v30, %v970_v30  ;;  %v3282_v59 = vrot.slane %v3268_v14, 7  ;;  %v931_v43 = vmax.f32 %v929_v4, %v930_v31  ;;  %v935_v62 = vmax.f32 %v818_v51, %v934_v48  ;;  %v2294_v4 = vld [vmem:[#allocation5 + $0x1] ss:$4 sm:$0x7] }
 0x30b   :  { %v983_v12 = vpack.c.bf16 %v971_v46, %v971_v46  ;;  %v3276_v20 = vrot.slane %v3267_v44, 7  ;;  %v943_v6 = vrot.slane %v942_v61, 2  ;;  %v903_v27 = vrot.slane %v902_v54, 4 }
 0x30c   :  { %v3270_v22 = vunpack.c.l.b16 %v982_v24  ;;  %v972_v7 = vadd.f32 %v7990_v17, %v927_v57  ;;  %v889_v2 = vmax.f32 %v887_v15, %v888_v55  ;;  %v932_v42 = vrot.slane %v931_v43, 1 }
 0x30d   :  { %v3271_v49 = vunpack.c.l.b16 %v983_v12  ;;  %v936_v16 = vrot.slane %v935_v62, 2  ;;  %v944_v52 = vmax.f32 %v942_v61, %v943_v6  ;;  %v904_v18 = vmax.f32 %v902_v54, %v903_v27 }
 0x30e   :  { %v3278_v10 = vrot.slane %v3270_v22, 6  ;;  %v3264_v23 = vunpack.c.l.b16 %v976_v3  ;;  %v933_v26 = vmax.f32 %v931_v43, %v932_v42  ;;  %v3283_v32 = vsel %vm2475_vm11, %v3282_v59, %v3265_v47 }
 0x30f   :  { %v3284_v13 = vrot.slane %v3271_v49, 6  ;;  %v937_v21 = vmax.f32 %v935_v62, %v936_v16  ;;  %v945_v58 = vrot.slane %v944_v52, 1  ;;  %v905_v51 = vrot.slane %v904_v18, 2 }
 0x310   :  { %v984_v33 = vpack.c.bf16 %v972_v7, %v972_v7  ;;  %v973_v38 = vadd.f32 %v7975_v40, %v933_v26  ;;  %v3277_v39 = vsel %vm2475_vm11, %v3276_v20, %v3264_v23  ;;  %v966_v45 = vadd.f32 %v7990_v17, %v889_v2 }
 0x311   :  { %v3285_v5 = vsel %vm2478_vm12, %v3284_v13, %v3283_v32  ;;  %v938_v35 = vrot.slane %v937_v21, 1  ;;  %v946_v8 = vmax.f32 %v944_v52, %v945_v58  ;;  %v906_v41 = vmax.f32 %v904_v18, %v905_v51 }
 0x312   :  { %v3279_v15 = vsel %vm2478_vm12, %v3278_v10, %v3277_v39  ;;  %v985_v11 = vpack.c.bf16 %v973_v38, %v973_v38  ;;  %v8005_v40 = vunpack.c.l.b16 %v984_v33  ;;  %v978_v46 = vpack.c.bf16 %v966_v45, %v966_v45 }
 0x313   :  { %v939_v3 = vmax.f32 %v937_v21, %v938_v35  ;;  %v975_v14 = vadd.f32 %v7990_v17, %v946_v8  ;;  %v907_v30 = vrot.slane %v906_v41, 1  ;;  %v8008_v12 = vrot.slane %v2294_v4, %v7969_v28 }
 0x314   :  { %v3273_v44 = vunpack.c.l.b16 %v985_v11  ;;  %v8014_v20 = vrot.slane %v2294_v4, %v7972_v63  ;;  %v8017_v49 = vrot.slane %v2294_v4, %v7981_v60  ;;  %v3290_v27 = vrot.slane %v8005_v40, 6 }
 0x315   :  { %v974_v57 = vadd.f32 %v7978_v19, %v939_v3  ;;  %v987_v37 = vpack.c.bf16 %v975_v14, %v975_v14  ;;  %v908_v24 = vmax.f32 %v906_v41, %v907_v30  ;;  %v3266_v7 = vunpack.c.l.b16 %v978_v46 }
 0x316   :  { %v3280_v31 = vrot.slane %v3273_v44, 5 }
 0x317   :  { %v1617_v55 = vpop.f32.mrb[8].mxu1  ;;  %v986_v48 = vpack.c.bf16 %v974_v57, %v974_v57  ;;  %v8010_v61 = vunpack.c.l.b16 %v987_v37  ;;  %v969_v54 = vadd.f32 %v7990_v17, %v908_v24 }
 0x318   :  { %v1619_v47 = vpop.f32.mrb[9].mxu1  ;;  %v8020_v6 = vsel %vm2481_vm13, %v3280_v31, %v3279_v15 }
 0x319   :  { %v1697_v59 = vcombine.low %v1617_v55, %v1619_v47  ;;  %v1698_v22 = vcombine.high %v1617_v55, %v1619_v47  ;;  %v1621_v19 = vpop.f32.mrb[10].mxu1  ;;  %v3274_v43 = vunpack.c.l.b16 %v986_v48  ;;  %v3292_v2 = vrot.slane %v8010_v61, 5 }
 0x31a   :  { %v1623_v62 = vpop.f32.mrb[11].mxu1  ;;  %v981_v17 = vpack.c.bf16 %v969_v54, %v969_v54 }
 0x31b   :  { %v1706_v42 = vrot.slane %v1697_v59, %v7444_v36  ;;  %v1764_v16 = vcombine.low %v1621_v19, %v1623_v62  ;;  %v1765_v10 = vcombine.high %v1621_v19, %v1623_v62  ;;  %v3286_v52 = vrot.slane %v3274_v43, 5 }
 0x31c   :  { %v6683_v13 = vpop.f32.mrb[16].mxu0  ;;  %v3269_v18 = vunpack.c.l.b16 %v981_v17  ;;  %v1713_v23 = vrot.slane %v1698_v22, %v7444_v36 }
 0x31d   :  { %v1833_v26 = vcombine.high %v6683_v13, %v6683_v13  ;;  %v1854_v21 = vrot.slane %v6683_v13, %v7444_v36  ;;  %v1670_v32 = vpop.f32.mrb[17].mxu0  ;;  %v8028_v58 = vrot.slane %v1764_v16, %v7444_v36  ;;  %v8031_v51 = vrot.slane %v1765_v10, %v7444_v36 }
 0x31e   :  { %v1699_v33 = vcombine.high %v1670_v32, %v1670_v32  ;;  %v1720_v38 = vrot.slane %v1670_v32, %v7444_v36  ;;  %v6684_v35 = vpop.f32.mrb[18].mxu0  ;;  %v3288_v39 = vrot.slane %v3269_v18, 7  ;;  %v8039_v11 = vsel %vm2481_vm13, %v3286_v52, %v3285_v5 }
 0x31f   :  { %v1861_v45 = vrot.slane %v1833_v26, %v7444_v36  ;;  %v1627_v8 = vpop.f32.mrb[12].mxu1  ;;  %v8036_v41 = vrot.slane %v6684_v35, %v7444_v36  ;;  %v1673_v15 = vpop.f32.mrb[19].mxu0 }
 0x320   :  { %v1727_v3 = vrot.slane %v1699_v33, %v7444_v36  ;;  %v1728_v14 = vcombine.low %v1706_v42, %v1720_v38  ;;  %v1729_v30 = vcombine.high %v1706_v42, %v1720_v38  ;;  %v1629_v4 = vpop.f32.mrb[13].mxu1  ;;  %v1766_v44 = vcombine.high %v1673_v15, %v1673_v15 }
 0x321   :  { %v8043_v57 = vsel %vm2475_vm11, %v3288_v39, %v3266_v7  ;;  %v1831_v46 = vcombine.low %v1627_v8, %v1629_v4  ;;  %v1832_v37 = vcombine.high %v1627_v8, %v1629_v4  ;;  %v8046_v24 = vrot.slane %v1673_v15, %v7444_v36  ;;  %v8048_v55 = vpop.f32.mrb[14].mxu1 }
 0x322   :  { %v1730_v31 = vcombine.low %v1713_v23, %v1727_v3  ;;  %v1731_v48 = vcombine.high %v1713_v23, %v1727_v3  ;;  %v1738_v5 = vrot.slane %v1728_v14, %v7444_v36  ;;  %v1752_v47 = vrot.slane %v1729_v30, %v7444_v36  ;;  %v8052_v54 = vpop.f32.mrb[15].mxu1 }
 0x323   :  { %v1840_v59 = vrot.slane %v1831_v46, %v7444_v36  ;;  %v1847_v22 = vrot.slane %v1832_v37, %v7444_v36  ;;  %v1794_v19 = vrot.slane %v1766_v44, %v7444_v36  ;;  %v1795_v43 = vcombine.low %v8028_v58, %v8046_v24 }
 0x324   :  { %v1745_v62 = vrot.slane %v1730_v31, %v7444_v36  ;;  %v1759_v7 = vrot.slane %v1731_v48, %v7444_v36  ;;  %v1931_v17 = vcombine.low %v1738_v5, %v1752_v47  ;;  %v6181_v42 = vcombine.high %v1738_v5, %v1752_v47 }
 0x325   :  { %v1862_v16 = vcombine.low %v1840_v59, %v1854_v21  ;;  %v1863_v10 = vcombine.high %v1840_v59, %v1854_v21  ;;  %v1864_v13 = vcombine.low %v1847_v22, %v1861_v45  ;;  %v1865_v52 = vcombine.high %v1847_v22, %v1861_v45 }
 0x326   :  { %v1761_v18 = vcombine.high %v1745_v62, %v1745_v62  ;;  %v1933_v23 = vcombine.low %v1745_v62, %v1759_v7  ;;  %v1940_v26 = vrot.slane %v1931_v17, %v7444_v36  ;;  %v1947_v32 = vrot.slane %v6181_v42, %v7444_v36 }
 0x327   :  { %v1872_v33 = vrot.slane %v1862_v16, %v7444_v36  ;;  %v1879_v38 = vrot.slane %v1864_v13, %v7444_v36  ;;  %v1886_v35 = vrot.slane %v1863_v10, %v7444_v36  ;;  %v8067_v39 = vrot.slane %v1865_v52, %v7444_v36 }
 0x328   :  { %v1954_v8 = vrot.slane %v1933_v23, %v7444_v36  ;;  %v1961_v21 = vrot.slane %v1761_v18, %v7444_v36  ;;  %v1962_v45 = vcombine.low %v1940_v26, %v1947_v32  ;;  %v1963_v15 = vcombine.high %v1940_v26, %v1947_v32 }
 0x329   :  { %v1895_v3 = vcombine.high %v1879_v38, %v1879_v38  ;;  %v1897_v14 = vcombine.high %v8067_v39, %v8067_v39  ;;  %v2064_v30 = vcombine.low %v1872_v33, %v1886_v35  ;;  %v6183_v4 = vcombine.high %v1872_v33, %v1886_v35 }
 0x32a   :  { %v1964_v44 = vcombine.low %v1954_v8, %v1961_v21  ;;  %v1965_v46 = vcombine.high %v1954_v8, %v1961_v21  ;;  %v1972_v37 = vrot.slane %v1962_v45, %v7444_v36  ;;  %v1979_v31 = vrot.slane %v1963_v15, %v7444_v36 }
 0x32b   :  { %v8076_v48 = vrot.slane %v2064_v30, %v7444_v36  ;;  %v2086_v5 = vrot.slane %v6183_v4, %v7444_v36  ;;  %v2093_v47 = vrot.slane %v1879_v38, %v7444_v36  ;;  %v2129_v59 = vcombine.low %v8067_v39, %v1895_v3 }
 0x32c   :  { %v1986_v22 = vrot.slane %v1964_v44, %v7444_v36  ;;  %v1993_v62 = vrot.slane %v1965_v46, %v7444_v36  ;;  %v1763_v17 = vcombine.high %v1759_v7, %v1759_v7  ;;  %v1796_v42 = vcombine.high %v8028_v58, %v8046_v24 }
 0x32d   :  { %v2096_v16 = vcombine.low %v2086_v5, %v2093_v47  ;;  %v2097_v10 = vcombine.high %v2086_v5, %v2093_v47  ;;  %v8086_v13 = vrot.slane %v2129_v59, %v7444_v36  ;;  %v1797_v52 = vcombine.low %v8031_v51, %v1794_v19 }
 0x32e   :  { %v1994_v18 = vcombine.low %v1972_v37, %v1986_v22  ;;  %v1995_v23 = vcombine.high %v1972_v37, %v1986_v22  ;;  %v1996_v26 = vcombine.low %v1979_v31, %v1993_v62  ;;  %v1798_v32 = vcombine.high %v8031_v51, %v1794_v19 }
 0x32f   :  { %v8091_v33 = vrot.slane %v2096_v16, %v7444_v36  ;;  %v8094_v7 = vrot.slane %v2097_v10, %v7444_v36  ;;  %v1805_v58 = vrot.slane %v1795_v43, %v7444_v36  ;;  %v1812_v24 = vrot.slane %v1797_v52, %v7444_v36 }
 0x330   :  { %v2208_v38 = vsel %vm2207_vm14, %v1994_v18, -inf  ;;  %v2215_v35 = vsel %vm2207_vm14, %v1996_v26, -inf  ;;  %v2223_v8 = vsel %vm2222_vm15, %v1995_v23, -inf  ;;  %v1819_v21 = vrot.slane %v1796_v42, %v7444_v36 }
 0x331   :  { %v2209_v45 = vrot.slane %v2208_v38, 4  ;;  %v2216_v51 = vrot.slane %v2215_v35, 4  ;;  %v2224_v19 = vrot.slane %v2223_v8, 4  ;;  %v1826_v15 = vrot.slane %v1798_v32, %v7444_v36 }
 0x332   :  { %v1827_v3 = vcombine.high %v1805_v58, %v1805_v58  ;;  %v1829_v30 = vcombine.high %v1819_v21, %v1819_v21  ;;  %v1997_v4 = vcombine.low %v1763_v17, %v1805_v58  ;;  %v1898_v43 = vcombine.low %v8048_v55, %v8052_v54 }
 0x333   :  { %v2210_v44 = vmax.f32 %v2208_v38, %v2209_v45  ;;  %v8105_v46 = vmax.f32 %v2215_v35, %v2216_v51  ;;  %v2225_v37 = vmax.f32 %v2223_v8, %v2224_v19  ;;  %v2027_v31 = vrot.slane %v1826_v15, %v7444_v36 }
 0x334   :  { %v1998_v5 = vcombine.low %v1819_v21, %v1827_v3  ;;  %v1999_v47 = vcombine.low %v1829_v30, %v1812_v24  ;;  %v2006_v59 = vrot.slane %v1997_v4, %v7444_v36  ;;  %v6182_v22 = vcombine.high %v1812_v24, %v1826_v15 }
 0x335   :  { %v2211_v62 = vrot.slane %v2210_v44, 2  ;;  %v2226_v42 = vrot.slane %v2225_v37, 2  ;;  %v1905_v16 = vrot.slane %v1898_v43, %v7444_v36  ;;  %v2218_v17 = vrot.slane %v8105_v46, 2 }
 0x336   :  { %v2013_v10 = vrot.slane %v1998_v5, %v7444_v36  ;;  %v2020_v55 = vrot.slane %v1999_v47, %v7444_v36  ;;  %v2072_v54 = vrot.slane %v6182_v22, %v7444_v36  ;;  %v8118_v52 = vsel %vm2478_vm12, %v3290_v27, %v8043_v57 }
 0x337   :  { %v2212_v18 = vmax.f32 %v2210_v44, %v2211_v62  ;;  %v2227_v23 = vmax.f32 %v2225_v37, %v2226_v42  ;;  %v1913_v26 = vcombine.low %v1905_v16, %v8036_v41  ;;  %v1914_v32 = vcombine.high %v1905_v16, %v8036_v41 }
 0x338   :  { %v2028_v58 = vcombine.low %v2006_v59, %v2013_v10  ;;  %v2029_v24 = vcombine.high %v2006_v59, %v2013_v10  ;;  %v2030_v38 = vcombine.low %v2020_v55, %v2027_v31  ;;  %v2031_v35 = vcombine.high %v2020_v55, %v2027_v31 }
 0x339   :  { %v2213_v8 = vrot.slane %v2212_v18, 1  ;;  %v2228_v21 = vrot.slane %v2227_v23, 1  ;;  %v2094_v45 = vcombine.low %v2072_v54, %v8076_v48  ;;  %v2095_v51 = vcombine.high %v2072_v54, %v8076_v48 }
 0x33a   :  { %v2038_v40 = vrot.slane %v2028_v58, %v7444_v36  ;;  %v2045_v27 = vrot.slane %v2029_v24, %v7444_v36  ;;  %v2052_v57 = vrot.slane %v2030_v38, %v7444_v36  ;;  %v2059_v19 = vrot.slane %v2031_v35, %v7444_v36 }
 0x33b   :  { %v8128_v15 = vmax.f32 %v2212_v18, %v2213_v8  ;;  %v8130_v41 = vmax.f32 %v2227_v23, %v2228_v21  ;;  %v2104_v3 = vrot.slane %v2094_v45, %v7444_v36  ;;  %v2111_v30 = vrot.slane %v2095_v51, %v7444_v36 }
 0x33c   :  { %v2060_v4 = vcombine.low %v2038_v40, %v2052_v57  ;;  %v2061_v43 = vcombine.high %v2038_v40, %v2052_v57  ;;  %v2062_v44 = vcombine.low %v2045_v27, %v2059_v19  ;;  %v1921_v48 = vrot.slane %v1913_v26, %v7444_v36 }
 0x33d   :  { %v2126_v37 = vcombine.low %v2104_v3, %v8091_v33  ;;  %v2127_v31 = vcombine.high %v2104_v3, %v8091_v33  ;;  %v2128_v5 = vcombine.low %v2111_v30, %v8094_v7  ;;  %v1928_v47 = vrot.slane %v1914_v32, %v7444_v36 }
 0x33e   :  { %v2230_v59 = vsel %vm2207_vm14, %v2060_v4, -inf  ;;  %v2237_v22 = vsel %vm2207_vm14, %v2062_v44, -inf  ;;  %v2244_v62 = vsel %vm2222_vm15, %v2061_v43, -inf  ;;  %v1929_v42 = vcombine.high %v1921_v48, %v1921_v48 }
 0x33f   :  { %v2231_v16 = vrot.slane %v2230_v59, 4  ;;  %v2238_v10 = vrot.slane %v2237_v22, 4  ;;  %v2245_v55 = vrot.slane %v2244_v62, 4  ;;  %v2251_v54 = vsel %vm2207_vm14, %v2126_v37, -inf }
 0x340   :  { %v2252_v18 = vrot.slane %v2251_v54, 4  ;;  %v2265_v23 = vsel %vm2222_vm15, %v2127_v31, -inf  ;;  %v1930_v33 = vcombine.high %v1928_v47, %v1928_v47  ;;  %v2130_v7 = vcombine.low %v1897_v14, %v1921_v48 }
 0x341   :  { %v2232_v26 = vmax.f32 %v2230_v59, %v2231_v16  ;;  %v2239_v32 = vmax.f32 %v2237_v22, %v2238_v10  ;;  %v2246_v58 = vmax.f32 %v2244_v62, %v2245_v55  ;;  %v2266_v24 = vrot.slane %v2265_v23, 4 }
 0x342   :  { %v2253_v38 = vmax.f32 %v2251_v54, %v2252_v18  ;;  %v2131_v35 = vcombine.low %v1928_v47, %v1929_v42  ;;  %v2145_v8 = vrot.slane %v2130_v7, %v7444_v36  ;;  %v2159_v21 = vrot.slane %v1930_v33, %v7444_v36 }
 0x343   :  { %v2233_v45 = vrot.slane %v2232_v26, 2  ;;  %v2247_v51 = vrot.slane %v2246_v58, 2  ;;  %v2267_v40 = vmax.f32 %v2265_v23, %v2266_v24  ;;  %v2219_v27 = vmax.f32 %v8105_v46, %v2218_v17 }
 0x344   :  { %v2254_v57 = vrot.slane %v2253_v38, 2  ;;  %v2152_v19 = vrot.slane %v2131_v35, %v7444_v36  ;;  %v2160_v39 = vcombine.low %v8086_v13, %v2145_v8  ;;  %v2161_v14 = vcombine.high %v8086_v13, %v2145_v8 }
 0x345   :  { %v2234_v3 = vmax.f32 %v2232_v26, %v2233_v45  ;;  %v2248_v30 = vmax.f32 %v2246_v58, %v2247_v51  ;;  %v2268_v4 = vrot.slane %v2267_v40, 2  ;;  %v2220_v43 = vrot.slane %v2219_v27, 1 }
 0x346   :  { %v8153_v44 = vmax.f32 %v2253_v38, %v2254_v57  ;;  %v2162_v48 = vcombine.low %v2152_v19, %v2159_v21  ;;  %v2163_v37 = vcombine.high %v2152_v19, %v2159_v21  ;;  %v2170_v31 = vrot.slane %v2160_v39, %v7444_v36 }
 0x347   :  { %v2235_v47 = vrot.slane %v2234_v3, 1  ;;  %v2249_v59 = vrot.slane %v2248_v30, 1  ;;  %v2269_v46 = vmax.f32 %v2267_v40, %v2268_v4  ;;  %v2177_v17 = vrot.slane %v2161_v14, %v7444_v36 }
 0x348   :  { %v2184_v22 = vrot.slane %v2162_v48, %v7444_v36  ;;  %v2191_v62 = vrot.slane %v2163_v37, %v7444_v36  ;;  %v2221_v13 = vmax.f32 %v2219_v27, %v2220_v43  ;;  %v2240_v42 = vrot.slane %v2239_v32, 2 }
 0x349   :  { %v8159_v16 = vmax.f32 %v2234_v3, %v2235_v47  ;;  %v2250_v10 = vmax.f32 %v2248_v30, %v2249_v59  ;;  %v2258_v55 = vsel %vm2207_vm14, %v2128_v5, -inf  ;;  %v2270_v54 = vrot.slane %v2269_v46, 1 }
 0x34a   :  { %v2192_v18 = vcombine.low %v2170_v31, %v2184_v22  ;;  %v2193_v23 = vcombine.high %v2170_v31, %v2184_v22  ;;  %v2194_v33 = vcombine.low %v2177_v17, %v2191_v62  ;;  %v2241_v7 = vmax.f32 %v2239_v32, %v2240_v42 }
 0x34b   :  { %v2259_v26 = vrot.slane %v2258_v55, 4  ;;  %v2312_v58 = vadd.f32 %v8014_v20, %v2221_v13  ;;  %v2271_v24 = vmax.f32 %v2269_v46, %v2270_v54  ;;  %v2313_v38 = vadd.f32 %v8017_v49, %v8130_v41 }
 0x34c   :  { %v2272_v35 = vsel %vm2207_vm14, %v2192_v18, -inf  ;;  %v2286_v8 = vsel %vm2222_vm15, %v2193_v23, -inf  ;;  %v2242_v21 = vrot.slane %v2241_v7, 1  ;;  %v2279_v45 = vsel %vm2207_vm14, %v2194_v33, -inf }
 0x34d   :  { %v2273_v5 = vrot.slane %v2272_v35, 4  ;;  %v2287_v51 = vrot.slane %v2286_v8, 4  ;;  %v2260_v40 = vmax.f32 %v2258_v55, %v2259_v26  ;;  %v2280_v27 = vrot.slane %v2279_v45, 4 }
 0x34e   :  { %v2243_v57 = vmax.f32 %v2241_v7, %v2242_v21  ;;  %v2324_v32 = vpack.c.bf16 %v2312_v58, %v2312_v58  ;;  %v2316_v19 = vadd.f32 %v8017_v49, %v2250_v10  ;;  %v2319_v39 = vadd.f32 %v8017_v49, %v2271_v24 }
 0x34f   :  { %v2274_v14 = vmax.f32 %v2272_v35, %v2273_v5  ;;  %v2288_v3 = vmax.f32 %v2286_v8, %v2287_v51  ;;  %v2261_v41 = vrot.slane %v2260_v40, 2  ;;  %v2281_v30 = vmax.f32 %v2279_v45, %v2280_v27 }
 0x350   :  { %v2315_v4 = vadd.f32 %v8014_v20, %v2243_v57  ;;  %v2463_v43 = vunpack.c.l.b16 %v2324_v32  ;;  %v2325_v48 = vpack.c.bf16 %v2313_v38, %v2313_v38  ;;  %v2328_v37 = vpack.c.bf16 %v2316_v19, %v2316_v19 }
 0x351   :  { %v2275_v31 = vrot.slane %v2274_v14, 2  ;;  %v2289_v47 = vrot.slane %v2288_v3, 2  ;;  %v2262_v59 = vmax.f32 %v2260_v40, %v2261_v41  ;;  %v2282_v46 = vrot.slane %v2281_v30, 2 }
 0x352   :  { %v2327_v17 = vpack.c.bf16 %v2315_v4, %v2315_v4  ;;  %v2331_v22 = vpack.c.bf16 %v2319_v39, %v2319_v39  ;;  %v2464_v62 = vunpack.c.l.b16 %v2325_v48  ;;  %v2467_v13 = vunpack.c.l.b16 %v2328_v37 }
 0x353   :  { %v2276_v42 = vmax.f32 %v2274_v14, %v2275_v31  ;;  %v2290_v10 = vmax.f32 %v2288_v3, %v2289_v47  ;;  %v2263_v55 = vrot.slane %v2262_v59, 1  ;;  %v2283_v54 = vmax.f32 %v2281_v30, %v2282_v46 }
 0x354   :  { %v2466_v18 = vunpack.c.l.b16 %v2327_v17  ;;  %v2470_v23 = vunpack.c.l.b16 %v2331_v22  ;;  %v2489_v33 = vrot.slane %v2467_v13, 7  ;;  %v2256_v7 = vrot.slane %v8153_v44, 1 }
 0x355   :  { %v2264_v26 = vmax.f32 %v2262_v59, %v2263_v55  ;;  %v2284_v58 = vrot.slane %v2283_v54, 1  ;;  %v2291_v24 = vrot.slane %v2290_v10, 1  ;;  %v2277_v38 = vrot.slane %v2276_v42, 1  ;;  %v6847_v55 = vld [vmem:[#allocation2 + $0x300] ss:$20 sps:$4 sm:$0xff]  }
 0x356   :  { %v2483_v35 = vrot.slane %v2466_v18, 7  ;;  %v2490_v8 = vsel %vm2475_vm11, %v2489_v33, %v2464_v62  ;;  %v2491_v21 = vrot.slane %v2470_v23, 6  ;;  %v2257_v45 = vmax.f32 %v8153_v44, %v2256_v7 }
 0x357   :  { %v2285_v5 = vmax.f32 %v2283_v54, %v2284_v58  ;;  %v2318_v51 = vadd.f32 %v8014_v20, %v2264_v26  ;;  %v2292_v40 = vmax.f32 %v2290_v10, %v2291_v24  ;;  %v2278_v27 = vmax.f32 %v2276_v42, %v2277_v38  ;;  %v6850_v26 = vld [vmem:[#allocation2 + $0x580] ss:$20 sps:$4 sm:$0xff]  }
 0x358   :  { %v2484_v57 = vsel %vm2475_vm11, %v2483_v35, %v2463_v43  ;;  %v2492_v32 = vsel %vm2478_vm12, %v2491_v21, %v2490_v8  ;;  %v2311_v19 = vadd.f32 %v8008_v12, %v8128_v15  ;;  %v2314_v39 = vadd.f32 %v8008_v12, %v8159_v16  ;;  %v6855_v38 = vld [vmem:[#allocation2 + $0x32c] ss:$20 sps:$4 sm:$0xff]   ;;  %v6853_v8 = vld [vmem:[#allocation2 + $0x328] ss:$20 sps:$4 sm:$0xff]  }
 0x359   :  { %v2321_v14 = vadd.f32 %v8014_v20, %v2285_v5  ;;  %v2330_v3 = vpack.c.bf16 %v2318_v51, %v2318_v51  ;;  %v2322_v44 = vadd.f32 %v8017_v49, %v2292_v40  ;;  %v2317_v41 = vadd.f32 %v8008_v12, %v2257_v45  ;;  %v6858_v35 = vld [vmem:[#allocation2 + $0x5ac] ss:$20 sps:$4 sm:$0xff]   ;;  %v6856_v21 = vld [vmem:[#allocation2 + $0x5a8] ss:$20 sps:$4 sm:$0xff]   ;;  %v6859_v40 = vld [vmem:[#allocation2 + $0x350] ss:$20 sps:$4 sm:$0xff]  }
 0x35a   :  { %v2320_v30 = vadd.f32 %v8008_v12, %v2278_v27  ;;  %v2323_v4 = vpack.c.bf16 %v2311_v19, %v2311_v19  ;;  %v2326_v48 = vpack.c.bf16 %v2314_v39, %v2314_v39  ;;  %v8189_v43 = vsel %vm2481_vm13, %v3292_v2, %v8118_v52  ;;  %v6861_v45 = vld [vmem:[#allocation2 + $0x354] ss:$20 sps:$4 sm:$0xff]   ;;  %v6864_v51 = vld [vmem:[#allocation2 + $0x5d0] ss:$20 sps:$4 sm:$0x3f]  }
 0x35b   :  { %v2333_v15 = vpack.c.bf16 %v2321_v14, %v2321_v14  ;;  %v2469_v37 = vunpack.c.l.b16 %v2330_v3  ;;  %v2334_v16 = vpack.c.bf16 %v2322_v44, %v2322_v44  ;;  %v2329_v31 = vpack.c.bf16 %v2317_v41, %v2317_v41  ;;  %v6862_v5 = vld [vmem:[#allocation2 + $0x5d4] ss:$20 sps:$4 sm:$0x3f]   ;;  %v6867_v27 = vld [vmem:[#allocation2 + $0x37c] ss:$20 sps:$4 sm:$0xff]  }
 0x35c   :  { %v2332_v20 = vpack.c.bf16 %v2320_v30, %v2320_v30  ;;  %v2465_v47 = vunpack.c.l.b16 %v2326_v48  ;;  %v2462_v22 = vunpack.c.l.b16 %v2323_v4  ;;  %v6865_v19 = vld [vmem:[#allocation2 + $0x378] ss:$20 sps:$4 sm:$0xff]   ;;  %v6869_v39 = vld [vmem:[#allocation2 + $0x308] ss:$20 sps:$4 sm:$0xff]   ;;  %v6873_v3 = vld [vmem:[#allocation2 + $0x470] ss:$20 sps:$4 sm:$0xff]  }
 0x35d   :  { %v2472_v59 = vunpack.c.l.b16 %v2333_v15  ;;  %v2485_v49 = vrot.slane %v2469_v37, 6  ;;  %v2473_v46 = vunpack.c.l.b16 %v2334_v16  ;;  %v2468_v17 = vunpack.c.l.b16 %v2329_v31  ;;  %v6872_v14 = vld [vmem:[#allocation2 + $0x3a4] ss:$20 sps:$4 sm:$0xff]   ;;  %v6870_v44 = vld [vmem:[#allocation2 + $0x3a0] ss:$20 sps:$4 sm:$0xff]  }
 0x35e   :  { %v2471_v12 = vunpack.c.l.b16 %v2332_v20  ;;  %v2474_v62 = vrot.slane %v2465_v47, 7  ;;  %v6874_v41 = vld [vmem:[#allocation2 + $0x330] ss:$20 sps:$4 sm:$0xff]   ;;  %v6877_v30 = vld [vmem:[#allocation2 + $0x3cc] ss:$20 sps:$4 sm:$0xff]  }
 0x35f   :  { %v2486_v13 = vsel %vm2478_vm12, %v2485_v49, %v2484_v57  ;;  %v2487_v42 = vrot.slane %v2472_v59, 5  ;;  %v2493_v61 = vrot.slane %v2473_v46, 5  ;;  %v2477_v10 = vrot.slane %v2468_v17, 6  ;;  %v6878_v4 = vld [vmem:[#allocation2 + $0x498] ss:$20 sps:$4 sm:$0xff]  }
 0x360   :  { %v2476_v2 = vsel %vm2475_vm11, %v2474_v62, %v2462_v22  ;;  %v2480_v52 = vrot.slane %v2471_v12, 5  ;;  %v3000_v57 = vsel %vm2992_vm9, %v6864_v51, 0  ;;  %v6875_v48 = vld [vmem:[#allocation2 + $0x3c8] ss:$20 sps:$4 sm:$0xff]   ;;  %v6879_v15 = vld [vmem:[#allocation2 + $0x358] ss:$20 sps:$4 sm:$0xff]  }
 0x361   :  { %v2488_v54 = vsel %vm2481_vm13, %v2487_v42, %v2486_v13  ;;  %v2494_v18 = vsel %vm2481_vm13, %v2493_v61, %v2492_v32  ;;  %v2479_v23 = vsel %vm2478_vm12, %v2477_v10, %v2476_v2  ;;  %v6868_v32 = vld [vmem:[#allocation2 + $0x448] ss:$20 sps:$4 sm:$0xff]   ;;  %v6883_v16 = vld [vmem:[#allocation2 + $0x4c0] ss:$20 sps:$4 sm:$0xff]   ;;  %v6880_v31 = vld [vmem:[#allocation2 + $0x3f0] ss:$20 sps:$4 sm:$0xff]  }
 0x362   :  { %v2496_v33 = vpack.c.b16 %v2488_v54, %v2488_v54  ;;  %v8196_v7 = vpack.c.b16 %v2494_v18, %v2494_v18  ;;  %v2482_v58 = vsel %vm2481_vm13, %v2480_v52, %v2479_v23  ;;  %v6882_v37 = vld [vmem:[#allocation2 + $0x3f4] ss:$20 sps:$4 sm:$0xff]   ;;  %v6887_v47 = vld [vmem:[#allocation2 + $0x41c] ss:$20 sps:$4 sm:$0xff]   ;;  %v6885_v49 = vld [vmem:[#allocation2 + $0x418] ss:$20 sps:$4 sm:$0xff]  }
 0x363   :  { %v8199_v24 = vpack.c.b16 %v2482_v58, %v2482_v58  ;;  %v6884_v20 = vld [vmem:[#allocation2 + $0x380] ss:$20 sps:$4 sm:$0xff]   ;;  %v6888_v59 = vld [vmem:[#allocation2 + $0x4e8] ss:$20 sps:$4 sm:$0xff]   ;;  %v6892_v17 = vld [vmem:[#allocation2 + $0x444] ss:$20 sps:$4 sm:$0xff]  }
 0x364   :  { %3040 = vmatprep.mubr.bf16.mxu1 %v2496_v33  ;;  %6280 = vmatmul.mubr.msk.bf16.vlgmr.msra.gmra.mrb[20].mxu0 %vm882_vm10, %v8196_v7  ;;  %v6889_v46 = vld [vmem:[#allocation2 + $0x3a8] ss:$20 sps:$4 sm:$0xff]   ;;  %v6893_v22 = vld [vmem:[#allocation2 + $0x510] ss:$20 sps:$4 sm:$0xff]   ;;  %v6890_v12 = vld [vmem:[#allocation2 + $0x440] ss:$20 sps:$4 sm:$0xff]  }
 0x365   :  { %3091 = vmatpush1.bf16.msra.mxu0 %v6847_v55  ;;  %3041 = vmatmul.mubr.bf16.vlgmr.msra.gmra.mrb[16].mxu1 %v8199_v24  ;;  %v6894_v62 = vld [vmem:[#allocation2 + $0x3d0] ss:$20 sps:$4 sm:$0xff]   ;;  %v6897_v13 = vld [vmem:[#allocation2 + $0x46c] ss:$20 sps:$4 sm:$0xff]   ;;  %v6895_v61 = vld [vmem:[#allocation2 + $0x468] ss:$20 sps:$4 sm:$0xff]  }
 0x366   :  { %3122 = vmatprep.mubr.bf16.mxu0 %v2496_v33  ;;  %3132 = vmatpush1.bf16.msra.mxu1 %v6850_v26  ;;  %v6898_v42 = vld [vmem:[#allocation2 + $0x538] ss:$20 sps:$4 sm:$0xff]   ;;  %v6902_v2 = vld [vmem:[#allocation2 + $0x494] ss:$20 sps:$4 sm:$0xff]   ;;  %v6900_v55 = vld [vmem:[#allocation2 + $0x490] ss:$20 sps:$4 sm:$0xff]  }
 0x367   :  { %3092 = vmatprep.subr.bf16.mxu0 %v6855_v38  ;;  %3133 = vmatprep.subr.bf16.mxu1 %v6858_v35  ;;  %v6899_v10 = vld [vmem:[#allocation2 + $0x3f8] ss:$20 sps:$4 sm:$0xff]   ;;  %v6903_v52 = vld [vmem:[#allocation2 + $0x560] ss:$20 sps:$4 sm:$0xff]   ;;  %v6907_v18 = vld [vmem:[#allocation2 + $0x4bc] ss:$20 sps:$4 sm:$0xff]  }
 0x368   :  { %3163 = vmatprep.mubr.bf16.mxu1 %v7315_v0  ;;  %v6904_v54 = vld [vmem:[#allocation2 + $0x420] ss:$20 sps:$4 sm:$0xff]   ;;  %v6910_v23 = vld [vmem:[#allocation2 + $0x284] ss:$20 sps:$4 sm:$0xff]   ;;  %v6917_v51 = vld [vmem:[#allocation2 + $0x508] ss:$20 sps:$4 sm:$0xff]  }
 0x369   :  { %3093 = vmatpush1.bf16.msra.mxu0 %v6853_v8  ;;  %v6908_v26 = vld [vmem:[#allocation2 + $0x280] ss:$20 sps:$4 sm:$0xff]   ;;  %v6913_v58 = vld [vmem:[#allocation2 + $0x4e4] ss:$20 sps:$4 sm:$0xff]   ;;  %v6914_v8 = vld [vmem:[#allocation2 + $0x2a8] ss:$20 sps:$4 sm:$0xff]  }
 0x36a   :  { %3134 = vmatpush1.bf16.msra.mxu1 %v6856_v21  ;;  %3094 = vmatprep.subr.bf16.mxu0 %v6861_v45  ;;  %v6916_v38 = vld [vmem:[#allocation2 + $0x2ac] ss:$20 sps:$4 sm:$0xff]   ;;  %v6920_v45 = vld [vmem:[#allocation2 + $0x2d4] ss:$20 sps:$4 sm:$0x3f]  }
 0x36b   :  { %6281 = vmatprep.subr.msk.bf16.mxu1 %vm2992_vm9, %v6862_v5  ;;  %v6911_v35 = vld [vmem:[#allocation2 + $0x4e0] ss:$20 sps:$4 sm:$0xff]   ;;  %v6922_v5 = vld [vmem:[#allocation2 + $0x2d0] ss:$20 sps:$4 sm:$0x3f]  }
 0x36c   :  { %v6919_v21 = vld [vmem:[#allocation2 + $0x50c] ss:$20 sps:$4 sm:$0xff]  }
 0x36d   :  { %3095 = vmatpush1.bf16.msra.mxu0 %v6859_v40  ;;  %v6925_v40 = vld [vmem:[#allocation2 + $0x534] ss:$20 sps:$4 sm:$0xff]  }
 0x36e   :  { %3136 = vmatpush1.bf16.msra.mxu1 %v3000_v57  ;;  %3096 = vmatprep.subr.bf16.mxu0 %v6867_v27  ;;  %v3792_v27 = vsel %vm2992_vm9, %v6922_v5, 0  ;;  %v6928_v57 = vld [vmem:[#allocation2 + $0xc] ss:$20 sps:$4 sm:$0xff]  }
 0x36f   :  { %6551 = vmatprep.subr.bf16.mxu1 %v6868_v32  ;;  %v6923_v32 = vld [vmem:[#allocation2 + $0x530] ss:$20 sps:$4 sm:$0xff]   ;;  %v6986_v5 = vld [vmem:[#allocation2 + $0x1c0] ss:$20 sps:$4 sm:$0xff]  }
 0x371   :  { %3097 = vmatpush1.bf16.msra.mxu0 %v6865_v19  ;;  %6282 = vmatmul.mubr.msk.bf16.vlgmr.msra.gmra.mrb[20].mxu1 %vm882_vm10, %v8196_v7  ;;  %v6926_v19 = vld [vmem:[#allocation2 + $0x8] ss:$20 sps:$4 sm:$0xff]  }
 0x372   :  { %6552 = vmatpush3.bf16.msra.mxu1 %v6869_v39  ;;  %3204 = vmatprep.mubr.bf16.mxu1 %v2496_v33  ;;  %v6905_v33 = vld [vmem:[#allocation2 + $0x4b8] ss:$20 sps:$4 sm:$0xff]   ;;  %v8215_v39 = vpack.c.b16 %v8189_v43, %v8189_v43  ;;  %v6938_v43 = vld [vmem:[#allocation2 + $0x5c] ss:$20 sps:$4 sm:$0xff]  }
 0x373   :  { %3098 = vmatprep.subr.bf16.mxu0 %v6872_v14  ;;  %6553 = vmatprep.subr.bf16.mxu1 %v6873_v3  ;;  %v6931_v14 = vld [vmem:[#allocation2 + $0x55c] ss:$20 sps:$4 sm:$0xff]   ;;  %v6934_v3 = vld [vmem:[#allocation2 + $0x34] ss:$20 sps:$4 sm:$0xff]  }
 0x375   :  { %3099 = vmatpush1.bf16.msra.mxu0 %v6870_v44  ;;  %v8219_v44 = vpack.c.b16 %v8039_v11, %v8039_v11  ;;  %v6942_v11 = vld [vmem:[#allocation2 + $0x84] ss:$20 sps:$4 sm:$0xff]  }
 0x376   :  { %6554 = vmatpush3.bf16.msra.mxu1 %v6874_v41  ;;  %3100 = vmatprep.subr.bf16.mxu0 %v6877_v30  ;;  %v6929_v41 = vld [vmem:[#allocation2 + $0x558] ss:$20 sps:$4 sm:$0xff]   ;;  %v6932_v30 = vld [vmem:[#allocation2 + $0x30] ss:$20 sps:$4 sm:$0xff]  }
 0x377   :  { %6555 = vmatprep.subr.bf16.mxu1 %v6878_v4  ;;  %v6935_v4 = vld [vmem:[#allocation2 + $0x588] ss:$20 sps:$4 sm:$0xff]  }
 0x379   :  { %3101 = vmatpush1.bf16.msra.mxu0 %v6875_v48  ;;  %v6936_v48 = vld [vmem:[#allocation2 + $0x58] ss:$20 sps:$4 sm:$0xff]  }
 0x37a   :  { %6556 = vmatpush3.bf16.msra.mxu1 %v6879_v15  ;;  %3102 = vmatprep.subr.bf16.mxu0 %v6882_v37  ;;  %v6939_v15 = vld [vmem:[#allocation2 + $0x5b0] ss:$20 sps:$4 sm:$0xff]   ;;  %v6940_v37 = vld [vmem:[#allocation2 + $0x80] ss:$20 sps:$4 sm:$0xff]  }
 0x37b   :  { %6557 = vmatprep.subr.bf16.mxu1 %v6883_v16  ;;  %v6943_v16 = vld [vmem:[#allocation2 + $0x5d8] ss:$20 sps:$4 sm:$0x3f]  }
 0x37d   :  { %3103 = vmatpush1.bf16.msra.mxu0 %v6880_v31  ;;  %v6946_v31 = vld [vmem:[#allocation2 + $0xac] ss:$20 sps:$4 sm:$0xff]  }
 0x37e   :  { %6558 = vmatpush3.bf16.msra.mxu1 %v6884_v20  ;;  %3104 = vmatprep.subr.bf16.mxu0 %v6887_v47  ;;  %v3006_v20 = vsel %vm2992_vm9, %v6943_v16, 0  ;;  %v6944_v47 = vld [vmem:[#allocation2 + $0xa8] ss:$20 sps:$4 sm:$0xff]  }
 0x37f   :  { %6559 = vmatprep.subr.bf16.mxu1 %v6888_v59  ;;  %v6952_v59 = vld [vmem:[#allocation2 + $0xd4] ss:$20 sps:$4 sm:$0xff]   ;;  %v7015_v16 = vld [vmem:[#allocation2 + $0x1bc] ss:$20 sps:$4 sm:$0xff]  }
 0x381   :  { %3105 = vmatpush1.bf16.msra.mxu0 %v6885_v49  ;;  %v6947_v49 = vld [vmem:[#allocation2] ss:$20 sps:$4 sm:$0xff]  }
 0x382   :  { %6560 = vmatpush3.bf16.msra.mxu1 %v6889_v46  ;;  %3106 = vmatprep.subr.bf16.mxu0 %v6892_v17  ;;  %v6950_v46 = vld [vmem:[#allocation2 + $0xd0] ss:$20 sps:$4 sm:$0xff]   ;;  %v6955_v17 = vld [vmem:[#allocation2 + $0x2c] ss:$20 sps:$4 sm:$0xff]  }
 0x383   :  { %6561 = vmatprep.subr.bf16.mxu1 %v6893_v22  ;;  %v6958_v22 = vld [vmem:[#allocation2 + $0xfc] ss:$20 sps:$4 sm:$0xff]  }
 0x385   :  { %3107 = vmatpush1.bf16.msra.mxu0 %v6890_v12  ;;  %v6953_v12 = vld [vmem:[#allocation2 + $0x28] ss:$20 sps:$4 sm:$0xff]  }
 0x386   :  { %6562 = vmatpush3.bf16.msra.mxu1 %v6894_v62  ;;  %3108 = vmatprep.subr.bf16.mxu0 %v6897_v13  ;;  %v6956_v62 = vld [vmem:[#allocation2 + $0xf8] ss:$20 sps:$4 sm:$0xff]   ;;  %v6961_v13 = vld [vmem:[#allocation2 + $0x54] ss:$20 sps:$4 sm:$0xff]  }
 0x387   :  { %6563 = vmatprep.subr.bf16.mxu1 %v6898_v42  ;;  %v6964_v42 = vld [vmem:[#allocation2 + $0x124] ss:$20 sps:$4 sm:$0xff]  }
 0x389   :  { %3109 = vmatpush1.bf16.msra.mxu0 %v6895_v61  ;;  %v6959_v61 = vld [vmem:[#allocation2 + $0x50] ss:$20 sps:$4 sm:$0xff]  }
 0x38a   :  { %6564 = vmatpush3.bf16.msra.mxu1 %v6899_v10  ;;  %3110 = vmatprep.subr.bf16.mxu0 %v6902_v2  ;;  %v6962_v10 = vld [vmem:[#allocation2 + $0x120] ss:$20 sps:$4 sm:$0xff]   ;;  %v6967_v2 = vld [vmem:[#allocation2 + $0x7c] ss:$20 sps:$4 sm:$0xff]  }
 0x38b   :  { %6565 = vmatprep.subr.bf16.mxu1 %v6903_v52  ;;  %v6970_v52 = vld [vmem:[#allocation2 + $0x14c] ss:$20 sps:$4 sm:$0xff]  }
 0x38d   :  { %3111 = vmatpush1.bf16.msra.mxu0 %v6900_v55  ;;  %v6968_v55 = vld [vmem:[#allocation2 + $0x148] ss:$20 sps:$4 sm:$0xff]  }
 0x38e   :  { %6566 = vmatpush3.bf16.msra.mxu1 %v6904_v54  ;;  %3112 = vmatprep.subr.bf16.mxu0 %v6907_v18  ;;  %v6973_v54 = vld [vmem:[#allocation2 + $0xa4] ss:$20 sps:$4 sm:$0xff]   ;;  %v6976_v18 = vld [vmem:[#allocation2 + $0x174] ss:$20 sps:$4 sm:$0xff]  }
 0x38f   :  { %3847 = vmatprep.subr.bf16.mxu1 %v6910_v23  ;;  %v6971_v23 = vld [vmem:[#allocation2 + $0xa0] ss:$20 sps:$4 sm:$0xff]  }
 0x391   :  { %3113 = vmatpush1.bf16.msra.mxu0 %v6905_v33  ;;  %3205 = vmatmul.mubr.bf16.vlgmr.msra.gmra.mrb[24].mxu1 %v8199_v24  ;;  %v6974_v33 = vld [vmem:[#allocation2 + $0x170] ss:$20 sps:$4 sm:$0xff]  }
 0x392   :  { %3848 = vmatpush1.bf16.msra.mxu1 %v6908_v26  ;;  %3114 = vmatprep.subr.bf16.mxu0 %v6913_v58  ;;  %v6979_v26 = vld [vmem:[#allocation2 + $0xcc] ss:$20 sps:$4 sm:$0xff]   ;;  %v6982_v58 = vld [vmem:[#allocation2 + $0x19c] ss:$20 sps:$4 sm:$0xff]  }
 0x393   :  { %3849 = vmatprep.subr.bf16.mxu1 %v6916_v38  ;;  %3879 = vmatprep.mubr.bf16.mxu1 %v7315_v0  ;;  %v6977_v38 = vld [vmem:[#allocation2 + $0xc8] ss:$20 sps:$4 sm:$0xff]  }
 0x395   :  { %3115 = vmatpush1.bf16.msra.mxu0 %v6911_v35  ;;  %v6980_v35 = vld [vmem:[#allocation2 + $0x198] ss:$20 sps:$4 sm:$0xff]  }
 0x396   :  { %3850 = vmatpush1.bf16.msra.mxu1 %v6914_v8  ;;  %3116 = vmatprep.subr.bf16.mxu0 %v6919_v21  ;;  %v6985_v8 = vld [vmem:[#allocation2 + $0xf4] ss:$20 sps:$4 sm:$0xff]   ;;  %v6988_v21 = vld [vmem:[#allocation2 + $0x1c4] ss:$20 sps:$4 sm:$0xff]  }
 0x397   :  { %6379 = vmatprep.subr.msk.bf16.mxu1 %vm2992_vm9, %v6920_v45  ;;  %v6983_v45 = vld [vmem:[#allocation2 + $0xf0] ss:$20 sps:$4 sm:$0xff]  }
 0x399   :  { %3117 = vmatpush1.bf16.msra.mxu0 %v6917_v51  ;;  %v6991_v51 = vld [vmem:[#allocation2 + $0x11c] ss:$20 sps:$4 sm:$0xff]  }
 0x39a   :  { %3852 = vmatpush1.bf16.msra.mxu1 %v3792_v27  ;;  %3118 = vmatprep.subr.bf16.mxu0 %v6925_v40  ;;  %v6994_v40 = vld [vmem:[#allocation2 + $0x1ec] ss:$20 sps:$4 sm:$0xff]  }
 0x39b   :  { %3888 = vmatprep.subr.bf16.mxu1 %v6928_v57  ;;  %v6989_v27 = vld [vmem:[#allocation2 + $0x118] ss:$20 sps:$4 sm:$0xff]   ;;  %v6992_v57 = vld [vmem:[#allocation2 + $0x1e8] ss:$20 sps:$4 sm:$0xff]  }
 0x39d   :  { %3119 = vmatpush1.bf16.msra.mxu0 %v6923_v32  ;;  %6380 = vmatmul.mubr.msk.bf16.vlgmr.msra.gmra.mrb[28].mxu1 %vm882_vm10, %v8215_v39  ;;  %v6997_v32 = vld [vmem:[#allocation2 + $0x144] ss:$20 sps:$4 sm:$0xff]  }
 0x39e   :  { %3889 = vmatpush1.bf16.msra.mxu1 %v6926_v19  ;;  %3920 = vmatprep.mubr.bf16.mxu1 %v8219_v44  ;;  %v7000_v19 = vld [vmem:[#allocation2 + $0x214] ss:$20 sps:$4 sm:$0xff]  }
 0x39f   :  { %3120 = vmatprep.subr.bf16.mxu0 %v6931_v14  ;;  %3890 = vmatprep.subr.bf16.mxu1 %v6934_v3  ;;  %v6995_v14 = vld [vmem:[#allocation2 + $0x140] ss:$20 sps:$4 sm:$0xff]   ;;  %v6998_v3 = vld [vmem:[#allocation2 + $0x210] ss:$20 sps:$4 sm:$0xff]  }
 0x3a1   :  { %3121 = vmatpush1.bf16.msra.mxu0 %v6929_v41  ;;  %v7003_v41 = vld [vmem:[#allocation2 + $0x16c] ss:$20 sps:$4 sm:$0xff]  }
 0x3a2   :  { %3891 = vmatpush1.bf16.msra.mxu1 %v6932_v30  ;;  %6685 = vmatprep.subr.bf16.mxu0 %v7316_v1  ;;  %v7006_v30 = vld [vmem:[#allocation2 + $0x23c] ss:$20 sps:$4 sm:$0xff]  }
 0x3a3   :  { %3892 = vmatprep.subr.bf16.mxu1 %v6938_v43  ;;  %v7001_v43 = vld [vmem:[#allocation2 + $0x168] ss:$20 sps:$4 sm:$0xff]  }
 0x3a4   :  { %3123 = vmatmul.mubr.bf16.vlgmr.msra.gmra.mrb[24].mxu0 %v8199_v24  ;;  %v6949_v24 = vld [vmem:[#allocation2 + $0x4] ss:$20 sps:$4 sm:$0xff]  }
 0x3a5   :  { %6686 = vmatpush3.bf16.msra.mxu0 %v6935_v4  ;;  %6691 = vmatprep.mubr.msk.bf16.mxu0 %vm7317_vm0, %v7316_v1  ;;  %v7004_v4 = vld [vmem:[#allocation2 + $0x238] ss:$20 sps:$4 sm:$0xff]  }
 0x3a6   :  { %3893 = vmatpush1.bf16.msra.mxu1 %v6936_v48  ;;  %6687 = vmatprep.subr.bf16.mxu0 %v7316_v1  ;;  %v7009_v48 = vld [vmem:[#allocation2 + $0x194] ss:$20 sps:$4 sm:$0xff]  }
 0x3a7   :  { %3894 = vmatprep.subr.bf16.mxu1 %v6942_v11  ;;  %v7012_v11 = vld [vmem:[#allocation2 + $0x264] ss:$20 sps:$4 sm:$0xff]  }
 0x3a9   :  { %6688 = vmatpush3.bf16.msra.mxu0 %v6939_v15  ;;  %v7007_v15 = vld [vmem:[#allocation2 + $0x190] ss:$20 sps:$4 sm:$0xff]  }
 0x3aa   :  { %3895 = vmatpush1.bf16.msra.mxu1 %v6940_v37  ;;  %6689 = vmatprep.subr.bf16.mxu0 %v7316_v1  ;;  %v7010_v37 = vld [vmem:[#allocation2 + $0x260] ss:$20 sps:$4 sm:$0xff]  }
 0x3ab   :  { %3896 = vmatprep.subr.bf16.mxu1 %v6946_v31  ;;  %v7013_v31 = vld [vmem:[#allocation2 + $0x1b8] ss:$20 sps:$4 sm:$0xff]  }
 0x3ad   :  { %6690 = vmatpush3.bf16.msra.mxu0 %v3006_v20  ;;  %v7016_v20 = vld [vmem:[#allocation2 + $0x290] ss:$20 sps:$4 sm:$0xff]  }
 0x3ae   :  { %3897 = vmatpush1.bf16.msra.mxu1 %v6944_v47  ;;  %3806 = vmatprep.subr.bf16.mxu0 %v6949_v24  ;;  %v7019_v47 = vld [vmem:[#allocation2 + $0x1e4] ss:$20 sps:$4 sm:$0xff]   ;;  %v8236_v24 = vpack.c.b16 %v8020_v6, %v8020_v6  ;;  %v7027_v6 = vld [vmem:[#allocation2 + $0x234] ss:$20 sps:$4 sm:$0xff]  }
 0x3af   :  { %3898 = vmatprep.subr.bf16.mxu1 %v6952_v59  ;;  %v7017_v59 = vld [vmem:[#allocation2 + $0x1e0] ss:$20 sps:$4 sm:$0xff]  }
 0x3b0   :  { %6692 = vmatmul.mubr.msk.bf16.vlgmr.msra.gmra.mrb[28].mxu0 %vm882_vm10, %v8196_v7  ;;  %v6965_v7 = vld [vmem:[#allocation2 + $0x78] ss:$20 sps:$4 sm:$0xff]  }
 0x3b1   :  { %3807 = vmatpush1.bf16.msra.mxu0 %v6947_v49  ;;  %3838 = vmatprep.mubr.bf16.mxu0 %v8219_v44  ;;  %v7020_v49 = vld [vmem:[#allocation2 + $0x2b8] ss:$20 sps:$4 sm:$0xff]  }
 0x3b2   :  { %3899 = vmatpush1.bf16.msra.mxu1 %v6950_v46  ;;  %3808 = vmatprep.subr.bf16.mxu0 %v6955_v17  ;;  %v7023_v46 = vld [vmem:[#allocation2 + $0x20c] ss:$20 sps:$4 sm:$0xff]  }
 0x3b3   :  { %3900 = vmatprep.subr.bf16.mxu1 %v6958_v22  ;;  %v7024_v17 = vld [vmem:[#allocation2 + $0x2e0] ss:$20 sps:$4 sm:$0x3f]   ;;  %v7021_v22 = vld [vmem:[#allocation2 + $0x208] ss:$20 sps:$4 sm:$0xff]  }
 0x3b5   :  { %3809 = vmatpush1.bf16.msra.mxu0 %v6953_v12  ;;  %v3804_v12 = vsel %vm2992_vm9, %v7024_v17, 0  ;;  %v7085_v17 = vld [vmem:[#allocation2 + $0x128] ss:$20 sps:$4 sm:$0xff]  }
 0x3b6   :  { %3901 = vmatpush1.bf16.msra.mxu1 %v6956_v62  ;;  %3810 = vmatprep.subr.bf16.mxu0 %v6961_v13  ;;  %v7030_v62 = vld [vmem:[%s8552_s2 + $0x154] ss:$12 sps:$4 sm:$0xff]   ;;  %v7025_v13 = vld [vmem:[#allocation2 + $0x230] ss:$20 sps:$4 sm:$0xff]  }
 0x3b7   :  { %3902 = vmatprep.subr.bf16.mxu1 %v6964_v42  ;;  %v7028_v42 = vld [vmem:[%s8552_s2 + $0x150] ss:$12 sps:$4 sm:$0xff]  }
 0x3b9   :  { %3811 = vmatpush1.bf16.msra.mxu0 %v6959_v61  ;;  %v7033_v61 = vld [vmem:[#allocation2 + $0x25c] ss:$20 sps:$4 sm:$0xff]  }
 0x3ba   :  { %3903 = vmatpush1.bf16.msra.mxu1 %v6962_v10  ;;  %3812 = vmatprep.subr.bf16.mxu0 %v6967_v2  ;;  %v7036_v10 = vld [vmem:[%s8552_s2 + $0x16c] ss:$12 sps:$4 sm:$0xff]  }
 0x3bb   :  { %3904 = vmatprep.subr.bf16.mxu1 %v6970_v52  ;;  %v7031_v2 = vld [vmem:[#allocation2 + $0x258] ss:$20 sps:$4 sm:$0xff]   ;;  %v7034_v52 = vld [vmem:[%s8552_s2 + $0x168] ss:$12 sps:$4 sm:$0xff]  }
 0x3bd   :  { %3813 = vmatpush1.bf16.msra.mxu0 %v6965_v7  ;;  %v7039_v7 = vld [vmem:[#allocation2 + $0x28c] ss:$20 sps:$4 sm:$0xff]  }
 0x3be   :  { %3905 = vmatpush1.bf16.msra.mxu1 %v6968_v55  ;;  %3814 = vmatprep.subr.bf16.mxu0 %v6973_v54  ;;  %v7042_v55 = vld [vmem:[%s8552_s2 + $0x184] ss:$12 sps:$4 sm:$0xff]   ;;  %v7037_v54 = vld [vmem:[#allocation2 + $0x288] ss:$20 sps:$4 sm:$0xff]  }
 0x3bf   :  { %3906 = vmatprep.subr.bf16.mxu1 %v6976_v18  ;;  %v7040_v18 = vld [vmem:[%s8552_s2 + $0x180] ss:$12 sps:$4 sm:$0xff]  }
 0x3c1   :  { %3815 = vmatpush1.bf16.msra.mxu0 %v6971_v23  ;;  %v7045_v23 = vld [vmem:[#allocation2 + $0x2b4] ss:$20 sps:$4 sm:$0xff]  }
 0x3c2   :  { %3907 = vmatpush1.bf16.msra.mxu1 %v6974_v33  ;;  %3816 = vmatprep.subr.bf16.mxu0 %v6979_v26  ;;  %v7048_v33 = vld [vmem:[%s8552_s2 + $0x19c] ss:$12 sps:$4 sm:$0xff]   ;;  %v7043_v26 = vld [vmem:[#allocation2 + $0x2b0] ss:$20 sps:$4 sm:$0xff]  }
 0x3c3   :  { %3908 = vmatprep.subr.bf16.mxu1 %v6982_v58  ;;  %v7046_v58 = vld [vmem:[%s8552_s2 + $0x198] ss:$12 sps:$4 sm:$0xff]  }
 0x3c5   :  { %3817 = vmatpush1.bf16.msra.mxu0 %v6977_v38  ;;  %v7049_v38 = vld [vmem:[#allocation2 + $0x2dc] ss:$20 sps:$4 sm:$0x3f]  }
 0x3c6   :  { %3909 = vmatpush1.bf16.msra.mxu1 %v6980_v35  ;;  %3818 = vmatprep.subr.bf16.mxu0 %v6985_v8  ;;  %v7051_v35 = vld [vmem:[#allocation2 + $0x2d8] ss:$20 sps:$4 sm:$0x3f]   ;;  %v7054_v8 = vld [vmem:[%s8552_s2 + $0x1b4] ss:$12 sps:$4 sm:$0xff]  }
 0x3c7   :  { %3910 = vmatprep.subr.bf16.mxu1 %v6988_v21  ;;  %v3798_v21 = vsel %vm2992_vm9, %v7051_v35, 0 }
 0x3c9   :  { %3819 = vmatpush1.bf16.msra.mxu0 %v6983_v45  ;;  %v7052_v45 = vld [vmem:[%s8552_s2 + $0x1b0] ss:$12 sps:$4 sm:$0xff]  }
 0x3ca   :  { %3911 = vmatpush1.bf16.msra.mxu1 %v6986_v5  ;;  %3820 = vmatprep.subr.bf16.mxu0 %v6991_v51  ;;  %v7055_v5 = vld [vmem:[#allocation2 + $0x150] ss:$20 sps:$4 sm:$0xff]   ;;  %v7059_v51 = vld [vmem:[%s8552_s2 + $0x1cc] ss:$12 sps:$4 sm:$0xff]  }
 0x3cb   :  { %3912 = vmatprep.subr.bf16.mxu1 %v6994_v40  ;;  %v7056_v40 = vld [vmem:[#allocation2 + $0x10] ss:$20 sps:$4 sm:$0xff]  }
 0x3cd   :  { %3821 = vmatpush1.bf16.msra.mxu0 %v6989_v27  ;;  %v7057_v27 = vld [vmem:[%s8552_s2 + $0x1c8] ss:$12 sps:$4 sm:$0xff]  }
 0x3ce   :  { %3913 = vmatpush1.bf16.msra.mxu1 %v6992_v57  ;;  %3822 = vmatprep.subr.bf16.mxu0 %v6997_v32  ;;  %v7060_v57 = vld [vmem:[#allocation2 + $0x178] ss:$20 sps:$4 sm:$0xff]   ;;  %v7064_v32 = vld [vmem:[%s8552_s2 + $0x1e4] ss:$12 sps:$4 sm:$0xff]  }
 0x3cf   :  { %3914 = vmatprep.subr.bf16.mxu1 %v7000_v19  ;;  %v7061_v19 = vld [vmem:[#allocation2 + $0x38] ss:$20 sps:$4 sm:$0xff]  }
 0x3d1   :  { %3823 = vmatpush1.bf16.msra.mxu0 %v6995_v14  ;;  %v7062_v14 = vld [vmem:[%s8552_s2 + $0x1e0] ss:$12 sps:$4 sm:$0xff]  }
 0x3d2   :  { %3915 = vmatpush1.bf16.msra.mxu1 %v6998_v3  ;;  %3824 = vmatprep.subr.bf16.mxu0 %v7003_v41  ;;  %v7065_v3 = vld [vmem:[#allocation2 + $0x1a0] ss:$20 sps:$4 sm:$0xff]   ;;  %v7069_v41 = vld [vmem:[%s8552_s2 + $0x1fc] ss:$12 sps:$4 sm:$0xff]  }
 0x3d3   :  { %3916 = vmatprep.subr.bf16.mxu1 %v7006_v30  ;;  %v7066_v30 = vld [vmem:[#allocation2 + $0x60] ss:$20 sps:$4 sm:$0xff]  }
 0x3d5   :  { %3825 = vmatpush1.bf16.msra.mxu0 %v7001_v43  ;;  %v7074_v43 = vld [vmem:[%s8552_s2 + $0x214] ss:$12 sps:$4 sm:$0xff]  }
 0x3d6   :  { %3917 = vmatpush1.bf16.msra.mxu1 %v7004_v4  ;;  %3826 = vmatprep.subr.bf16.mxu0 %v7009_v48  ;;  %v7071_v4 = vld [vmem:[#allocation2 + $0x88] ss:$20 sps:$4 sm:$0xff]  }
 0x3d7   :  { %3918 = vmatprep.subr.bf16.mxu1 %v7012_v11  ;;  %v7072_v48 = vld [vmem:[%s8552_s2 + $0x210] ss:$12 sps:$4 sm:$0xff]  }
 0x3d8   :  { %v7075_v11 = vld [vmem:[#allocation2 + $0x1f0] ss:$20 sps:$4 sm:$0xff]  }
 0x3d9   :  { %3827 = vmatpush1.bf16.msra.mxu0 %v7007_v15  ;;  %v7079_v15 = vld [vmem:[%s8552_s2 + $0x22c] ss:$12 sps:$4 sm:$0xff]  }
 0x3da   :  { %3919 = vmatpush1.bf16.msra.mxu1 %v7010_v37  ;;  %3828 = vmatprep.subr.bf16.mxu0 %v7015_v16  ;;  %v7076_v37 = vld [vmem:[#allocation2 + $0xb0] ss:$20 sps:$4 sm:$0xff]   ;;  %v7077_v16 = vld [vmem:[%s8552_s2 + $0x228] ss:$12 sps:$4 sm:$0xff]  }
 0x3db   :  { %6695 = vmatprep.subr.bf16.mxu1 %v7316_v1 }
 0x3dd   :  { %3829 = vmatpush1.bf16.msra.mxu0 %v7013_v31  ;;  %3921 = vmatmul.mubr.bf16.vlgmr.msra.gmra.mrb[32].mxu1 %v8236_v24  ;;  %v7080_v31 = vld [vmem:[#allocation2 + $0x218] ss:$20 sps:$4 sm:$0xff]  }
 0x3de   :  { %6696 = vmatpush3.bf16.msra.mxu1 %v7016_v20  ;;  %3830 = vmatprep.subr.bf16.mxu0 %v7019_v47  ;;  %v7081_v20 = vld [vmem:[#allocation2 + $0xd8] ss:$20 sps:$4 sm:$0xff]   ;;  %v7082_v47 = vld [vmem:[#allocation2 + $0x240] ss:$20 sps:$4 sm:$0xff]  }
 0x3df   :  { %6697 = vmatprep.subr.bf16.mxu1 %v7316_v1  ;;  %6701 = vmatprep.mubr.msk.bf16.mxu1 %vm7317_vm0, %v7316_v1 }
 0x3e1   :  { %3831 = vmatpush1.bf16.msra.mxu0 %v7017_v59  ;;  %v4467_v59 = vrot.slane %v4453_v29, %v7444_v36  ;;  %v7086_v29 = vld [vmem:[%s8552_s2 + $0x158] ss:$12 sps:$4 sm:$0xff]  }
 0x3e2   :  { %6698 = vmatpush3.bf16.msra.mxu1 %v7020_v49  ;;  %3832 = vmatprep.subr.bf16.mxu0 %v7023_v46  ;;  %v7083_v49 = vld [vmem:[#allocation2 + $0x100] ss:$20 sps:$4 sm:$0xff]   ;;  %v7084_v46 = vld [vmem:[#allocation2 + $0x268] ss:$20 sps:$4 sm:$0xff]  }
 0x3e3   :  { %6699 = vmatprep.subr.bf16.mxu1 %v7316_v1 }
 0x3e5   :  { %3833 = vmatpush1.bf16.msra.mxu0 %v7021_v22  ;;  %v4460_v22 = vrot.slane %v4452_v50, %v7444_v36  ;;  %v7088_v36 = vld [vmem:[%s8552_s2 + $0x188] ss:$12 sps:$4 sm:$0xff]   ;;  %v7091_v50 = vld [vmem:[%s8552_s2 + $0x1d0] ss:$12 sps:$4 sm:$0xff]  }
 0x3e6   :  { %6700 = vmatpush3.bf16.msra.mxu1 %v3804_v12  ;;  %3834 = vmatprep.subr.bf16.mxu0 %v7027_v6  ;;  %v7087_v6 = vld [vmem:[%s8552_s2 + $0x170] ss:$12 sps:$4 sm:$0xff]  }
 0x3e7   :  { %4636 = vmatprep.subr.bf16.mxu1 %v7030_v62 }
 0x3e9   :  { %3835 = vmatpush1.bf16.msra.mxu0 %v7025_v13  ;;  %6702 = vmatmul.mubr.msk.bf16.vlgmr.msra.gmra.mrb[36].mxu1 %vm882_vm10, %v8215_v39 }
 0x3ea   :  { %4637 = vmatpush1.bf16.msra.mxu1 %v7028_v42  ;;  %6414 = vmatprep.mubr.msk.bf16.mxu1 %vm610_vm7, %v7962_v56 }
 0x3eb   :  { %3836 = vmatprep.subr.bf16.mxu0 %v7033_v61  ;;  %4638 = vmatprep.subr.bf16.mxu1 %v7036_v10 }
 0x3ed   :  { %3837 = vmatpush1.bf16.msra.mxu0 %v7031_v2  ;;  %v7094_v2 = vld [vmem:[%s8552_s2 + $0x218] ss:$12 sps:$4 sm:$0xff]  }
 0x3ee   :  { %4639 = vmatpush1.bf16.msra.mxu1 %v7034_v52  ;;  %3929 = vmatprep.subr.bf16.mxu0 %v7039_v7 }
 0x3ef   :  { %4640 = vmatprep.subr.bf16.mxu1 %v7042_v55 }
 0x3f0   :  { %3839 = vmatmul.mubr.bf16.vlgmr.msra.gmra.mrb[32].mxu0 %v8236_v24 }
 0x3f1   :  { %3930 = vmatpush1.bf16.msra.mxu0 %v7037_v54  ;;  %3961 = vmatprep.mubr.bf16.mxu0 %v7315_v0 }
 0x3f2   :  { %4641 = vmatpush1.bf16.msra.mxu1 %v7040_v18  ;;  %3931 = vmatprep.subr.bf16.mxu0 %v7045_v23  ;;  %v7095_v18 = vld [vmem:[%s8552_s2 + $0x230] ss:$12 sps:$4 sm:$0xff]  }
 0x3f3   :  { %4642 = vmatprep.subr.bf16.mxu1 %v7048_v33 }
 0x3f5   :  { %3932 = vmatpush1.bf16.msra.mxu0 %v7043_v26 }
 0x3f6   :  { %4643 = vmatpush1.bf16.msra.mxu1 %v7046_v58  ;;  %6381 = vmatprep.subr.msk.bf16.mxu0 %vm2992_vm9, %v7049_v38 }
 0x3f7   :  { %4644 = vmatprep.subr.bf16.mxu1 %v7054_v8 }
 0x3f9   :  { %3934 = vmatpush1.bf16.msra.mxu0 %v3798_v21 }
 0x3fa   :  { %4645 = vmatpush1.bf16.msra.mxu1 %v7052_v45  ;;  %6577 = vmatprep.subr.bf16.mxu0 %v7055_v5 }
 0x3fb   :  { %4646 = vmatprep.subr.bf16.mxu1 %v7059_v51 }
 0x3fc   :  { %6382 = vmatmul.mubr.msk.bf16.vlgmr.msra.gmra.mrb[36].mxu0 %vm882_vm10, %v8215_v39  ;;  %v7067_v39 = vld [vmem:[%s8552_s2 + $0x1f8] ss:$12 sps:$4 sm:$0xff]  }
 0x3fd   :  { %6578 = vmatpush3.bf16.msra.mxu0 %v7056_v40  ;;  %4002 = vmatprep.mubr.bf16.mxu0 %v8219_v44  ;;  %v7070_v44 = vld [vmem:[#allocation2 + $0x1c8] ss:$20 sps:$4 sm:$0xff]  }
 0x3fe   :  { %4647 = vmatpush1.bf16.msra.mxu1 %v7057_v27  ;;  %6579 = vmatprep.subr.bf16.mxu0 %v7060_v57  ;;  %v7096_v57 = vld [vmem:[#allocation2 + $0x5f0] ss:$20 sps:$4 sm:$0xff]  }
 0x3ff   :  { %4648 = vmatprep.subr.bf16.mxu1 %v7064_v32  ;;  %v7101_v32 = vld [vmem:[#allocation2 + $0x61c] ss:$20 sps:$4 sm:$0xff]  }
 0x401   :  { %6580 = vmatpush3.bf16.msra.mxu0 %v7061_v19  ;;  %v7099_v19 = vld [vmem:[#allocation2 + $0x618] ss:$20 sps:$4 sm:$0xff]  }
 0x402   :  { %4649 = vmatpush1.bf16.msra.mxu1 %v7062_v14  ;;  %6581 = vmatprep.subr.bf16.mxu0 %v7065_v3  ;;  %v7104_v3 = vld [vmem:[#allocation2 + $0x644] ss:$20 sps:$4 sm:$0xff]  }
 0x403   :  { %4650 = vmatprep.subr.bf16.mxu1 %v7069_v41 }
 0x405   :  { %6582 = vmatpush3.bf16.msra.mxu0 %v7066_v30 }
 0x406   :  { %4651 = vmatpush1.bf16.msra.mxu1 %v7067_v39  ;;  %6583 = vmatprep.subr.bf16.mxu0 %v7070_v44 }
 0x407   :  { %4652 = vmatprep.subr.bf16.mxu1 %v7074_v43 }
 0x409   :  { %6584 = vmatpush3.bf16.msra.mxu0 %v7071_v4  ;;  %v7102_v4 = vld [vmem:[#allocation2 + $0x640] ss:$20 sps:$4 sm:$0xff]  }
 0x40a   :  { %4653 = vmatpush1.bf16.msra.mxu1 %v7072_v48  ;;  %6585 = vmatprep.subr.bf16.mxu0 %v7075_v11  ;;  %v7107_v48 = vld [vmem:[#allocation2 + $0x66c] ss:$20 sps:$4 sm:$0xff]   ;;  %v7105_v11 = vld [vmem:[#allocation2 + $0x668] ss:$20 sps:$4 sm:$0xff]  }
 0x40b   :  { %4654 = vmatprep.subr.bf16.mxu1 %v7079_v15  ;;  %v7110_v15 = vld [vmem:[#allocation2 + $0x694] ss:$20 sps:$4 sm:$0xff]  }
 0x40d   :  { %6586 = vmatpush3.bf16.msra.mxu0 %v7076_v37  ;;  %v7108_v37 = vld [vmem:[#allocation2 + $0x690] ss:$20 sps:$4 sm:$0xff]  }
 0x40e   :  { %4655 = vmatpush1.bf16.msra.mxu1 %v7077_v16  ;;  %6587 = vmatprep.subr.bf16.mxu0 %v7080_v31  ;;  %v7113_v31 = vld [vmem:[#allocation2 + $0x6bc] ss:$20 sps:$4 sm:$0xff]  }
 0x411   :  { %6588 = vmatpush3.bf16.msra.mxu0 %v7081_v20  ;;  %4669 = vmatmul.mubr.bf16.vlgmr.msra.gmra.mrb[40].mxu1 %v7964_v9 }
 0x412   :  { %6415 = vmatprep.mubr.msk.bf16.mxu1 %vm610_vm7, %v4467_v59  ;;  %6589 = vmatprep.subr.bf16.mxu0 %v7082_v47 }
 0x415   :  { %6590 = vmatpush3.bf16.msra.mxu0 %v7083_v49 }
 0x416   :  { %6591 = vmatprep.subr.bf16.mxu0 %v7084_v46  ;;  %v7111_v46 = vld [vmem:[#allocation2 + $0x6b8] ss:$20 sps:$4 sm:$0xff]  }
 0x419   :  { %6592 = vmatpush3.bf16.msra.mxu0 %v7085_v17  ;;  %4679 = vmatmul.mubr.bf16.gmra.mrb[44].mxu1 %v4460_v22 }
 0x41a   :  { %4687 = vmatprep.subr.bf16.mxu0 %v7315_v0 }
 0x41c   :  { %4003 = vmatmul.mubr.bf16.vlgmr.msra.gmra.mrb[40].mxu0 %v8236_v24  ;;  %v7093_v24 = vld [vmem:[%s8552_s2 + $0x200] ss:$12 sps:$4 sm:$0xff]  }
 0x41d   :  { %4688 = vmatpush1.bf16.msra.mxu0 %v7086_v29  ;;  %6416 = vmatprep.mubr.msk.bf16.mxu0 %vm610_vm7, %v7962_v56  ;;  %v7092_v56 = vld [vmem:[%s8552_s2 + $0x1e8] ss:$12 sps:$4 sm:$0xff]   ;;  %s7323_s2 = smov [#allocation7]  }
 0x41e   :  { %4689 = vmatprep.subr.bf16.mxu0 %v7315_v0  ;;  %s6097_s10 = sshll.u32 %s7323_s2, 4  ;;  %s6098_s10 = int_to_ptr.vmem [resolvable:$true] %s6097_s10 }
 0x41f   :  { %s7283_s11 = scalar_lea.vmem %s6098_s10, 320  ;;  %p7288_p3 = scmp.lt.s32.totalorder %s6098_s10, %s6098_s10 }
 0x420   :  { %p7284_p2 = scmp.ne.s32.totalorder %s6098_s10, %s7283_s11  ;;  %p7289_p4 = scmp.lt.s32.totalorder %s7283_s11, %s7283_s11 }
 0x421   :  { %4690 = vmatpush1.bf16.msra.mxu0 %v7087_v6 }
 0x422   :  { %4691 = vmatprep.subr.bf16.mxu0 %v7315_v0  ;;  %p7290_p5 = por %p7289_p4, %p7288_p3 }
 0x424   :  { %p7291_p6 = pnand %p7290_p5, %p7284_p2 }
 0x425   :  { %4692 = vmatpush1.bf16.msra.mxu0 %v7088_v36 }
 0x426   :  { %4693 = vmatprep.subr.bf16.mxu0 %v7315_v0 }
 0x429   :  { %4694 = vmatpush1.bf16.msra.mxu0 %v7089_v53 }
 0x42a   :  { %4695 = vmatprep.subr.bf16.mxu0 %v7315_v0 }
 0x42d   :  { %4696 = vmatpush1.bf16.msra.mxu0 %v7090_v25  ;;  %v7114_v25 = vld [vmem:[#allocation2 + $0x6e0] ss:$20 sps:$4 sm:$0xff]  }
 0x42e   :  { %4697 = vmatprep.subr.bf16.mxu0 %v7315_v0 }
 0x431   :  { %4698 = vmatpush1.bf16.msra.mxu0 %v7091_v50  ;;  %v7116_v50 = vld [vmem:[#allocation2 + $0x6e4] ss:$20 sps:$4 sm:$0xff]  }
 0x432   :  { %4699 = vmatprep.subr.bf16.mxu0 %v7315_v0 }
 0x435   :  { %4700 = vmatpush1.bf16.msra.mxu0 %v7092_v56  ;;  %v7119_v56 = vld [vmem:[#allocation2 + $0x70c] ss:$20 sps:$4 sm:$0xff]  }
 0x436   :  { %4701 = vmatprep.subr.bf16.mxu0 %v7315_v0 }
 0x437   :  { %v3083_v12 = vpop.f32.mrb[20].mxu0 }
 0x438   :  { %v3042_v62 = vpop.f32.mrb[16].mxu1  ;;  %v3085_v13 = vpop.f32.mrb[21].mxu0 }
 0x439   :  { %v8361_v42 = vadd.f32 %v3083_v12, %v3042_v62  ;;  %4702 = vmatpush1.bf16.msra.mxu0 %v7093_v24  ;;  %v3044_v61 = vpop.f32.mrb[17].mxu1  ;;  %v3087_v10 = vpop.f32.mrb[22].mxu0  ;;  %v7117_v62 = vld [vmem:[#allocation2 + $0x708] ss:$20 sps:$4 sm:$0xff]  }
 0x43a   :  { %v8366_v52 = vadd.f32 %v3085_v13, %v3044_v61  ;;  %v3046_v7 = vpop.f32.mrb[18].mxu1  ;;  %v3088_v55 = vpop.f32.mrb[23].mxu0  ;;  %4703 = vmatprep.subr.bf16.mxu0 %v7315_v0 }
 0x43b   :  { %v3047_v54 = vpop.f32.mrb[19].mxu1 }
 0x43d   :  { %4704 = vmatpush1.bf16.msra.mxu0 %v7094_v2 }
 0x43e   :  { %4705 = vmatprep.subr.bf16.mxu0 %v7315_v0 }
 0x441   :  { %4706 = vmatpush1.bf16.msra.mxu0 %v7095_v18 }
 0x444   :  { %v3165_v23 = vpop.f32.mrb[20].mxu1  ;;  %4720 = vmatmul.mubr.bf16.vlgmr.msra.gmra.mrb[44].mxu0 %v7964_v9  ;;  %v7098_v9 = vld [vmem:[#allocation2 + $0x5f4] ss:$20 sps:$4 sm:$0xff]  }
 0x445   :  { %v3167_v33 = vpop.f32.mrb[21].mxu1  ;;  %6417 = vmatprep.mubr.msk.bf16.mxu0 %vm610_vm7, %v4467_v59  ;;  %5793 = vmatprep.subr.bf16.mxu1 %v7098_v9 }
 0x446   :  { %v3169_v26 = vpop.f32.mrb[22].mxu1  ;;  %5794 = vmatpush1.bf16.msra.mxu1 %v7096_v57  ;;  %v7131_v57 = vld [vmem:[#allocation2 + $0x7ac] ss:$20 sps:$4 sm:$0xff]  }
 0x447   :  { %v3170_v58 = vpop.f32.mrb[23].mxu1  ;;  %5795 = vmatprep.subr.bf16.mxu1 %v7101_v32  ;;  %v7120_v26 = vld [vmem:[#allocation2 + $0x730] ss:$20 sps:$4 sm:$0xff]  }
 0x448   :  { %v7122_v58 = vld [vmem:[#allocation2 + $0x734] ss:$20 sps:$4 sm:$0xff]  }
 0x44a   :  { %5796 = vmatpush1.bf16.msra.mxu1 %v7099_v19 }
 0x44b   :  { %5797 = vmatprep.subr.bf16.mxu1 %v7104_v3 }
 0x44c   :  { %4728 = vmatmul.mubr.bf16.gmra.mrb[48].mxu0 %v4460_v22 }
 0x44d   :  { %5866 = vmatprep.mubr.bf16.mxu0 %v7315_v0 }
 0x44e   :  { %5798 = vmatpush1.bf16.msra.mxu1 %v7102_v4  ;;  %v7140_v4 = vld [vmem:[#allocation2 + $0x7fc] ss:$20 sps:$4 sm:$0xff]  }
 0x44f   :  { %5799 = vmatprep.subr.bf16.mxu1 %v7107_v48  ;;  %v7138_v48 = vld [vmem:[#allocation2 + $0x7f8] ss:$20 sps:$4 sm:$0xff]  }
 0x452   :  { %5800 = vmatpush1.bf16.msra.mxu1 %v7105_v11  ;;  %v7146_v11 = vld [vmem:[#allocation2 + $0x824] ss:$20 sps:$4 sm:$0xff]  }
 0x453   :  { %5801 = vmatprep.subr.bf16.mxu1 %v7110_v15  ;;  %v7144_v15 = vld [vmem:[#allocation2 + $0x820] ss:$20 sps:$4 sm:$0xff]  }
 0x456   :  { %5802 = vmatpush1.bf16.msra.mxu1 %v7108_v37  ;;  %v7149_v37 = vld [vmem:[#allocation2 + $0x84c] ss:$20 sps:$4 sm:$0xff]  }
 0x457   :  { %5803 = vmatprep.subr.bf16.mxu1 %v7113_v31  ;;  %v7155_v31 = vld [vmem:[#allocation2 + $0x87c] ss:$20 sps:$4 sm:$0xff]  }
 0x45a   :  { %5804 = vmatpush1.bf16.msra.mxu1 %v7111_v46 }
 0x45b   :  { %5805 = vmatprep.subr.bf16.mxu1 %v7116_v50 }
 0x45e   :  { %5806 = vmatpush1.bf16.msra.mxu1 %v7114_v25 }
 0x45f   :  { %5807 = vmatprep.subr.bf16.mxu1 %v7119_v56 }
 0x462   :  { %5808 = vmatpush1.bf16.msra.mxu1 %v7117_v62 }
 0x463   :  { %5809 = vmatprep.subr.bf16.mxu1 %v7122_v58 }
 0x464   :  { %v6567_v38 = vpop.f32.mrb[24].mxu1 }
 0x465   :  { %v6568_v35 = vpop.f32.mrb[25].mxu1 }
 0x466   :  { %v6569_v8 = vadd.f32 %v6568_v35, %v6567_v38  ;;  %v6570_v21 = vpop.f32.mrb[26].mxu1  ;;  %v7125_v38 = vld [vmem:[#allocation2 + $0x75c] ss:$20 sps:$4 sm:$0xff]   ;;  %5810 = vmatpush1.bf16.msra.mxu1 %v7120_v26  ;;  %v7123_v35 = vld [vmem:[#allocation2 + $0x758] ss:$20 sps:$4 sm:$0xff]  }
 0x467   :  { %v6571_v45 = vpop.f32.mrb[27].mxu1  ;;  %v7137_v21 = vld [vmem:[#allocation2 + $0x874] ss:$20 sps:$4 sm:$0xff]   ;;  %5811 = vmatprep.subr.bf16.mxu1 %v7125_v38 }
 0x468   :  { %5834 = vmatprep.subr.bf16.mxu0 %v7137_v21  ;;  %v7143_v45 = vld [vmem:[#allocation2 + $0x89c] ss:$20 sps:$4 sm:$0xff]  }
 0x469   :  { %v5083_v38 = vld [vmem:[#allocation5 + $0x2] ss:$4 sm:$0x7] }
 0x46a   :  { %5812 = vmatpush1.bf16.msra.mxu1 %v7123_v35 }
 0x470   :  { %v3881_v5 = vpop.f32.mrb[28].mxu1 }
 0x471   :  { %v8376_v51 = vpop.f32.mrb[29].mxu1 }
 0x472   :  { %v3885_v40 = vpop.f32.mrb[30].mxu1 }
 0x473   :  { %v3886_v27 = vpop.f32.mrb[31].mxu1  ;;  %v7150_v40 = vld [vmem:[#allocation2 + $0x8c4] ss:$20 sps:$4 sm:$0x3f]  }
 0x477   :  { %v3124_v14 = vpop.f32.mrb[24].mxu0 }
 0x478   :  { %v3166_v41 = vadd.f32 %v3165_v23, %v3124_v14  ;;  %v3126_v30 = vpop.f32.mrb[25].mxu0 }
 0x479   :  { %v3168_v39 = vadd.f32 %v3167_v33, %v3126_v30  ;;  %v3128_v44 = vpop.f32.mrb[26].mxu0 }
 0x47a   :  { %v3129_v43 = vpop.f32.mrb[27].mxu0  ;;  %v7134_v44 = vld [vmem:[#allocation2 + $0x7d4] ss:$20 sps:$4 sm:$0xff]  }
 0x47b   :  { %v7132_v43 = vld [vmem:[#allocation2 + $0x7d0] ss:$20 sps:$4 sm:$0xff]  }
 0x483   :  { %v3246_v16 = vpop.f32.mrb[28].mxu0 }
 0x484   :  { %v8378_v20 = vadd.f32 %v6569_v8, %v3246_v16  ;;  %v6693_v47 = vpop.f32.mrb[29].mxu0  ;;  %v7135_v8 = vld [vmem:[#allocation2 + $0x870] ss:$20 sps:$4 sm:$0xff]   ;;  %v7147_v16 = vld [vmem:[#allocation2 + $0x848] ss:$20 sps:$4 sm:$0xff]  }
 0x485   :  { %v3249_v59 = vpop.f32.mrb[30].mxu0  ;;  %5835 = vmatpush1.bf16.msra.mxu0 %v7135_v8 }
 0x486   :  { %v6694_v49 = vpop.f32.mrb[31].mxu0  ;;  %5836 = vmatprep.subr.bf16.mxu0 %v7143_v45 }
 0x4b0   :  { %v3922_v17 = vpop.f32.mrb[32].mxu1 }
 0x4b1   :  { %v3923_v22 = vadd.f32 %v3922_v17, %v3166_v41  ;;  %v3924_v29 = vpop.f32.mrb[33].mxu1  ;;  %v7129_v41 = vld [vmem:[#allocation2 + $0x7a8] ss:$20 sps:$4 sm:$0xff]  }
 0x4b2   :  { %v3925_v6 = vadd.f32 %v3924_v29, %v3168_v39  ;;  %v3926_v36 = vpop.f32.mrb[34].mxu1  ;;  %v7158_v39 = vld [vmem:[#allocation2 + $0x5fc] ss:$20 sps:$4 sm:$0xff]  }
 0x4b3   :  { %v3927_v53 = vpop.f32.mrb[35].mxu1 }
 0x4bc   :  { %v8380_v24 = vpop.f32.mrb[36].mxu1 }
 0x4bd   :  { %v6703_v12 = vpop.f32.mrb[37].mxu1 }
 0x4be   :  { %v4047_v13 = vpop.f32.mrb[38].mxu1 }
 0x4bf   :  { %v6704_v61 = vpop.f32.mrb[39].mxu1 }
 0x4c3   :  { %v3840_v10 = vpop.f32.mrb[32].mxu0 }
 0x4c4   :  { %v3841_v2 = vadd.f32 %v3840_v10, %v8361_v42  ;;  %v3842_v7 = vpop.f32.mrb[33].mxu0  ;;  %v7128_v42 = vld [vmem:[#allocation2 + $0x784] ss:$20 sps:$4 sm:$0xff]  }
 0x4c5   :  { %v3843_v55 = vadd.f32 %v3842_v7, %v8366_v52  ;;  %v3844_v54 = vpop.f32.mrb[34].mxu0  ;;  %v7126_v52 = vld [vmem:[#allocation2 + $0x780] ss:$20 sps:$4 sm:$0xff]   ;;  %5813 = vmatprep.subr.bf16.mxu1 %v7128_v42 }
 0x4c6   :  { %v8384_v18 = vadd.f32 %v3881_v5, %v3841_v2  ;;  %v3845_v23 = vpop.f32.mrb[35].mxu0  ;;  %v7141_v5 = vld [vmem:[#allocation2 + $0x898] ss:$20 sps:$4 sm:$0xff]   ;;  %5814 = vmatpush1.bf16.msra.mxu1 %v7126_v52  ;;  %v7322_v54 = vmov 1983009808  }
 0x4c7   :  { %v8387_v33 = vadd.f32 %v8376_v51, %v3843_v55  ;;  %v7152_v51 = vld [vmem:[#allocation2 + $0x8c0] ss:$20 sps:$4 sm:$0x3f]   ;;  %5837 = vmatpush1.bf16.msra.mxu0 %v7141_v5  ;;  %5815 = vmatprep.subr.bf16.mxu1 %v7131_v57  ;;  %v4748_v23 = vunpack.c.l.s4 %v7322_v54  ;;  %v8409_v5 = vrot.slane %v5083_v38, %v7969_v28 }
 0x4c8   :  { %6521 = vmatprep.subr.msk.bf16.mxu0 %vm2992_vm9, %v7150_v40  ;;  %v5779_v30 = vsel %vm2992_vm9, %v7152_v51, 0 }
 0x4c9   :  { %v4749_v26 = vunpack.c.0.s8 %v4748_v23 }
 0x4ca   :  { %5816 = vmatpush1.bf16.msra.mxu1 %v7129_v41 }
 0x4cb   :  { %5839 = vmatpush1.bf16.msra.mxu0 %v5779_v30  ;;  %5817 = vmatprep.subr.bf16.mxu1 %v7134_v44  ;;  %v8400_v58 = vsub.s32 %v4749_v26, %v7441_v34  ;;  %v8420_v30 = vrot.slane %v5083_v38, %v7972_v63 }
 0x4cc   :  { %5875 = vmatprep.subr.bf16.mxu0 %v7158_v39 }
 0x4ce   :  { %5818 = vmatpush1.bf16.msra.mxu1 %v7132_v43 }
 0x4cf   :  { %v3963_v27 = vpop.f32.mrb[36].mxu0  ;;  %5819 = vmatprep.subr.bf16.mxu1 %v7140_v4 }
 0x4d0   :  { %v8389_v9 = vadd.f32 %v3963_v27, %v3923_v22  ;;  %v3965_v32 = vpop.f32.mrb[37].mxu0 }
 0x4d1   :  { %v8391_v19 = vadd.f32 %v3965_v32, %v3925_v6  ;;  %v3967_v14 = vpop.f32.mrb[38].mxu0 }
 0x4d2   :  { %v3968_v3 = vpop.f32.mrb[39].mxu0  ;;  %5820 = vmatpush1.bf16.msra.mxu1 %v7138_v48 }
 0x4d3   :  { %5821 = vmatprep.subr.bf16.mxu1 %v7146_v11 }
 0x4d6   :  { %5822 = vmatpush1.bf16.msra.mxu1 %v7144_v15 }
 0x4d7   :  { %5823 = vmatprep.subr.bf16.mxu1 %v7149_v37 }
 0x4da   :  { %5824 = vmatpush1.bf16.msra.mxu1 %v7147_v16 }
 0x4db   :  { %5916 = vmatprep.subr.bf16.mxu1 %v7155_v31 }
 0x4e4   :  { %v4670_v47 = vpop.f32.mrb[40].mxu1 }
 0x4e5   :  { %v4672_v59 = vpop.f32.mrb[41].mxu1 }
 0x4e6   :  { %v4744_v49 = vcombine.low %v4670_v47, %v4672_v59  ;;  %v4745_v46 = vcombine.high %v4670_v47, %v4672_v59  ;;  %v4674_v17 = vpop.f32.mrb[42].mxu1 }
 0x4e7   :  { %v4676_v22 = vpop.f32.mrb[43].mxu1 }
 0x4e8   :  { %v4779_v29 = vcombine.low %v4674_v17, %v4676_v22  ;;  %v4780_v6 = vcombine.high %v4674_v17, %v4676_v22  ;;  %v4753_v35 = vrot.slane %v4744_v49, %v8400_v58  ;;  %v4760_v52 = vrot.slane %v4745_v46, %v8400_v58 }
 0x4ea   :  { %v4795_v8 = vrot.slane %v4780_v6, %v8400_v58  ;;  %v4858_v14 = vrot.slane %v4753_v35, %v8400_v58  ;;  %v4788_v3 = vrot.slane %v4779_v29, %v8400_v58 }
 0x4ec   :  { %v4680_v36 = vpop.f32.mrb[44].mxu1  ;;  %v8417_v41 = vrot.slane %v4795_v8, %v8400_v58 }
 0x4ed   :  { %v4682_v53 = vpop.f32.mrb[45].mxu1 }
 0x4ee   :  { %v4814_v25 = vcombine.low %v4680_v36, %v4682_v53  ;;  %v4815_v50 = vcombine.high %v4680_v36, %v4682_v53  ;;  %v4684_v56 = vpop.f32.mrb[46].mxu1 }
 0x4ef   :  { %v6593_v12 = vpop.f32.mrb[40].mxu0  ;;  %v4685_v62 = vpop.f32.mrb[47].mxu1 }
 0x4f0   :  { %v6594_v13 = vpop.f32.mrb[41].mxu0  ;;  %v8426_v48 = vrot.slane %v4814_v25, %v8400_v58  ;;  %v8432_v49 = vrot.slane %v4815_v50, %v8400_v58 }
 0x4f1   :  { %v6595_v61 = vadd.f32 %v6594_v13, %v6593_v12  ;;  %v6596_v10 = vpop.f32.mrb[42].mxu0 }
 0x4f2   :  { %v6597_v2 = vpop.f32.mrb[43].mxu0 }
 0x4f3   :  { %v4005_v7 = vadd.f32 %v6595_v61, %v8378_v20  ;;  %v8406_v20 = vrot.slane %v5083_v38, %v7981_v60 }
 0x4f5   :  { %v8397_v55 = vadd.f32 %v8380_v24, %v4005_v7 }
 0x517   :  { %v4721_v21 = vpop.f32.mrb[44].mxu0 }
 0x518   :  { %v4746_v42 = vcombine.high %v4721_v21, %v4721_v21  ;;  %v4723_v45 = vpop.f32.mrb[45].mxu0  ;;  %v4767_v40 = vrot.slane %v4721_v21, %v8400_v58 }
 0x519   :  { %v4724_v24 = vpop.f32.mrb[46].mxu0 }
 0x51a   :  { %v4774_v51 = vrot.slane %v4746_v42, %v8400_v58  ;;  %v4781_v27 = vcombine.high %v4724_v24, %v4724_v24  ;;  %v4802_v57 = vrot.slane %v4724_v24, %v8400_v58  ;;  %v4726_v32 = vpop.f32.mrb[47].mxu0  ;;  %v4865_v16 = vrot.slane %v4767_v40, %v8400_v58 }
 0x51c   :  { %v4777_v39 = vcombine.low %v4760_v52, %v4774_v51  ;;  %v4778_v44 = vcombine.high %v4760_v52, %v4774_v51  ;;  %v6418_v43 = vcombine.low %v4774_v51, %v4774_v51  ;;  %v8423_v4 = vrot.slane %v4781_v27, %v8400_v58 }
 0x51d   :  { %v4810_v11 = vcombine.low %v4788_v3, %v4802_v57  ;;  %v4811_v15 = vcombine.high %v4788_v3, %v4802_v57  ;;  %v6421_v37 = vcombine.high %v4802_v57, %v4802_v57 }
 0x51e   :  { %v4872_v31 = vrot.slane %v4777_v39, %v8400_v58  ;;  %v4879_v47 = vrot.slane %v6418_v43, %v8400_v58  ;;  %v6419_v59 = vcombine.low %v4778_v44, %v4788_v3  ;;  %v4933_v22 = vrot.slane %v8423_v4, %v8400_v58 }
 0x51f   :  { %v6420_v46 = vcombine.high %v4774_v51, %v4810_v11  ;;  %v4906_v17 = vrot.slane %v4811_v15, %v8400_v58  ;;  %v4729_v29 = vpop.f32.mrb[48].mxu0  ;;  %v4913_v62 = vrot.slane %v6421_v37, %v8400_v58 }
 0x520   :  { %v4880_v6 = vcombine.low %v4858_v14, %v4872_v31  ;;  %v4881_v36 = vcombine.high %v4858_v14, %v4872_v31  ;;  %v4882_v53 = vcombine.low %v4865_v16, %v4879_v47  ;;  %v4892_v25 = vrot.slane %v6419_v59, %v8400_v58  ;;  %v4731_v56 = vpop.f32.mrb[49].mxu0 }
 0x521   :  { %v4899_v12 = vrot.slane %v6420_v46, %v8400_v58  ;;  %v4816_v13 = vcombine.high %v4729_v29, %v4729_v29  ;;  %v4837_v50 = vrot.slane %v4729_v29, %v8400_v58  ;;  %v4732_v61 = vpop.f32.mrb[50].mxu0 }
 0x522   :  { %v4997_v10 = vsel %vm2992_vm9, %v4880_v6, -inf  ;;  %v5004_v2 = vsel %vm2992_vm9, %v4881_v36, -inf  ;;  %v5012_v7 = vsel %vm5011_vm1, %v4882_v53, -inf  ;;  %v4914_v54 = vcombine.low %v4892_v25, %v4906_v17  ;;  %v4733_v23 = vpop.f32.mrb[51].mxu0 }
 0x523   :  { %v4998_v26 = vrot.slane %v4997_v10, 4  ;;  %v5005_v38 = vrot.slane %v5004_v2, 4  ;;  %v5013_v35 = vrot.slane %v5012_v7, 4  ;;  %v4915_v8 = vcombine.high %v4892_v25, %v4906_v17 }
 0x524   :  { %v4916_v21 = vcombine.low %v4899_v12, %v4913_v62  ;;  %v5019_v42 = vsel %vm2992_vm9, %v4914_v54, -inf  ;;  %v4844_v45 = vrot.slane %v4816_v13, %v8400_v58  ;;  %v4845_v52 = vcombine.low %v8426_v48, %v4837_v50 }
 0x525   :  { %v4999_v24 = vmax.f32 %v4997_v10, %v4998_v26  ;;  %v8447_v40 = vmax.f32 %v5004_v2, %v5005_v38  ;;  %v5014_v51 = vmax.f32 %v5012_v7, %v5013_v35  ;;  %v5020_v27 = vrot.slane %v5019_v42, 4 }
 0x526   :  { %v5026_v57 = vsel %vm2992_vm9, %v4915_v8, -inf  ;;  %v5033_v32 = vsel %vm5011_vm1, %v4916_v21, -inf  ;;  %v4846_v14 = vcombine.high %v8426_v48, %v4837_v50  ;;  %v4847_v3 = vcombine.low %v8432_v49, %v4844_v45 }
 0x527   :  { %v5000_v39 = vrot.slane %v4999_v24, 2  ;;  %v5015_v44 = vrot.slane %v5014_v51, 2  ;;  %v5021_v43 = vmax.f32 %v5019_v42, %v5020_v27  ;;  %v5027_v4 = vrot.slane %v5026_v57, 4 }
 0x528   :  { %v5034_v11 = vrot.slane %v5033_v32, 4  ;;  %v4848_v15 = vcombine.high %v8432_v49, %v4844_v45  ;;  %v6422_v37 = vcombine.low %v4837_v50, %v4837_v50  ;;  %v4940_v16 = vrot.slane %v4845_v52, %v8400_v58 }
 0x529   :  { %v5001_v31 = vmax.f32 %v4999_v24, %v5000_v39  ;;  %v5016_v47 = vmax.f32 %v5014_v51, %v5015_v44  ;;  %v5022_v59 = vrot.slane %v5021_v43, 2  ;;  %v5028_v46 = vmax.f32 %v5026_v57, %v5027_v4 }
 0x52a   :  { %v5035_v17 = vmax.f32 %v5033_v32, %v5034_v11  ;;  %v4947_v29 = vrot.slane %v6422_v37, %v8400_v58  ;;  %v4948_v48 = vcombine.low %v8417_v41, %v4940_v16  ;;  %v4949_v6 = vcombine.high %v8417_v41, %v4940_v16 }
 0x52b   :  { %v5002_v36 = vrot.slane %v5001_v31, 1  ;;  %v5017_v53 = vrot.slane %v5016_v47, 1  ;;  %v5023_v25 = vmax.f32 %v5021_v43, %v5022_v59  ;;  %v5029_v56 = vrot.slane %v5028_v46, 2 }
 0x52c   :  { %v5036_v12 = vrot.slane %v5035_v17, 2  ;;  %v4950_v62 = vcombine.low %v4933_v22, %v4947_v29  ;;  %v6423_v13 = vcombine.low %v4846_v14, %v8432_v49  ;;  %v6424_v61 = vcombine.high %v4837_v50, %v4847_v3 }
 0x52d   :  { %v8459_v10 = vmax.f32 %v5001_v31, %v5002_v36  ;;  %v5018_v2 = vmax.f32 %v5016_v47, %v5017_v53  ;;  %v5024_v7 = vrot.slane %v5023_v25, 1  ;;  %v5030_v54 = vmax.f32 %v5028_v46, %v5029_v56 }
 0x52e   :  { %v5037_v23 = vmax.f32 %v5035_v17, %v5036_v12  ;;  %v6425_v26 = vcombine.high %v4844_v45, %v4844_v45  ;;  %v4960_v38 = vrot.slane %v6423_v13, %v8400_v58  ;;  %v4967_v41 = vrot.slane %v6424_v61, %v8400_v58 }
 0x52f   :  { %v5102_v35 = vadd.f32 %v8406_v20, %v5018_v2  ;;  %v5025_v8 = vmax.f32 %v5023_v25, %v5024_v7  ;;  %v5031_v21 = vrot.slane %v5030_v54, 1  ;;  %v4974_v22 = vrot.slane %v4848_v15, %v8400_v58 }
 0x530   :  { %v5038_v42 = vrot.slane %v5037_v23, 1  ;;  %v4981_v49 = vrot.slane %v6425_v26, %v8400_v58  ;;  %v5040_v50 = vsel %vm2992_vm9, %v4948_v48, -inf  ;;  %v5047_v52 = vsel %vm2992_vm9, %v4949_v6, -inf }
 0x531   :  { %v5114_v24 = vpack.c.bf16 %v5102_v35, %v5102_v35  ;;  %v5103_v45 = vadd.f32 %v8409_v5, %v5025_v8  ;;  %v4982_v51 = vcombine.low %v4960_v38, %v4974_v22  ;;  %v4983_v27 = vcombine.high %v4960_v38, %v4974_v22 }
 0x532   :  { %v5039_v57 = vmax.f32 %v5037_v23, %v5038_v42  ;;  %v4984_v32 = vcombine.low %v4967_v41, %v4981_v49  ;;  %v5041_v14 = vrot.slane %v5040_v50, 4  ;;  %v5048_v3 = vrot.slane %v5047_v52, 4 }
 0x533   :  { %v8469_v39 = vunpack.c.l.b16 %v5114_v24  ;;  %v5115_v44 = vpack.c.bf16 %v5103_v45, %v5103_v45  ;;  %v5054_v43 = vsel %vm5011_vm1, %v4950_v62, -inf  ;;  %v5061_v58 = vsel %vm2992_vm9, %v4982_v51, -inf }
 0x534   :  { %v5105_v4 = vadd.f32 %v8406_v20, %v5039_v57  ;;  %v5042_v11 = vmax.f32 %v5040_v50, %v5041_v14  ;;  %v5049_v15 = vmax.f32 %v5047_v52, %v5048_v3  ;;  %v5055_v37 = vrot.slane %v5054_v43, 4 }
 0x535   :  { %v8474_v16 = vunpack.c.l.b16 %v5115_v44  ;;  %v5062_v31 = vrot.slane %v5061_v58, 4  ;;  %v5068_v47 = vsel %vm2992_vm9, %v4983_v27, -inf  ;;  %v5075_v59 = vsel %vm5011_vm1, %v4984_v32, -inf }
 0x536   :  { %v5117_v46 = vpack.c.bf16 %v5105_v4, %v5105_v4  ;;  %v5043_v17 = vrot.slane %v5042_v11, 2  ;;  %v5056_v29 = vmax.f32 %v5054_v43, %v5055_v37  ;;  %v5069_v48 = vrot.slane %v5068_v47, 4 }
 0x537   :  { %v5263_v6 = vrot.slane %v8474_v16, 7  ;;  %v5063_v36 = vmax.f32 %v5061_v58, %v5062_v31  ;;  %v5076_v53 = vrot.slane %v5075_v59, 4  ;;  %v5007_v25 = vrot.slane %v8447_v40, 2 }
 0x538   :  { %v8480_v56 = vunpack.c.l.b16 %v5117_v46  ;;  %v5044_v12 = vmax.f32 %v5042_v11, %v5043_v17  ;;  %v5057_v62 = vrot.slane %v5056_v29, 2  ;;  %v5070_v13 = vmax.f32 %v5068_v47, %v5069_v48 }
 0x539   :  { %v5064_v61 = vrot.slane %v5063_v36, 2  ;;  %v5077_v2 = vmax.f32 %v5075_v59, %v5076_v53  ;;  %v5008_v7 = vmax.f32 %v8447_v40, %v5007_v25  ;;  %v5032_v23 = vmax.f32 %v5030_v54, %v5031_v21 }
 0x53a   :  { %v5275_v26 = vrot.slane %v8480_v56, 7  ;;  %v5045_v38 = vrot.slane %v5044_v12, 1  ;;  %v5058_v41 = vmax.f32 %v5056_v29, %v5057_v62  ;;  %v5050_v35 = vrot.slane %v5049_v15, 2 }
 0x53b   :  { %v5065_v8 = vmax.f32 %v5063_v36, %v5064_v61  ;;  %v5078_v22 = vrot.slane %v5077_v2, 2  ;;  %v5009_v42 = vrot.slane %v5008_v7, 1  ;;  %v5071_v49 = vrot.slane %v5070_v13, 2 }
 0x53c   :  { %v5046_v50 = vmax.f32 %v5044_v12, %v5045_v38  ;;  %v5059_v52 = vrot.slane %v5058_v41, 1  ;;  %v5051_v24 = vmax.f32 %v5049_v15, %v5050_v35  ;;  %v5104_v45 = vadd.f32 %v8420_v30, %v5032_v23 }
 0x53d   :  { %v5066_v51 = vrot.slane %v5065_v8, 1  ;;  %v5079_v27 = vmax.f32 %v5077_v2, %v5078_v22  ;;  %v5010_v57 = vmax.f32 %v5008_v7, %v5009_v42  ;;  %v5072_v32 = vmax.f32 %v5070_v13, %v5071_v49 }
 0x53e   :  { %v5060_v40 = vmax.f32 %v5058_v41, %v5059_v52  ;;  %v5052_v54 = vrot.slane %v5051_v24, 1  ;;  %v5116_v21 = vpack.c.bf16 %v5104_v45, %v5104_v45  ;;  %v5100_v14 = vadd.f32 %v8409_v5, %v8459_v10 }
 0x53f   :  { %v5067_v3 = vmax.f32 %v5065_v8, %v5066_v51  ;;  %v5080_v44 = vrot.slane %v5079_v27, 1  ;;  %v5073_v43 = vrot.slane %v5072_v32, 1  ;;  %v5101_v58 = vadd.f32 %v8420_v30, %v5010_v57 }
 0x540   :  { %v5108_v4 = vadd.f32 %v8406_v20, %v5060_v40  ;;  %v5053_v11 = vmax.f32 %v5051_v24, %v5052_v54  ;;  %v5255_v15 = vunpack.c.l.b16 %v5116_v21  ;;  %v5106_v37 = vadd.f32 %v8409_v5, %v5046_v50  ;;  %v7161_v21 = vld [vmem:[#allocation2 + $0x8a4] ss:$20 sps:$4 sm:$0xff]  }
 0x541   :  { %v5081_v31 = vmax.f32 %v5079_v27, %v5080_v44  ;;  %v5074_v47 = vmax.f32 %v5072_v32, %v5073_v43  ;;  %v5113_v59 = vpack.c.bf16 %v5101_v58, %v5101_v58  ;;  %v5109_v46 = vadd.f32 %v8409_v5, %v5067_v3  ;;  %v7156_v32 = vld [vmem:[#allocation2 + $0x5f8] ss:$20 sps:$4 sm:$0xff]   ;;  %v7162_v3 = vld [vmem:[#allocation2 + $0x620] ss:$20 sps:$4 sm:$0xff]  }
 0x542   :  { %v5120_v17 = vpack.c.bf16 %v5108_v4, %v5108_v4  ;;  %v5107_v29 = vadd.f32 %v8420_v30, %v5053_v11  ;;  %v5269_v10 = vrot.slane %v5255_v15, 7  ;;  %v5112_v48 = vpack.c.bf16 %v5100_v14, %v5100_v14  ;;  %v7164_v14 = vld [vmem:[#allocation2 + $0x624] ss:$20 sps:$4 sm:$0xff]   ;;  %v7159_v44 = vld [vmem:[#allocation2 + $0x8a0] ss:$20 sps:$4 sm:$0xff]  }
 0x543   :  { %v5111_v36 = vadd.f32 %v8406_v20, %v5081_v31  ;;  %v5110_v53 = vadd.f32 %v8420_v30, %v5074_v47  ;;  %v5252_v25 = vunpack.c.l.b16 %v5113_v59  ;;  %v5118_v56 = vpack.c.bf16 %v5106_v37, %v5106_v37  ;;  %v7169_v43 = vld [vmem:[#allocation2 + $0x64c] ss:$20 sps:$4 sm:$0xff]   ;;  %v7170_v4 = vld [vmem:[#allocation2 + $0x8c8] ss:$20 sps:$4 sm:$0x3f]  }
 0x544   :  { %v5259_v12 = vunpack.c.l.b16 %v5120_v17  ;;  %v5119_v62 = vpack.c.bf16 %v5107_v29, %v5107_v29  ;;  %v5121_v13 = vpack.c.bf16 %v5109_v46, %v5109_v46  ;;  %v5251_v61 = vunpack.c.l.b16 %v5112_v48  ;;  %v7165_v58 = vld [vmem:[#allocation2 + $0x8cc] ss:$20 sps:$4 sm:$0x3f]   ;;  %v7167_v11 = vld [vmem:[#allocation2 + $0x648] ss:$20 sps:$4 sm:$0xff]  }
 0x545   :  { %v5123_v2 = vpack.c.bf16 %v5111_v36, %v5111_v36  ;;  %v5122_v7 = vpack.c.bf16 %v5110_v53, %v5110_v53  ;;  %v5270_v23 = vsel %vm2475_vm11, %v5269_v10, %v5252_v25  ;;  %v5257_v5 = vunpack.c.l.b16 %v5118_v56  ;;  %v7174_v15 = vld [vmem:[#allocation2 + $0x674] ss:$20 sps:$4 sm:$0xff]   ;;  %v7172_v47 = vld [vmem:[#allocation2 + $0x670] ss:$20 sps:$4 sm:$0xff]   ;;  %v7189_v25 = vld [vmem:[#allocation2 + $0x6ec] ss:$20 sps:$4 sm:$0xff]  }
 0x546   :  { %v5277_v38 = vrot.slane %v5259_v12, 6  ;;  %v5258_v41 = vunpack.c.l.b16 %v5119_v62  ;;  %v5260_v35 = vunpack.c.l.b16 %v5121_v13  ;;  %v5264_v20 = vsel %vm2475_vm11, %v5263_v6, %v5251_v61  ;;  %v7171_v31 = vld [vmem:[#allocation2 + $0x740] ss:$20 sps:$4 sm:$0xff]   ;;  %v7176_v46 = vld [vmem:[#allocation2 + $0x768] ss:$20 sps:$4 sm:$0xff]  }
 0x547   :  { %v5262_v8 = vunpack.c.l.b16 %v5123_v2  ;;  %v5261_v30 = vunpack.c.l.b16 %v5122_v7  ;;  %v5265_v22 = vrot.slane %v5257_v5, 6  ;;  %v5276_v42 = vsel %vm2475_vm11, %v5275_v26, %v8469_v39  ;;  %v7153_v26 = vld [vmem:[#allocation2 + $0x878] ss:$20 sps:$4 sm:$0xff]   ;;  %v7175_v59 = vld [vmem:[#allocation2 + $0x600] ss:$20 sps:$4 sm:$0xff]  }
 0x548   :  { %v5271_v49 = vrot.slane %v5258_v41, 6  ;;  %v5267_v50 = vrot.slane %v5260_v35, 5  ;;  %v5278_v52 = vsel %vm2478_vm12, %v5277_v38, %v5276_v42  ;;  %v5785_v37 = vsel %vm2992_vm9, %v7170_v4, 0  ;;  %v7179_v17 = vld [vmem:[#allocation2 + $0x69c] ss:$20 sps:$4 sm:$0xff]  }
 0x549   :  { %v5273_v24 = vrot.slane %v5261_v30, 5  ;;  %v5266_v45 = vsel %vm2478_vm12, %v5265_v22, %v5264_v20  ;;  %v5279_v51 = vrot.slane %v5262_v8, 5  ;;  %v7180_v29 = vld [vmem:[#allocation2 + $0x628] ss:$20 sps:$4 sm:$0xff]   ;;  %v7184_v10 = vld [vmem:[#allocation2 + $0x6c4] ss:$20 sps:$4 sm:$0xff]  }
 0x54a   :  { %v5272_v27 = vsel %vm2478_vm12, %v5271_v49, %v5270_v23  ;;  %v5268_v16 = vsel %vm2481_vm13, %v5267_v50, %v5266_v45  ;;  %v7181_v48 = vld [vmem:[#allocation2 + $0x790] ss:$20 sps:$4 sm:$0xff]   ;;  %v7182_v36 = vld [vmem:[#allocation2 + $0x6c0] ss:$20 sps:$4 sm:$0xff]   ;;  %v7186_v56 = vld [vmem:[#allocation2 + $0x7b8] ss:$20 sps:$4 sm:$0xff]  }
 0x54b   :  { %v5274_v6 = vsel %vm2481_vm13, %v5273_v24, %v5272_v27  ;;  %v8505_v57 = vpack.c.b16 %v5268_v16, %v5268_v16  ;;  %v5280_v40 = vsel %vm2481_vm13, %v5279_v51, %v5278_v52  ;;  %v7185_v53 = vld [vmem:[#allocation2 + $0x650] ss:$20 sps:$4 sm:$0xff]   ;;  %v7187_v12 = vld [vmem:[#allocation2 + $0x6e8] ss:$20 sps:$4 sm:$0xff]   ;;  %v7190_v62 = vld [vmem:[#allocation2 + $0x678] ss:$20 sps:$4 sm:$0xff]  }
 0x54c   :  { %v5282_v39 = vpack.c.b16 %v5274_v6, %v5274_v6  ;;  %v8508_v54 = vpack.c.b16 %v5280_v40, %v5280_v40  ;;  %v7194_v13 = vld [vmem:[#allocation2 + $0x714] ss:$20 sps:$4 sm:$0xff]   ;;  %v7192_v2 = vld [vmem:[#allocation2 + $0x710] ss:$20 sps:$4 sm:$0xff]   ;;  %v7197_v38 = vld [vmem:[#allocation2 + $0x738] ss:$20 sps:$4 sm:$0xff]  }
 0x54d   :  { %v7191_v61 = vld [vmem:[#allocation2 + $0x7e0] ss:$20 sps:$4 sm:$0xff]   ;;  %v7199_v23 = vld [vmem:[#allocation2 + $0x73c] ss:$20 sps:$4 sm:$0xff]   ;;  %v7204_v35 = vld [vmem:[#allocation2 + $0x764] ss:$20 sps:$4 sm:$0xff]  }
 0x54e   :  { %5825 = vmatprep.mubr.bf16.mxu1 %v5282_v39  ;;  %6522 = vmatmul.mubr.msk.bf16.vlgmr.msra.gmra.mrb[52].mxu0 %vm882_vm10, %v8508_v54  ;;  %v7195_v7 = vld [vmem:[#allocation2 + $0x6a0] ss:$20 sps:$4 sm:$0xff]   ;;  %v7196_v5 = vld [vmem:[#allocation2 + $0x808] ss:$20 sps:$4 sm:$0xff]   ;;  %v7201_v20 = vld [vmem:[#allocation2 + $0x830] ss:$20 sps:$4 sm:$0xff]  }
 0x54f   :  { %5826 = vmatmul.mubr.bf16.vlgmr.msra.gmra.mrb[48].mxu1 %v8505_v57  ;;  %5876 = vmatpush1.bf16.msra.mxu0 %v7156_v32  ;;  %v7200_v41 = vld [vmem:[#allocation2 + $0x6c8] ss:$20 sps:$4 sm:$0xff]   ;;  %v7202_v8 = vld [vmem:[#allocation2 + $0x760] ss:$20 sps:$4 sm:$0xff]   ;;  %v7205_v30 = vld [vmem:[#allocation2 + $0x6f0] ss:$20 sps:$4 sm:$0xff]  }
 0x550   :  { %5917 = vmatpush1.bf16.msra.mxu1 %v7153_v26  ;;  %5907 = vmatprep.mubr.bf16.mxu0 %v5282_v39  ;;  %v7209_v22 = vld [vmem:[#allocation2 + $0x78c] ss:$20 sps:$4 sm:$0xff]   ;;  %v7207_v49 = vld [vmem:[#allocation2 + $0x788] ss:$20 sps:$4 sm:$0xff]   ;;  %v7211_v24 = vld [vmem:[#allocation2 + $0x7b0] ss:$20 sps:$4 sm:$0xff]  }
 0x551   :  { %5918 = vmatprep.subr.bf16.mxu1 %v7161_v21  ;;  %5877 = vmatprep.subr.bf16.mxu0 %v7164_v14  ;;  %v7206_v42 = vld [vmem:[#allocation2 + $0x858] ss:$20 sps:$4 sm:$0xff]   ;;  %v7213_v52 = vld [vmem:[#allocation2 + $0x7b4] ss:$20 sps:$4 sm:$0xff]   ;;  %v7216_v45 = vld [vmem:[#allocation2 + $0x7dc] ss:$20 sps:$4 sm:$0xff]  }
 0x552   :  { %5948 = vmatprep.mubr.bf16.mxu1 %v7315_v0  ;;  %v7177_v0 = vld [vmem:[#allocation2 + $0x698] ss:$20 sps:$4 sm:$0xff]   ;;  %v7217_v16 = vld [vmem:[#allocation2 + $0x800] ss:$20 sps:$4 sm:$0xff]   ;;  %v7220_v32 = vld [vmem:[#allocation2 + $0x828] ss:$20 sps:$4 sm:$0xff]  }
 0x553   :  { %5878 = vmatpush1.bf16.msra.mxu0 %v7162_v3  ;;  %v7210_v50 = vld [vmem:[#allocation2 + $0x718] ss:$20 sps:$4 sm:$0xff]   ;;  %v7225_v40 = vld [vmem:[#allocation2 + $0x854] ss:$20 sps:$4 sm:$0xff]  }
 0x554   :  { %5919 = vmatpush1.bf16.msra.mxu1 %v7159_v44  ;;  %5879 = vmatprep.subr.bf16.mxu0 %v7169_v43  ;;  %v7214_v51 = vld [vmem:[#allocation2 + $0x7d8] ss:$20 sps:$4 sm:$0xff]   ;;  %v7226_v26 = vld [vmem:[#allocation2 + $0x880] ss:$20 sps:$4 sm:$0xff]   ;;  %v7227_v21 = vld [vmem:[#allocation2 + $0x8a8] ss:$20 sps:$4 sm:$0xff]  }
 0x555   :  { %6523 = vmatprep.subr.msk.bf16.mxu1 %vm2992_vm9, %v7165_v58  ;;  %v7219_v27 = vld [vmem:[#allocation2 + $0x804] ss:$20 sps:$4 sm:$0xff]   ;;  %v7222_v6 = vld [vmem:[#allocation2 + $0x82c] ss:$20 sps:$4 sm:$0xff]  }
 0x556   :  { %v7228_v14 = vld [vmem:[#allocation2 + $0x8d0] ss:$20 sps:$4 sm:$0x3f]  }
 0x557   :  { %5880 = vmatpush1.bf16.msra.mxu0 %v7167_v11  ;;  %v5791_v3 = vsel %vm2992_vm9, %v7228_v14, 0  ;;  %v6043_v44 = vld [vmem:[#allocation5 + $0x3] ss:$4 sm:$0x1f] }
 0x558   :  { %5921 = vmatpush1.bf16.msra.mxu1 %v5785_v37  ;;  %5881 = vmatprep.subr.bf16.mxu0 %v7174_v15  ;;  %v6048_v15 = vrot.slane %v6043_v44, %v7969_v28 }
 0x559   :  { %6603 = vmatprep.subr.bf16.mxu1 %v7171_v31 }
 0x55b   :  { %6524 = vmatmul.mubr.msk.bf16.vlgmr.msra.gmra.mrb[52].mxu1 %vm882_vm10, %v8508_v54  ;;  %5882 = vmatpush1.bf16.msra.mxu0 %v7172_v47 }
 0x55c   :  { %6604 = vmatpush3.bf16.msra.mxu1 %v7175_v59  ;;  %5989 = vmatprep.mubr.bf16.mxu1 %v5282_v39  ;;  %v7223_v39 = vld [vmem:[#allocation2 + $0x850] ss:$20 sps:$4 sm:$0xff]   ;;  %v6052_v59 = vrot.slane %v6043_v44, %v7972_v63 }
 0x55d   :  { %6605 = vmatprep.subr.bf16.mxu1 %v7176_v46  ;;  %5883 = vmatprep.subr.bf16.mxu0 %v7179_v17 }
 0x55f   :  { %5884 = vmatpush1.bf16.msra.mxu0 %v7177_v0 }
 0x560   :  { %6606 = vmatpush3.bf16.msra.mxu1 %v7180_v29  ;;  %5885 = vmatprep.subr.bf16.mxu0 %v7184_v10 }
 0x561   :  { %6607 = vmatprep.subr.bf16.mxu1 %v7181_v48 }
 0x563   :  { %5886 = vmatpush1.bf16.msra.mxu0 %v7182_v36 }
 0x564   :  { %6608 = vmatpush3.bf16.msra.mxu1 %v7185_v53  ;;  %5887 = vmatprep.subr.bf16.mxu0 %v7189_v25 }
 0x565   :  { %6609 = vmatprep.subr.bf16.mxu1 %v7186_v56 }
 0x567   :  { %5888 = vmatpush1.bf16.msra.mxu0 %v7187_v12 }
 0x568   :  { %6610 = vmatpush3.bf16.msra.mxu1 %v7190_v62  ;;  %5889 = vmatprep.subr.bf16.mxu0 %v7194_v13 }
 0x569   :  { %6611 = vmatprep.subr.bf16.mxu1 %v7191_v61  ;;  %v6059_v61 = vsub.s32 3, %v7441_v34 }
 0x56b   :  { %5890 = vmatpush1.bf16.msra.mxu0 %v7192_v2 }
 0x56c   :  { %6612 = vmatpush3.bf16.msra.mxu1 %v7195_v7  ;;  %5891 = vmatprep.subr.bf16.mxu0 %v7199_v23  ;;  %v6056_v7 = vrot.slane %v6043_v44, %v7981_v60 }
 0x56d   :  { %6613 = vmatprep.subr.bf16.mxu1 %v7196_v5 }
 0x56f   :  { %5892 = vmatpush1.bf16.msra.mxu0 %v7197_v38  ;;  %v6060_v38 = vrot.slane %v6043_v44, %v6059_v61 }
 0x570   :  { %6614 = vmatpush3.bf16.msra.mxu1 %v7200_v41  ;;  %5893 = vmatprep.subr.bf16.mxu0 %v7204_v35 }
 0x571   :  { %6615 = vmatprep.subr.bf16.mxu1 %v7201_v20 }
 0x573   :  { %5894 = vmatpush1.bf16.msra.mxu0 %v7202_v8 }
 0x574   :  { %6616 = vmatpush3.bf16.msra.mxu1 %v7205_v30  ;;  %5895 = vmatprep.subr.bf16.mxu0 %v7209_v22 }
 0x575   :  { %6617 = vmatprep.subr.bf16.mxu1 %v7206_v42  ;;  %v6063_v42 = vsub.s32 4, %v7441_v34 }
 0x577   :  { %5896 = vmatpush1.bf16.msra.mxu0 %v7207_v49 }
 0x578   :  { %6618 = vmatpush3.bf16.msra.mxu1 %v7210_v50  ;;  %5897 = vmatprep.subr.bf16.mxu0 %v7213_v52  ;;  %v6064_v52 = vrot.slane %v6043_v44, %v6063_v42 }
 0x57b   :  { %5990 = vmatmul.mubr.bf16.vlgmr.msra.gmra.mrb[56].mxu1 %v8505_v57  ;;  %5898 = vmatpush1.bf16.msra.mxu0 %v7211_v24 }
 0x57c   :  { %5899 = vmatprep.subr.bf16.mxu0 %v7216_v45 }
 0x57f   :  { %5900 = vmatpush1.bf16.msra.mxu0 %v7214_v51 }
 0x580   :  { %5901 = vmatprep.subr.bf16.mxu0 %v7219_v27 }
 0x583   :  { %5902 = vmatpush1.bf16.msra.mxu0 %v7217_v16 }
 0x584   :  { %5903 = vmatprep.subr.bf16.mxu0 %v7222_v6 }
 0x587   :  { %5904 = vmatpush1.bf16.msra.mxu0 %v7220_v32 }
 0x588   :  { %5905 = vmatprep.subr.bf16.mxu0 %v7225_v40 }
 0x58b   :  { %5906 = vmatpush1.bf16.msra.mxu0 %v7223_v39 }
 0x58c   :  { %6705 = vmatprep.subr.bf16.mxu0 %v7316_v1 }
 0x58e   :  { %5908 = vmatmul.mubr.bf16.vlgmr.msra.gmra.mrb[56].mxu0 %v8505_v57 }
 0x58f   :  { %6706 = vmatpush3.bf16.msra.mxu0 %v7226_v26  ;;  %6711 = vmatprep.mubr.msk.bf16.mxu0 %vm7317_vm0, %v7316_v1 }
 0x590   :  { %6707 = vmatprep.subr.bf16.mxu0 %v7316_v1 }
 0x593   :  { %6708 = vmatpush3.bf16.msra.mxu0 %v7227_v21 }
 0x594   :  { %6709 = vmatprep.subr.bf16.mxu0 %v7316_v1 }
 0x597   :  { %6710 = vmatpush3.bf16.msra.mxu0 %v5791_v3 }
 0x59a   :  { %6712 = vmatmul.mubr.msk.bf16.vlgmr.msra.gmra.mrb[60].mxu0 %vm882_vm10, %v8508_v54 }
 0x621   :  { %v5868_v43 = vpop.f32.mrb[52].mxu0 }
 0x622   :  { %v5827_v57 = vpop.f32.mrb[48].mxu1  ;;  %v5870_v58 = vpop.f32.mrb[53].mxu0 }
 0x623   :  { %v5829_v4 = vpop.f32.mrb[49].mxu1  ;;  %v5869_v11 = vadd.f32 %v5868_v43, %v5827_v57  ;;  %v5872_v37 = vpop.f32.mrb[54].mxu0 }
 0x624   :  { %v5831_v31 = vpop.f32.mrb[50].mxu1  ;;  %v5871_v47 = vadd.f32 %v5870_v58, %v5829_v4  ;;  %v5873_v1 = vpop.f32.mrb[55].mxu0 }
 0x625   :  { %v6037_v46 = vadd.f32 %v5869_v11, %v8384_v18  ;;  %v5832_v17 = vpop.f32.mrb[51].mxu1 }
 0x626   :  { %v6038_v0 = vadd.f32 %v5871_v47, %v8387_v33 }
 0x627   :  { %v6070_v54 = vadd.f32 %v6048_v15, %v6037_v46 }
 0x628   :  { %v6071_v29 = vadd.f32 %v6052_v59, %v6038_v0 }
 0x629   :  { %7229 = vtanh.f32 %v6070_v54 }
 0x62a   :  { %7231 = vtanh.f32 %v6071_v29 }
 0x62e   :  { %v5950_v10 = vpop.f32.mrb[52].mxu1 }
 0x62f   :  { %v5952_v48 = vpop.f32.mrb[53].mxu1 }
 0x630   :  { %v5954_v36 = vpop.f32.mrb[54].mxu1 }
 0x631   :  { %v5955_v53 = vpop.f32.mrb[55].mxu1 }
 0x633   :  { %v7230_v28 = vpop.eup %7229 }
 0x634   :  { %v7232_v25 = vpop.eup %7231 }
 0x635   :  { %v6084_v56 = vcombine.low %v7230_v28, %v7232_v25 }
 0x637   :  { %6088 = vst [vmem:[#allocation7] sm:$0xff] %v6084_v56 }
 0x64e   :  { %v6619_v12 = vpop.f32.mrb[56].mxu1 }
 0x64f   :  { %v6620_v63 = vpop.f32.mrb[57].mxu1 }
 0x650   :  { %v6621_v62 = vadd.f32 %v6620_v63, %v6619_v12  ;;  %v6622_v13 = vpop.f32.mrb[58].mxu1 }
 0x651   :  { %v6623_v18 = vpop.f32.mrb[59].mxu1 }
 0x661   :  { %v5909_v33 = vpop.f32.mrb[56].mxu0 }
 0x662   :  { %v5951_v2 = vadd.f32 %v5950_v10, %v5909_v33  ;;  %v5911_v23 = vpop.f32.mrb[57].mxu0 }
 0x663   :  { %v5953_v5 = vadd.f32 %v5952_v48, %v5911_v23  ;;  %v5913_v41 = vpop.f32.mrb[58].mxu0 }
 0x664   :  { %v6039_v35 = vadd.f32 %v5951_v2, %v8389_v9  ;;  %v5914_v20 = vpop.f32.mrb[59].mxu0 }
 0x665   :  { %v6040_v8 = vadd.f32 %v5953_v5, %v8391_v19 }
 0x666   :  { %v6072_v30 = vadd.f32 %v6056_v7, %v6039_v35 }
 0x667   :  { %v6073_v22 = vadd.f32 %v6060_v38, %v6040_v8 }
 0x668   :  { %7233 = vtanh.f32 %v6072_v30 }
 0x669   :  { %7235 = vtanh.f32 %v6073_v22 }
 0x66d   :  { %v6031_v49 = vpop.f32.mrb[60].mxu0 }
 0x66e   :  { %v6032_v50 = vadd.f32 %v6621_v62, %v6031_v49  ;;  %v6713_v24 = vpop.f32.mrb[61].mxu0 }
 0x66f   :  { %v6034_v60 = vpop.f32.mrb[62].mxu0 }
 0x670   :  { %v6041_v45 = vadd.f32 %v6032_v50, %v8397_v55  ;;  %v6714_v51 = vpop.f32.mrb[63].mxu0 }
 0x672   :  { %v7234_v27 = vpop.eup %7233  ;;  %v6074_v16 = vadd.f32 %v6064_v52, %v6041_v45 }
 0x673   :  { %v7236_v9 = vpop.eup %7235 }
 0x674   :  { %7237 = vtanh.f32 %v6074_v16  ;;  %v6085_v6 = vcombine.low %v7234_v27, %v7236_v9 }
 0x676   :  { %6089 = vst [vmem:[#allocation7 + $0x8] sm:$0xff] %v6085_v6 }
 0x67e   :  { %v7238_v19 = vpop.eup %7237 }
 0x67f   :  { %6090 = vst [vmem:[#allocation7 + $0x10] sm:$0xf] %v7238_v19 }
 0x680   :  { %7294 = shalt.err (!%p7291_p6)
}
 0x681   :  { %s7295_s14 = scalar_lea.hbm %s8555_s5, 320 }
 0x682   :  { %p7296_p7 = scmp.ne.s32.totalorder %s8555_s5, %s7295_s14  ;;  %p7299_p8 = scmp.lt.u32.totalorder %s7295_s14, %s8555_s5 }
 0x684   :  { %p7301_p9 = pnand %p7299_p8, %p7296_p7 }
 0x686   :  { %7304 = shalt.err (!%p7301_p9)
}
 0x687   :  { %6100 = dma.vmem_to_hbm [thread:$0]  %s6098_s10, 320, %s8555_s5, [#allocation4]  }
 0x688   :  { %7309 = dma.done.wait [#allocation4], 320  }
 0x689   :  { %7310 = vsyncadd [#allocation4], 4294966976 }
 0x68a   :  { %6104 = vsyncpa [#allocation3], 1 }
 0x68b   :  { %6105 = vsyncpa [#allocation6], 1 }
 0x68c   :  { %6106 = vsyncpa [#allocation4], 1 }

</bundles_post_ra>
